<compile_context>
chip_gen: v7x
topology: tpu7x:2x2x1
jax: 0.10.0
libtpu: 0.0.40
codegen_flags: <defaults>
</compile_context>

<pallas_src>
import jax
import jax.numpy as jnp
from jax.experimental import pallas as pl
from jax.experimental.pallas import tpu as pltpu

LN_EPS = 1e-5                      # nn.LayerNorm default
PREC = jax.lax.Precision.HIGHEST   # for the pure-JAX reference only


# ----------------------------------------------------------------------------
# In-kernel helpers.  Canonical activation layout: (Bblk, T*N, C) with rows
# ordered (batch, time, vertex); all math in f32, matmul operands cast to `dt`.
# ----------------------------------------------------------------------------
def _temporal_glu(x, w_ref, bc_ref, a_ref, ab_ref, Kt, N, dt):
    """CausalConv2d (Kt,1) + Align residual + GLU.  x: (Bblk, T*N, Cin)."""
    Bblk, R, Cin = x.shape
    T = R // N
    T_out = T - Kt + 1
    R_out = T_out * N
    rows = Bblk * R_out
    Cout = a_ref.shape[1]

    acc = jnp.zeros((rows, 2 * Cout), jnp.float32)
    for k in range(Kt):  # Kt tiny; contiguous row-window slices, accumulated MXU calls
        xk = x[:, k * N:k * N + R_out, :].reshape(rows, Cin)
        acc = acc + jnp.dot(xk.astype(dt), w_ref[k].astype(dt),
                            preferred_element_type=jnp.float32)
    acc = acc + bc_ref[0]

    # residual path: align(x)[:, Kt-1:, :]
    xr = x[:, (Kt - 1) * N:(Kt - 1) * N + R_out, :].reshape(rows, Cin)
    x_in = jnp.dot(xr.astype(dt), a_ref[...].astype(dt),
                   preferred_element_type=jnp.float32) + ab_ref[0]

    p = acc[:, :Cout] + x_in
    q = acc[:, Cout:]
    return (p * jax.nn.sigmoid(q)).reshape(Bblk, R_out, Cout)   # GLU


def _graph_conv_relu(x, a_ref, ab_ref, kron_ref, w_ref, b_ref, dt):
    """x_al = align(x); relu(gso @ x_al @ W + b + x_al).

    The vertex mix is one MXU call with the block-diagonal I_{Bblk*T} (x) gso
    operator, so the slab never changes layout (no transposes / lane reshapes).
    """
    Bblk, R, Cin = x.shape
    Cout = a_ref.shape[1]
    rows = Bblk * R
    x_al = jnp.dot(x.reshape(rows, Cin).astype(dt), a_ref[...].astype(dt),
                   preferred_element_type=jnp.float32) + ab_ref[0]        # (rows, Cout)
    fm = jnp.dot(kron_ref[...].astype(dt), x_al.astype(dt),
                 preferred_element_type=jnp.float32)                      # vertex mix
    sm = jnp.dot(fm.astype(dt), w_ref[...].astype(dt),
                 preferred_element_type=jnp.float32) + b_ref[0]           # channel mix
    return jnp.maximum(sm + x_al, 0.0).reshape(Bblk, R, Cout)             # residual + ReLU


def _layer_norm(x, g_ref, b_ref, N, eps):
    """LayerNorm over (N, C) per (batch, time) step; stats in f32."""
    Bblk, R, C = x.shape
    T = R // N
    x4 = x.reshape(Bblk, T, N, C)
    m = jnp.mean(jnp.mean(x4, axis=3, keepdims=True), axis=2, keepdims=True)
    d = x4 - m
    v = jnp.mean(jnp.mean(d * d, axis=3, keepdims=True), axis=2, keepdims=True)
    return (d * jax.lax.rsqrt(v + eps) * g_ref[...] + b_ref[...]).reshape(Bblk, R, C)


# ----------------------------------------------------------------------------
# Fused whole-network kernel factory
# ----------------------------------------------------------------------------
def _make_kernel(n_st, Kt, Ko, N, Cin, dt):
    def kernel(x_ref, *refs):
        o_ref = refs[-1]
        it = iter(refs[:-1])

        x = x_ref[...].astype(jnp.float32)                 # (Bblk, Cin, T*N)
        Bblk = x.shape[0]
        if Cin == 1:
            h = x.reshape(Bblk, x.shape[2], 1)             # metadata-only
        else:
            # fold the model-boundary NCHW -> channels-last transpose in here
            h = jnp.transpose(x, (0, 2, 1))                # (Bblk, T*N, Cin)

        # ---- STConvBlocks ----------------------------------------------
        for _ in range(n_st):
            tc1_w, tc1_b, tc1_A, tc1_Ab = next(it), next(it), next(it), next(it)
            gc_A, gc_Ab, kron, gc_w, gc_b = (next(it), next(it), next(it),
                                             next(it), next(it))
            tc2_w, tc2_b, tc2_A, tc2_Ab = next(it), next(it), next(it), next(it)
            ln_g, ln_b = next(it), next(it)

            h = _temporal_glu(h, tc1_w, tc1_b, tc1_A, tc1_Ab, Kt, N, dt)
            h = _graph_conv_relu(h, gc_A, gc_Ab, kron, gc_w, gc_b, dt)
            h = _temporal_glu(h, tc2_w, tc2_b, tc2_A, tc2_Ab, Kt, N, dt)
            h = _layer_norm(h, ln_g, ln_b, N, LN_EPS)
            # dropout: identity (inference)

        # ---- OutputBlock: GLU conv (kernel Ko == remaining T) -> LN -> fc ----
        tc_w, tc_b, tc_A, tc_Ab = next(it), next(it), next(it), next(it)
        ln_g, ln_b = next(it), next(it)
        fc1_w, fc1_b, fc2_w, fc2_b = next(it), next(it), next(it), next(it)

        h = _temporal_glu(h, tc_w, tc_b, tc_A, tc_Ab, Ko, N, dt)   # (Bblk, N, C0); T_f == 1
        h = _layer_norm(h, ln_g, ln_b, N, LN_EPS)
        Bb, R, C0 = h.shape                                        # R == N
        h2 = h.reshape(Bb * R, C0)
        z = jnp.maximum(
            jnp.dot(h2.astype(dt), fc1_w[...].astype(dt),
                    preferred_element_type=jnp.float32) + fc1_b[0], 0.0)
        y = jnp.dot(z.astype(dt), fc2_w[...].astype(dt),
                    preferred_element_type=jnp.float32) + fc2_b[0]  # (Bblk*N, C2)
        C2 = y.shape[1]
        y = jnp.transpose(y.reshape(Bb, R, C2), (0, 2, 1))          # (Bblk, C2, N)
        o_ref[...] = y.astype(o_ref.dtype)

    return kernel


def _full_spec(a):
    zeros = (0,) * a.ndim
    return pl.BlockSpec(a.shape, lambda b, _z=zeros: _z)


# ----------------------------------------------------------------------------
# Forward builder: flattens params, precomputes the kron GSO operators, builds
# one fused pallas_call covering the whole network.
# ----------------------------------------------------------------------------
def build_stgcn_forward(params, x_shape, *, batch_block=1,
                        matmul_dtype=jnp.float32):
    B, Cin, n_his, N = x_shape
    assert B % batch_block == 0, (B, batch_block)
    st_blocks = params["st_blocks"]
    Kt = st_blocks[0]["Kt"]
    Ko = params["Ko"]
    if Ko <= 1:
        # TODO(synk): Ko == 0 (plain fc1->relu->fc2 head) / Ko == 1 passthrough
        # are not implemented; this config always has Ko > 1.
        raise NotImplementedError("only the Ko > 1 (OutputBlock) configuration is implemented")

    flat = []
    T = n_his
    for p in st_blocks:
        T_gc = T - (Kt - 1)   # time steps at the graph conv of this block
        # block-diagonal vertex-mix operator; rows ordered (batch, time, vertex)
        kron = jnp.kron(jnp.eye(batch_block * T_gc, dtype=jnp.float32), p["gso"])
        flat += [p["tc1_w"], p["tc1_b"], p["tc1_A"], p["tc1_Ab"],
                 p["gc_A"], p["gc_Ab"], kron, p["gc_w"], p["gc_b"],
                 p["tc2_w"], p["tc2_b"], p["tc2_A"], p["tc2_Ab"],
                 p["ln_g"], p["ln_b"]]
        T = T - 2 * (Kt - 1)
    po = params["output"]
    assert T == Ko, (T, Ko)   # OutputBlock conv kernel consumes all remaining steps
    flat += [po["tc_w"], po["tc_b"], po["tc_A"], po["tc_Ab"],
             po["ln_g"], po["ln_b"],
             po["fc1_w"], po["fc1_b"], po["fc2_w"], po["fc2_b"]]

    C2 = po["fc2_w"].shape[1]
    T_f = 1
    kernel = _make_kernel(len(st_blocks), Kt, Ko, N, Cin, matmul_dtype)

    # Explicit VMEM budget from the per-step footprint (weights are grid-
    # invariant but the pipeline still allocates double buffers for them).
    w_bytes = sum(int(w.size) * 4 for w in flat)
    act_bytes = batch_block * n_his * N * 4 * max(
        [2 * p["tc1_A"].shape[1] for p in st_blocks] + [2 * po["tc_A"].shape[1]])
    io_bytes = batch_block * (Cin * n_his * N + C2 * T_f * N) * 4
    vmem_limit = int(min(32 << 20,
                         max(8 << 20, 4 * (2 * (w_bytes + io_bytes) + 8 * act_bytes))))

    grid = (B // batch_block,)
    in_specs = ([pl.BlockSpec((batch_block, Cin, n_his * N), lambda b: (b, 0, 0))]
                + [_full_spec(w) for w in flat])
    out_spec = pl.BlockSpec((batch_block, C2, T_f * N), lambda b: (b, 0, 0))

    call = pl.pallas_call(
        kernel,
        out_shape=jax.ShapeDtypeStruct((B, C2, T_f * N), jnp.float32),
        grid=grid,
        in_specs=in_specs,
        out_specs=out_spec,
        compiler_params=pltpu.CompilerParams(
            dimension_semantics=("parallel",),
            vmem_limit_bytes=vmem_limit),
    )

    def forward(x_nchw):
        # (B, Cin, T, N) -> (B, Cin, T*N): metadata-only; the channels-last
        # transpose happens inside the kernel.
        x_in = x_nchw.reshape(B, Cin, n_his * N)
        y = call(x_in, *flat)
        return y.reshape(B, C2, T_f, N)   # NCHW, metadata-only reshape

    return forward


# ----------------------------------------------------------------------------
# Parameter construction (deterministic, synthetic)
# ----------------------------------------------------------------------------
def init_params(key, blocks, n_vertex, Kt, n_his):
    keys = iter(jax.random.split(key, 128))

    def nrm(shape, scale=0.1):
        return scale * jax.random.normal(next(keys), shape, dtype=jnp.float32)

    # symmetric normalized graph shift operator
    adj = jax.random.uniform(next(keys), (n_vertex, n_vertex), jnp.float32)
    adj = 0.5 * (adj + adj.T)
    deg = jnp.sum(adj, axis=1)
    gso = adj / jnp.sqrt(deg[:, None] * deg[None, :])

    def align_params(c_in, c_out):
        # c_in > c_out: learned 1x1 conv (with bias); c_in <= c_out: eye / zero-pad
        if c_in > c_out:
            return nrm((c_in, c_out)), nrm((1, c_out))
        return jnp.eye(c_in, c_out, dtype=jnp.float32), jnp.zeros((1, c_out), jnp.float32)

    st_blocks = []
    last_c = blocks[0][-1]
    for l in range(len(blocks) - 3):
        ch = blocks[l + 1]
        p = {"Kt": Kt, "gso": gso}
        p["tc1_w"] = nrm((Kt, last_c, 2 * ch[0]))
        p["tc1_b"] = nrm((1, 2 * ch[0]))
        p["tc1_A"], p["tc1_Ab"] = align_params(last_c, ch[0])
        p["gc_A"], p["gc_Ab"] = align_params(ch[0], ch[1])
        p["gc_w"] = nrm((ch[1], ch[1]))
        p["gc_b"] = nrm((1, ch[1]))
        p["tc2_w"] = nrm((Kt, ch[1], 2 * ch[2]))
        p["tc2_b"] = nrm((1, 2 * ch[2]))
        p["tc2_A"], p["tc2_Ab"] = align_params(ch[1], ch[2])
        p["ln_g"] = jnp.ones((n_vertex, ch[2]), jnp.float32)
        p["ln_b"] = jnp.zeros((n_vertex, ch[2]), jnp.float32)
        st_blocks.append(p)
        last_c = ch[2]

    Ko = n_his - (len(blocks) - 3) * 2 * (Kt - 1)
    c0, c1 = blocks[-2][0], blocks[-2][1]
    end_c = blocks[-1][0]
    out_p = {"Ko": Ko}
    out_p["tc_w"] = nrm((Ko, last_c, 2 * c0))
    out_p["tc_b"] = nrm((1, 2 * c0))
    out_p["tc_A"], out_p["tc_Ab"] = align_params(last_c, c0)
    out_p["ln_g"] = jnp.ones((n_vertex, c0), jnp.float32)
    out_p["ln_b"] = jnp.zeros((n_vertex, c0), jnp.float32)
    out_p["fc1_w"] = nrm((c0, c1))
    out_p["fc1_b"] = nrm((1, c1))
    out_p["fc2_w"] = nrm((c1, end_c))
    out_p["fc2_b"] = nrm((1, end_c))
    return {"st_blocks": st_blocks, "output": out_p, "Ko": Ko}


# ----------------------------------------------------------------------------
# Pure-JAX reference (same math, Precision.HIGHEST matmuls) for correctness
# ----------------------------------------------------------------------------
def _ref_align(x, A, Ab):
    return jnp.einsum("btnc,cd->btnd", x, A, precision=PREC) + Ab[0]


def _ref_temporal(x, w, bc, A, Ab, Kt):
    T_out = x.shape[1] - Kt + 1
    c_out = A.shape[1]
    acc = sum(jnp.einsum("btnc,cd->btnd", x[:, k:k + T_out], w[k], precision=PREC)
              for k in range(Kt))
    acc = acc + bc[0]
    x_in = _ref_align(x[:, Kt - 1:Kt - 1 + T_out], A, Ab)
    return (acc[..., :c_out] + x_in) * jax.nn.sigmoid(acc[..., c_out:])


def _ref_graph_conv(x, A, Ab, gso, W, b):
    x_al = _ref_align(x, A, Ab)
    fm = jnp.einsum("hi,btic->bthc", gso, x_al, precision=PREC)
    sm = jnp.einsum("bthc,cd->bthd", fm, W, precision=PREC) + b[0]
    return jnp.maximum(sm + x_al, 0.0)


def _ref_layernorm(x, g, beta, eps=LN_EPS):
    m = jnp.mean(x, axis=(2, 3), keepdims=True)
    v = jnp.mean((x - m) ** 2, axis=(2, 3), keepdims=True)
    return (x - m) / jnp.sqrt(v + eps) * g + beta


def stgcn_ref(params, x_nchw):
    x = jnp.transpose(x_nchw, (0, 2, 3, 1))
    for p in params["st_blocks"]:
        x = _ref_temporal(x, p["tc1_w"], p["tc1_b"], p["tc1_A"], p["tc1_Ab"], p["Kt"])
        x = _ref_graph_conv(x, p["gc_A"], p["gc_Ab"], p["gso"], p["gc_w"], p["gc_b"])
        x = _ref_temporal(x, p["tc2_w"], p["tc2_b"], p["tc2_A"], p["tc2_Ab"], p["Kt"])
        x = _ref_layernorm(x, p["ln_g"], p["ln_b"])
    po = params["output"]
    x = _ref_temporal(x, po["tc_w"], po["tc_b"], po["tc_A"], po["tc_Ab"], po["Ko"])
    x = _ref_layernorm(x, po["ln_g"], po["ln_b"])
    h = jnp.maximum(jnp.einsum("btnc,cd->btnd", x, po["fc1_w"], precision=PREC)
                    + po["fc1_b"][0], 0.0)
    x = jnp.einsum("btnc,cd->btnd", h, po["fc2_w"], precision=PREC) + po["fc2_b"][0]
    return jnp.transpose(x, (0, 3, 1, 2))


# ----------------------------------------------------------------------------
if __name__ == "__main__":
    key = jax.random.PRNGKey(0)
    k_param, k_x = jax.random.split(key)

    # small STGCN config: one STConvBlock, Ko = 8 - 1*2*(3-1) = 4 > 1 -> OutputBlock
    B, n_vertex, n_his, Kt = 2, 16, 8, 3
    blocks = [[1], [8, 4, 8], [16, 16], [1]]

    params = init_params(k_param, blocks, n_vertex, Kt, n_his)
    assert params["Ko"] == 4

    # input in PyTorch NCHW convention: (B, C_in=1, n_his, n_vertex)
    x = jax.random.normal(k_x, (B, blocks[0][0], n_his, n_vertex), jnp.float32)

    ref = jax.block_until_ready(stgcn_ref(params, x))

    # 1) main path: f32 matmuls, 1 batch element per grid step (2 "parallel"
    #    steps -> both v7x TensorCores get work).
    fwd = build_stgcn_forward(params, x.shape, batch_block=1,
                              matmul_dtype=jnp.float32)
    out = jax.block_until_ready(fwd(x))
    assert out.shape == (B, blocks[-1][0], 1, n_vertex), out.shape
    err = float(jnp.max(jnp.abs(out - ref)))
    assert err < 5e-3, f"f32 mismatch vs reference: max abs err = {err}"

    # 2) whole batch folded into one grid step (v5e/v6e-friendly: amortizes the
    #    per-step pipeline overhead, larger matmul row dimension).
    fwd_b = build_stgcn_forward(params, x.shape, batch_block=B,
                                matmul_dtype=jnp.float32)
    out_b = jax.block_until_ready(fwd_b(x))
    err_b = float(jnp.max(jnp.abs(out_b - ref)))
    assert err_b < 5e-3, f"batched-step mismatch vs reference: max abs err = {err_b}"

    # 3) bf16 matmul operands (MXU-native on v6e/v7x); accumulation, GLU and
    #    LayerNorm stay f32, so only a looser tolerance is needed.
    fwd_bf16 = build_stgcn_forward(params, x.shape, batch_block=1,
                                   matmul_dtype=jnp.bfloat16)
    out_bf16 = jax.block_until_ready(fwd_bf16(x))
    err_bf16 = float(jnp.max(jnp.abs(out_bf16 - ref)))
    assert err_bf16 < 5e-2, f"bf16 mismatch vs reference: max abs err = {err_bf16}"

    print("KERNEL_OK")
</pallas_src>

<mosaic_0001>
module attributes {stable_mosaic.version = 11 : i64} {
  func.func @kernel(%arg0: i32, %arg1: memref<1x1x128xf32, #tpu.memory_space<vmem>>, %arg2: memref<3x1x16xf32, #tpu.memory_space<vmem>>, %arg3: memref<1x16xf32, #tpu.memory_space<vmem>>, %arg4: memref<1x8xf32, #tpu.memory_space<vmem>>, %arg5: memref<1x8xf32, #tpu.memory_space<vmem>>, %arg6: memref<8x4xf32, #tpu.memory_space<vmem>>, %arg7: memref<1x4xf32, #tpu.memory_space<vmem>>, %arg8: memref<96x96xf32, #tpu.memory_space<vmem>>, %arg9: memref<4x4xf32, #tpu.memory_space<vmem>>, %arg10: memref<1x4xf32, #tpu.memory_space<vmem>>, %arg11: memref<3x4x16xf32, #tpu.memory_space<vmem>>, %arg12: memref<1x16xf32, #tpu.memory_space<vmem>>, %arg13: memref<4x8xf32, #tpu.memory_space<vmem>>, %arg14: memref<1x8xf32, #tpu.memory_space<vmem>>, %arg15: memref<16x8xf32, #tpu.memory_space<vmem>>, %arg16: memref<16x8xf32, #tpu.memory_space<vmem>>, %arg17: memref<4x8x32xf32, #tpu.memory_space<vmem>>, %arg18: memref<1x32xf32, #tpu.memory_space<vmem>>, %arg19: memref<8x16xf32, #tpu.memory_space<vmem>>, %arg20: memref<1x16xf32, #tpu.memory_space<vmem>>, %arg21: memref<16x16xf32, #tpu.memory_space<vmem>>, %arg22: memref<16x16xf32, #tpu.memory_space<vmem>>, %arg23: memref<16x16xf32, #tpu.memory_space<vmem>>, %arg24: memref<1x16xf32, #tpu.memory_space<vmem>>, %arg25: memref<16x1xf32, #tpu.memory_space<vmem>>, %arg26: memref<1x1xf32, #tpu.memory_space<vmem>>, %arg27: memref<1x1x16xf32, #tpu.memory_space<vmem>>) attributes {dimension_semantics = [#tpu.dimension_semantics<parallel>], iteration_bounds = array<i64: 2>, scalar_prefetch = 0 : i64, scratch_operands = 0 : i64, tpu.core_type = #tpu.core_type<tc>, window_params = [{transform_indices = @transform_0, window_bounds = array<i64: 1, 1, 128>}, {pipeline_mode = #tpu.pipeline_mode<synchronous>, transform_indices = @transform_1, window_bounds = array<i64: 3, 1, 16>}, {pipeline_mode = #tpu.pipeline_mode<synchronous>, transform_indices = @transform_2, window_bounds = array<i64: 1, 16>}, {pipeline_mode = #tpu.pipeline_mode<synchronous>, transform_indices = @transform_3, window_bounds = array<i64: 1, 8>}, {pipeline_mode = #tpu.pipeline_mode<synchronous>, transform_indices = @transform_4, window_bounds = array<i64: 1, 8>}, {pipeline_mode = #tpu.pipeline_mode<synchronous>, transform_indices = @transform_5, window_bounds = array<i64: 8, 4>}, {pipeline_mode = #tpu.pipeline_mode<synchronous>, transform_indices = @transform_6, window_bounds = array<i64: 1, 4>}, {pipeline_mode = #tpu.pipeline_mode<synchronous>, transform_indices = @transform_7, window_bounds = array<i64: 96, 96>}, {pipeline_mode = #tpu.pipeline_mode<synchronous>, transform_indices = @transform_8, window_bounds = array<i64: 4, 4>}, {pipeline_mode = #tpu.pipeline_mode<synchronous>, transform_indices = @transform_9, window_bounds = array<i64: 1, 4>}, {pipeline_mode = #tpu.pipeline_mode<synchronous>, transform_indices = @transform_10, window_bounds = array<i64: 3, 4, 16>}, {pipeline_mode = #tpu.pipeline_mode<synchronous>, transform_indices = @transform_11, window_bounds = array<i64: 1, 16>}, {pipeline_mode = #tpu.pipeline_mode<synchronous>, transform_indices = @transform_12, window_bounds = array<i64: 4, 8>}, {pipeline_mode = #tpu.pipeline_mode<synchronous>, transform_indices = @transform_13, window_bounds = array<i64: 1, 8>}, {pipeline_mode = #tpu.pipeline_mode<synchronous>, transform_indices = @transform_14, window_bounds = array<i64: 16, 8>}, {pipeline_mode = #tpu.pipeline_mode<synchronous>, transform_indices = @transform_15, window_bounds = array<i64: 16, 8>}, {pipeline_mode = #tpu.pipeline_mode<synchronous>, transform_indices = @transform_16, window_bounds = array<i64: 4, 8, 32>}, {pipeline_mode = #tpu.pipeline_mode<synchronous>, transform_indices = @transform_17, window_bounds = array<i64: 1, 32>}, {pipeline_mode = #tpu.pipeline_mode<synchronous>, transform_indices = @transform_18, window_bounds = array<i64: 8, 16>}, {pipeline_mode = #tpu.pipeline_mode<synchronous>, transform_indices = @transform_19, window_bounds = array<i64: 1, 16>}, {pipeline_mode = #tpu.pipeline_mode<synchronous>, transform_indices = @transform_20, window_bounds = array<i64: 16, 16>}, {pipeline_mode = #tpu.pipeline_mode<synchronous>, transform_indices = @transform_21, window_bounds = array<i64: 16, 16>}, {pipeline_mode = #tpu.pipeline_mode<synchronous>, transform_indices = @transform_22, window_bounds = array<i64: 16, 16>}, {pipeline_mode = #tpu.pipeline_mode<synchronous>, transform_indices = @transform_23, window_bounds = array<i64: 1, 16>}, {pipeline_mode = #tpu.pipeline_mode<synchronous>, transform_indices = @transform_24, window_bounds = array<i64: 16, 1>}, {pipeline_mode = #tpu.pipeline_mode<synchronous>, transform_indices = @transform_25, window_bounds = array<i64: 1, 1>}, {transform_indices = @transform_26, window_bounds = array<i64: 1, 1, 16>}]} {
    %c0 = arith.constant 0 : index
    %c0_0 = arith.constant 0 : index
    %c0_1 = arith.constant 0 : index
    %0 = vector.load %arg1[%c0, %c0_0, %c0_1] : memref<1x1x128xf32, #tpu.memory_space<vmem>>, vector<1x1x128xf32>
    %1 = vector.shape_cast %0 : vector<1x1x128xf32> to vector<1x128x1xf32>
    %cst = arith.constant 0.000000e+00 : f32
    %2 = vector.broadcast %cst : f32 to vector<96x16xf32>
    %3 = vector.extract_strided_slice %1 {offsets = [0, 0, 0], sizes = [1, 96, 1], strides = [1, 1, 1]} : vector<1x128x1xf32> to vector<1x96x1xf32>
    %4 = vector.shape_cast %3 : vector<1x96x1xf32> to vector<96x1xf32>
    %c0_2 = arith.constant 0 : index
    %c0_3 = arith.constant 0 : index
    %c0_4 = arith.constant 0 : index
    %5 = vector.load %arg2[%c0_2, %c0_3, %c0_4] : memref<3x1x16xf32, #tpu.memory_space<vmem>>, vector<1x1x16xf32>
    %6 = vector.shape_cast %5 : vector<1x1x16xf32> to vector<1x16xf32>
    %cst_5 = arith.constant dense<0.000000e+00> : vector<96x16xf32>
    %7 = tpu.matmul %4, %6, %cst_5 {dimension_numbers = #tpu.dot_dimension_numbers<[1], [0], [0], [1], [0, 0, 1, 1], [], []>} : vector<96x1xf32>, vector<1x16xf32>, vector<96x16xf32> -> vector<96x16xf32>
    %8 = arith.addf %2, %7 : vector<96x16xf32>
    %9 = vector.extract_strided_slice %1 {offsets = [0, 16, 0], sizes = [1, 96, 1], strides = [1, 1, 1]} : vector<1x128x1xf32> to vector<1x96x1xf32>
    %10 = vector.shape_cast %9 : vector<1x96x1xf32> to vector<96x1xf32>
    %c1 = arith.constant 1 : index
    %c0_6 = arith.constant 0 : index
    %c0_7 = arith.constant 0 : index
    %11 = vector.load %arg2[%c1, %c0_6, %c0_7] : memref<3x1x16xf32, #tpu.memory_space<vmem>>, vector<1x1x16xf32>
    %12 = vector.shape_cast %11 : vector<1x1x16xf32> to vector<1x16xf32>
    %cst_8 = arith.constant dense<0.000000e+00> : vector<96x16xf32>
    %13 = tpu.matmul %10, %12, %cst_8 {dimension_numbers = #tpu.dot_dimension_numbers<[1], [0], [0], [1], [0, 0, 1, 1], [], []>} : vector<96x1xf32>, vector<1x16xf32>, vector<96x16xf32> -> vector<96x16xf32>
    %14 = arith.addf %8, %13 : vector<96x16xf32>
    %15 = vector.extract_strided_slice %1 {offsets = [0, 32, 0], sizes = [1, 96, 1], strides = [1, 1, 1]} : vector<1x128x1xf32> to vector<1x96x1xf32>
    %16 = vector.shape_cast %15 : vector<1x96x1xf32> to vector<96x1xf32>
    %c2 = arith.constant 2 : index
    %c0_9 = arith.constant 0 : index
    %c0_10 = arith.constant 0 : index
    %17 = vector.load %arg2[%c2, %c0_9, %c0_10] : memref<3x1x16xf32, #tpu.memory_space<vmem>>, vector<1x1x16xf32>
    %18 = vector.shape_cast %17 : vector<1x1x16xf32> to vector<1x16xf32>
    %cst_11 = arith.constant dense<0.000000e+00> : vector<96x16xf32>
    %19 = tpu.matmul %16, %18, %cst_11 {dimension_numbers = #tpu.dot_dimension_numbers<[1], [0], [0], [1], [0, 0, 1, 1], [], []>} : vector<96x1xf32>, vector<1x16xf32>, vector<96x16xf32> -> vector<96x16xf32>
    %20 = arith.addf %14, %19 : vector<96x16xf32>
    %c0_12 = arith.constant 0 : index
    %c0_13 = arith.constant 0 : index
    %21 = vector.load %arg3[%c0_12, %c0_13] : memref<1x16xf32, #tpu.memory_space<vmem>>, vector<1x16xf32>
    %22 = vector.shape_cast %21 : vector<1x16xf32> to vector<16xf32>
    %23 = vector.shape_cast %22 : vector<16xf32> to vector<1x16xf32>
    %24 = vector.broadcast %23 : vector<1x16xf32> to vector<96x16xf32>
    %25 = arith.addf %20, %24 : vector<96x16xf32>
    %26 = vector.extract_strided_slice %1 {offsets = [0, 32, 0], sizes = [1, 96, 1], strides = [1, 1, 1]} : vector<1x128x1xf32> to vector<1x96x1xf32>
    %27 = vector.shape_cast %26 : vector<1x96x1xf32> to vector<96x1xf32>
    %c0_14 = arith.constant 0 : index
    %c0_15 = arith.constant 0 : index
    %28 = vector.load %arg4[%c0_14, %c0_15] : memref<1x8xf32, #tpu.memory_space<vmem>>, vector<1x8xf32>
    %cst_16 = arith.constant dense<0.000000e+00> : vector<96x8xf32>
    %29 = tpu.matmul %27, %28, %cst_16 {dimension_numbers = #tpu.dot_dimension_numbers<[1], [0], [0], [1], [0, 0, 1, 1], [], []>} : vector<96x1xf32>, vector<1x8xf32>, vector<96x8xf32> -> vector<96x8xf32>
    %c0_17 = arith.constant 0 : index
    %c0_18 = arith.constant 0 : index
    %30 = vector.load %arg5[%c0_17, %c0_18] : memref<1x8xf32, #tpu.memory_space<vmem>>, vector<1x8xf32>
    %31 = vector.shape_cast %30 : vector<1x8xf32> to vector<8xf32>
    %32 = vector.shape_cast %31 : vector<8xf32> to vector<1x8xf32>
    %33 = vector.broadcast %32 : vector<1x8xf32> to vector<96x8xf32>
    %34 = arith.addf %29, %33 : vector<96x8xf32>
    %35 = vector.extract_strided_slice %25 {offsets = [0, 0], sizes = [96, 8], strides = [1, 1]} : vector<96x16xf32> to vector<96x8xf32>
    %36 = arith.addf %35, %34 : vector<96x8xf32>
    %37 = vector.extract_strided_slice %25 {offsets = [0, 8], sizes = [96, 8], strides = [1, 1]} : vector<96x16xf32> to vector<96x8xf32>
    %38 = arith.negf %37 : vector<96x8xf32>
    %39 = math.exp %38 : vector<96x8xf32>
    %cst_19 = arith.constant 1.000000e+00 : f32
    %40 = vector.broadcast %cst_19 : f32 to vector<96x8xf32>
    %41 = arith.addf %40, %39 : vector<96x8xf32>
    %42 = arith.divf %40, %41 : vector<96x8xf32>
    %43 = arith.mulf %36, %42 : vector<96x8xf32>
    %44 = vector.shape_cast %43 : vector<96x8xf32> to vector<1x96x8xf32>
    %45 = vector.shape_cast %44 : vector<1x96x8xf32> to vector<96x8xf32>
    %c0_20 = arith.constant 0 : index
    %c0_21 = arith.constant 0 : index
    %46 = vector.load %arg6[%c0_20, %c0_21] : memref<8x4xf32, #tpu.memory_space<vmem>>, vector<8x4xf32>
    %cst_22 = arith.constant dense<0.000000e+00> : vector<96x4xf32>
    %47 = tpu.matmul %45, %46, %cst_22 {dimension_numbers = #tpu.dot_dimension_numbers<[1], [0], [0], [1], [0, 0, 1, 1], [], []>} : vector<96x8xf32>, vector<8x4xf32>, vector<96x4xf32> -> vector<96x4xf32>
    %c0_23 = arith.constant 0 : index
    %c0_24 = arith.constant 0 : index
    %48 = vector.load %arg7[%c0_23, %c0_24] : memref<1x4xf32, #tpu.memory_space<vmem>>, vector<1x4xf32>
    %49 = vector.shape_cast %48 : vector<1x4xf32> to vector<4xf32>
    %50 = vector.shape_cast %49 : vector<4xf32> to vector<1x4xf32>
    %51 = vector.broadcast %50 : vector<1x4xf32> to vector<96x4xf32>
    %52 = arith.addf %47, %51 : vector<96x4xf32>
    %c0_25 = arith.constant 0 : index
    %c0_26 = arith.constant 0 : index
    %53 = vector.load %arg8[%c0_25, %c0_26] : memref<96x96xf32, #tpu.memory_space<vmem>>, vector<96x96xf32>
    %cst_27 = arith.constant dense<0.000000e+00> : vector<96x4xf32>
    %54 = tpu.matmul %53, %52, %cst_27 {dimension_numbers = #tpu.dot_dimension_numbers<[1], [0], [0], [1], [0, 0, 1, 1], [], []>} : vector<96x96xf32>, vector<96x4xf32>, vector<96x4xf32> -> vector<96x4xf32>
    %c0_28 = arith.constant 0 : index
    %c0_29 = arith.constant 0 : index
    %55 = vector.load %arg9[%c0_28, %c0_29] : memref<4x4xf32, #tpu.memory_space<vmem>>, vector<4x4xf32>
    %cst_30 = arith.constant dense<0.000000e+00> : vector<96x4xf32>
    %56 = tpu.matmul %54, %55, %cst_30 {dimension_numbers = #tpu.dot_dimension_numbers<[1], [0], [0], [1], [0, 0, 1, 1], [], []>} : vector<96x4xf32>, vector<4x4xf32>, vector<96x4xf32> -> vector<96x4xf32>
    %c0_31 = arith.constant 0 : index
    %c0_32 = arith.constant 0 : index
    %57 = vector.load %arg10[%c0_31, %c0_32] : memref<1x4xf32, #tpu.memory_space<vmem>>, vector<1x4xf32>
    %58 = vector.shape_cast %57 : vector<1x4xf32> to vector<4xf32>
    %59 = vector.shape_cast %58 : vector<4xf32> to vector<1x4xf32>
    %60 = vector.broadcast %59 : vector<1x4xf32> to vector<96x4xf32>
    %61 = arith.addf %56, %60 : vector<96x4xf32>
    %62 = arith.addf %61, %52 : vector<96x4xf32>
    %cst_33 = arith.constant 0.000000e+00 : f32
    %63 = vector.broadcast %cst_33 : f32 to vector<96x4xf32>
    %64 = arith.maximumf %62, %63 : vector<96x4xf32>
    %65 = vector.shape_cast %64 : vector<96x4xf32> to vector<1x96x4xf32>
    %cst_34 = arith.constant 0.000000e+00 : f32
    %66 = vector.broadcast %cst_34 : f32 to vector<64x16xf32>
    %67 = vector.extract_strided_slice %65 {offsets = [0, 0, 0], sizes = [1, 64, 4], strides = [1, 1, 1]} : vector<1x96x4xf32> to vector<1x64x4xf32>
    %68 = vector.shape_cast %67 : vector<1x64x4xf32> to vector<64x4xf32>
    %c0_35 = arith.constant 0 : index
    %c0_36 = arith.constant 0 : index
    %c0_37 = arith.constant 0 : index
    %69 = vector.load %arg11[%c0_35, %c0_36, %c0_37] : memref<3x4x16xf32, #tpu.memory_space<vmem>>, vector<1x4x16xf32>
    %70 = vector.shape_cast %69 : vector<1x4x16xf32> to vector<4x16xf32>
    %cst_38 = arith.constant dense<0.000000e+00> : vector<64x16xf32>
    %71 = tpu.matmul %68, %70, %cst_38 {dimension_numbers = #tpu.dot_dimension_numbers<[1], [0], [0], [1], [0, 0, 1, 1], [], []>} : vector<64x4xf32>, vector<4x16xf32>, vector<64x16xf32> -> vector<64x16xf32>
    %72 = arith.addf %66, %71 : vector<64x16xf32>
    %73 = vector.extract_strided_slice %65 {offsets = [0, 16, 0], sizes = [1, 64, 4], strides = [1, 1, 1]} : vector<1x96x4xf32> to vector<1x64x4xf32>
    %74 = vector.shape_cast %73 : vector<1x64x4xf32> to vector<64x4xf32>
    %c1_39 = arith.constant 1 : index
    %c0_40 = arith.constant 0 : index
    %c0_41 = arith.constant 0 : index
    %75 = vector.load %arg11[%c1_39, %c0_40, %c0_41] : memref<3x4x16xf32, #tpu.memory_space<vmem>>, vector<1x4x16xf32>
    %76 = vector.shape_cast %75 : vector<1x4x16xf32> to vector<4x16xf32>
    %cst_42 = arith.constant dense<0.000000e+00> : vector<64x16xf32>
    %77 = tpu.matmul %74, %76, %cst_42 {dimension_numbers = #tpu.dot_dimension_numbers<[1], [0], [0], [1], [0, 0, 1, 1], [], []>} : vector<64x4xf32>, vector<4x16xf32>, vector<64x16xf32> -> vector<64x16xf32>
    %78 = arith.addf %72, %77 : vector<64x16xf32>
    %79 = vector.extract_strided_slice %65 {offsets = [0, 32, 0], sizes = [1, 64, 4], strides = [1, 1, 1]} : vector<1x96x4xf32> to vector<1x64x4xf32>
    %80 = vector.shape_cast %79 : vector<1x64x4xf32> to vector<64x4xf32>
    %c2_43 = arith.constant 2 : index
    %c0_44 = arith.constant 0 : index
    %c0_45 = arith.constant 0 : index
    %81 = vector.load %arg11[%c2_43, %c0_44, %c0_45] : memref<3x4x16xf32, #tpu.memory_space<vmem>>, vector<1x4x16xf32>
    %82 = vector.shape_cast %81 : vector<1x4x16xf32> to vector<4x16xf32>
    %cst_46 = arith.constant dense<0.000000e+00> : vector<64x16xf32>
    %83 = tpu.matmul %80, %82, %cst_46 {dimension_numbers = #tpu.dot_dimension_numbers<[1], [0], [0], [1], [0, 0, 1, 1], [], []>} : vector<64x4xf32>, vector<4x16xf32>, vector<64x16xf32> -> vector<64x16xf32>
    %84 = arith.addf %78, %83 : vector<64x16xf32>
    %c0_47 = arith.constant 0 : index
    %c0_48 = arith.constant 0 : index
    %85 = vector.load %arg12[%c0_47, %c0_48] : memref<1x16xf32, #tpu.memory_space<vmem>>, vector<1x16xf32>
    %86 = vector.shape_cast %85 : vector<1x16xf32> to vector<16xf32>
    %87 = vector.shape_cast %86 : vector<16xf32> to vector<1x16xf32>
    %88 = vector.broadcast %87 : vector<1x16xf32> to vector<64x16xf32>
    %89 = arith.addf %84, %88 : vector<64x16xf32>
    %90 = vector.extract_strided_slice %65 {offsets = [0, 32, 0], sizes = [1, 64, 4], strides = [1, 1, 1]} : vector<1x96x4xf32> to vector<1x64x4xf32>
    %91 = vector.shape_cast %90 : vector<1x64x4xf32> to vector<64x4xf32>
    %c0_49 = arith.constant 0 : index
    %c0_50 = arith.constant 0 : index
    %92 = vector.load %arg13[%c0_49, %c0_50] : memref<4x8xf32, #tpu.memory_space<vmem>>, vector<4x8xf32>
    %cst_51 = arith.constant dense<0.000000e+00> : vector<64x8xf32>
    %93 = tpu.matmul %91, %92, %cst_51 {dimension_numbers = #tpu.dot_dimension_numbers<[1], [0], [0], [1], [0, 0, 1, 1], [], []>} : vector<64x4xf32>, vector<4x8xf32>, vector<64x8xf32> -> vector<64x8xf32>
    %c0_52 = arith.constant 0 : index
    %c0_53 = arith.constant 0 : index
    %94 = vector.load %arg14[%c0_52, %c0_53] : memref<1x8xf32, #tpu.memory_space<vmem>>, vector<1x8xf32>
    %95 = vector.shape_cast %94 : vector<1x8xf32> to vector<8xf32>
    %96 = vector.shape_cast %95 : vector<8xf32> to vector<1x8xf32>
    %97 = vector.broadcast %96 : vector<1x8xf32> to vector<64x8xf32>
    %98 = arith.addf %93, %97 : vector<64x8xf32>
    %99 = vector.extract_strided_slice %89 {offsets = [0, 0], sizes = [64, 8], strides = [1, 1]} : vector<64x16xf32> to vector<64x8xf32>
    %100 = arith.addf %99, %98 : vector<64x8xf32>
    %101 = vector.extract_strided_slice %89 {offsets = [0, 8], sizes = [64, 8], strides = [1, 1]} : vector<64x16xf32> to vector<64x8xf32>
    %102 = arith.negf %101 : vector<64x8xf32>
    %103 = math.exp %102 : vector<64x8xf32>
    %cst_54 = arith.constant 1.000000e+00 : f32
    %104 = vector.broadcast %cst_54 : f32 to vector<64x8xf32>
    %105 = arith.addf %104, %103 : vector<64x8xf32>
    %106 = arith.divf %104, %105 : vector<64x8xf32>
    %107 = arith.mulf %100, %106 : vector<64x8xf32>
    %108 = vector.shape_cast %107 : vector<64x8xf32> to vector<1x64x8xf32>
    %109 = vector.shape_cast %108 : vector<1x64x8xf32> to vector<1x4x16x8xf32>
    %cst_55 = arith.constant dense<0.000000e+00> : vector<1x4x16xf32>
    %110 = vector.multi_reduction <add>, %109, %cst_55 [3] : vector<1x4x16x8xf32> to vector<1x4x16xf32>
    %111 = vector.shape_cast %110 : vector<1x4x16xf32> to vector<1x4x16x1xf32>
    %cst_56 = arith.constant 8.000000e+00 : f32
    %112 = vector.broadcast %cst_56 : f32 to vector<1x4x16x1xf32>
    %113 = arith.divf %111, %112 : vector<1x4x16x1xf32>
    %cst_57 = arith.constant dense<0.000000e+00> : vector<1x4x1xf32>
    %114 = vector.multi_reduction <add>, %113, %cst_57 [2] : vector<1x4x16x1xf32> to vector<1x4x1xf32>
    %115 = vector.shape_cast %114 : vector<1x4x1xf32> to vector<1x4x1x1xf32>
    %cst_58 = arith.constant 1.600000e+01 : f32
    %116 = vector.broadcast %cst_58 : f32 to vector<1x4x1x1xf32>
    %117 = arith.divf %115, %116 : vector<1x4x1x1xf32>
    %118 = vector.broadcast %117 : vector<1x4x1x1xf32> to vector<1x4x16x8xf32>
    %119 = arith.subf %109, %118 : vector<1x4x16x8xf32>
    %120 = arith.mulf %119, %119 : vector<1x4x16x8xf32>
    %cst_59 = arith.constant dense<0.000000e+00> : vector<1x4x16xf32>
    %121 = vector.multi_reduction <add>, %120, %cst_59 [3] : vector<1x4x16x8xf32> to vector<1x4x16xf32>
    %122 = vector.shape_cast %121 : vector<1x4x16xf32> to vector<1x4x16x1xf32>
    %cst_60 = arith.constant 8.000000e+00 : f32
    %123 = vector.broadcast %cst_60 : f32 to vector<1x4x16x1xf32>
    %124 = arith.divf %122, %123 : vector<1x4x16x1xf32>
    %cst_61 = arith.constant dense<0.000000e+00> : vector<1x4x1xf32>
    %125 = vector.multi_reduction <add>, %124, %cst_61 [2] : vector<1x4x16x1xf32> to vector<1x4x1xf32>
    %126 = vector.shape_cast %125 : vector<1x4x1xf32> to vector<1x4x1x1xf32>
    %cst_62 = arith.constant 1.600000e+01 : f32
    %127 = vector.broadcast %cst_62 : f32 to vector<1x4x1x1xf32>
    %128 = arith.divf %126, %127 : vector<1x4x1x1xf32>
    %cst_63 = arith.constant 9.99999974E-6 : f32
    %129 = vector.broadcast %cst_63 : f32 to vector<1x4x1x1xf32>
    %130 = arith.addf %128, %129 : vector<1x4x1x1xf32>
    %131 = math.rsqrt %130 : vector<1x4x1x1xf32>
    %132 = vector.broadcast %131 : vector<1x4x1x1xf32> to vector<1x4x16x8xf32>
    %133 = arith.mulf %119, %132 : vector<1x4x16x8xf32>
    %c0_64 = arith.constant 0 : index
    %c0_65 = arith.constant 0 : index
    %134 = vector.load %arg15[%c0_64, %c0_65] : memref<16x8xf32, #tpu.memory_space<vmem>>, vector<16x8xf32>
    %135 = vector.shape_cast %134 : vector<16x8xf32> to vector<1x1x16x8xf32>
    %136 = vector.broadcast %135 : vector<1x1x16x8xf32> to vector<1x4x16x8xf32>
    %137 = arith.mulf %133, %136 : vector<1x4x16x8xf32>
    %c0_66 = arith.constant 0 : index
    %c0_67 = arith.constant 0 : index
    %138 = vector.load %arg16[%c0_66, %c0_67] : memref<16x8xf32, #tpu.memory_space<vmem>>, vector<16x8xf32>
    %139 = vector.shape_cast %138 : vector<16x8xf32> to vector<1x1x16x8xf32>
    %140 = vector.broadcast %139 : vector<1x1x16x8xf32> to vector<1x4x16x8xf32>
    %141 = arith.addf %137, %140 : vector<1x4x16x8xf32>
    %142 = vector.shape_cast %141 : vector<1x4x16x8xf32> to vector<1x64x8xf32>
    %cst_68 = arith.constant 0.000000e+00 : f32
    %143 = vector.broadcast %cst_68 : f32 to vector<16x32xf32>
    %144 = vector.extract_strided_slice %142 {offsets = [0, 0, 0], sizes = [1, 16, 8], strides = [1, 1, 1]} : vector<1x64x8xf32> to vector<1x16x8xf32>
    %145 = vector.shape_cast %144 : vector<1x16x8xf32> to vector<16x8xf32>
    %c0_69 = arith.constant 0 : index
    %c0_70 = arith.constant 0 : index
    %c0_71 = arith.constant 0 : index
    %146 = vector.load %arg17[%c0_69, %c0_70, %c0_71] : memref<4x8x32xf32, #tpu.memory_space<vmem>>, vector<1x8x32xf32>
    %147 = vector.shape_cast %146 : vector<1x8x32xf32> to vector<8x32xf32>
    %cst_72 = arith.constant dense<0.000000e+00> : vector<16x32xf32>
    %148 = tpu.matmul %145, %147, %cst_72 {dimension_numbers = #tpu.dot_dimension_numbers<[1], [0], [0], [1], [0, 0, 1, 1], [], []>} : vector<16x8xf32>, vector<8x32xf32>, vector<16x32xf32> -> vector<16x32xf32>
    %149 = arith.addf %143, %148 : vector<16x32xf32>
    %150 = vector.extract_strided_slice %142 {offsets = [0, 16, 0], sizes = [1, 16, 8], strides = [1, 1, 1]} : vector<1x64x8xf32> to vector<1x16x8xf32>
    %151 = vector.shape_cast %150 : vector<1x16x8xf32> to vector<16x8xf32>
    %c1_73 = arith.constant 1 : index
    %c0_74 = arith.constant 0 : index
    %c0_75 = arith.constant 0 : index
    %152 = vector.load %arg17[%c1_73, %c0_74, %c0_75] : memref<4x8x32xf32, #tpu.memory_space<vmem>>, vector<1x8x32xf32>
    %153 = vector.shape_cast %152 : vector<1x8x32xf32> to vector<8x32xf32>
    %cst_76 = arith.constant dense<0.000000e+00> : vector<16x32xf32>
    %154 = tpu.matmul %151, %153, %cst_76 {dimension_numbers = #tpu.dot_dimension_numbers<[1], [0], [0], [1], [0, 0, 1, 1], [], []>} : vector<16x8xf32>, vector<8x32xf32>, vector<16x32xf32> -> vector<16x32xf32>
    %155 = arith.addf %149, %154 : vector<16x32xf32>
    %156 = vector.extract_strided_slice %142 {offsets = [0, 32, 0], sizes = [1, 16, 8], strides = [1, 1, 1]} : vector<1x64x8xf32> to vector<1x16x8xf32>
    %157 = vector.shape_cast %156 : vector<1x16x8xf32> to vector<16x8xf32>
    %c2_77 = arith.constant 2 : index
    %c0_78 = arith.constant 0 : index
    %c0_79 = arith.constant 0 : index
    %158 = vector.load %arg17[%c2_77, %c0_78, %c0_79] : memref<4x8x32xf32, #tpu.memory_space<vmem>>, vector<1x8x32xf32>
    %159 = vector.shape_cast %158 : vector<1x8x32xf32> to vector<8x32xf32>
    %cst_80 = arith.constant dense<0.000000e+00> : vector<16x32xf32>
    %160 = tpu.matmul %157, %159, %cst_80 {dimension_numbers = #tpu.dot_dimension_numbers<[1], [0], [0], [1], [0, 0, 1, 1], [], []>} : vector<16x8xf32>, vector<8x32xf32>, vector<16x32xf32> -> vector<16x32xf32>
    %161 = arith.addf %155, %160 : vector<16x32xf32>
    %162 = vector.extract_strided_slice %142 {offsets = [0, 48, 0], sizes = [1, 16, 8], strides = [1, 1, 1]} : vector<1x64x8xf32> to vector<1x16x8xf32>
    %163 = vector.shape_cast %162 : vector<1x16x8xf32> to vector<16x8xf32>
    %c3 = arith.constant 3 : index
    %c0_81 = arith.constant 0 : index
    %c0_82 = arith.constant 0 : index
    %164 = vector.load %arg17[%c3, %c0_81, %c0_82] : memref<4x8x32xf32, #tpu.memory_space<vmem>>, vector<1x8x32xf32>
    %165 = vector.shape_cast %164 : vector<1x8x32xf32> to vector<8x32xf32>
    %cst_83 = arith.constant dense<0.000000e+00> : vector<16x32xf32>
    %166 = tpu.matmul %163, %165, %cst_83 {dimension_numbers = #tpu.dot_dimension_numbers<[1], [0], [0], [1], [0, 0, 1, 1], [], []>} : vector<16x8xf32>, vector<8x32xf32>, vector<16x32xf32> -> vector<16x32xf32>
    %167 = arith.addf %161, %166 : vector<16x32xf32>
    %c0_84 = arith.constant 0 : index
    %c0_85 = arith.constant 0 : index
    %168 = vector.load %arg18[%c0_84, %c0_85] : memref<1x32xf32, #tpu.memory_space<vmem>>, vector<1x32xf32>
    %169 = vector.shape_cast %168 : vector<1x32xf32> to vector<32xf32>
    %170 = vector.shape_cast %169 : vector<32xf32> to vector<1x32xf32>
    %171 = vector.broadcast %170 : vector<1x32xf32> to vector<16x32xf32>
    %172 = arith.addf %167, %171 : vector<16x32xf32>
    %173 = vector.extract_strided_slice %142 {offsets = [0, 48, 0], sizes = [1, 16, 8], strides = [1, 1, 1]} : vector<1x64x8xf32> to vector<1x16x8xf32>
    %174 = vector.shape_cast %173 : vector<1x16x8xf32> to vector<16x8xf32>
    %c0_86 = arith.constant 0 : index
    %c0_87 = arith.constant 0 : index
    %175 = vector.load %arg19[%c0_86, %c0_87] : memref<8x16xf32, #tpu.memory_space<vmem>>, vector<8x16xf32>
    %cst_88 = arith.constant dense<0.000000e+00> : vector<16x16xf32>
    %176 = tpu.matmul %174, %175, %cst_88 {dimension_numbers = #tpu.dot_dimension_numbers<[1], [0], [0], [1], [0, 0, 1, 1], [], []>} : vector<16x8xf32>, vector<8x16xf32>, vector<16x16xf32> -> vector<16x16xf32>
    %c0_89 = arith.constant 0 : index
    %c0_90 = arith.constant 0 : index
    %177 = vector.load %arg20[%c0_89, %c0_90] : memref<1x16xf32, #tpu.memory_space<vmem>>, vector<1x16xf32>
    %178 = vector.shape_cast %177 : vector<1x16xf32> to vector<16xf32>
    %179 = vector.shape_cast %178 : vector<16xf32> to vector<1x16xf32>
    %180 = vector.broadcast %179 : vector<1x16xf32> to vector<16x16xf32>
    %181 = arith.addf %176, %180 : vector<16x16xf32>
    %182 = vector.extract_strided_slice %172 {offsets = [0, 0], sizes = [16, 16], strides = [1, 1]} : vector<16x32xf32> to vector<16x16xf32>
    %183 = arith.addf %182, %181 : vector<16x16xf32>
    %184 = vector.extract_strided_slice %172 {offsets = [0, 16], sizes = [16, 16], strides = [1, 1]} : vector<16x32xf32> to vector<16x16xf32>
    %185 = arith.negf %184 : vector<16x16xf32>
    %186 = math.exp %185 : vector<16x16xf32>
    %cst_91 = arith.constant 1.000000e+00 : f32
    %187 = vector.broadcast %cst_91 : f32 to vector<16x16xf32>
    %188 = arith.addf %187, %186 : vector<16x16xf32>
    %189 = arith.divf %187, %188 : vector<16x16xf32>
    %190 = arith.mulf %183, %189 : vector<16x16xf32>
    %191 = vector.shape_cast %190 : vector<16x16xf32> to vector<1x16x16xf32>
    %192 = vector.shape_cast %191 : vector<1x16x16xf32> to vector<1x1x16x16xf32>
    %cst_92 = arith.constant dense<0.000000e+00> : vector<1x1x16xf32>
    %193 = vector.multi_reduction <add>, %192, %cst_92 [3] : vector<1x1x16x16xf32> to vector<1x1x16xf32>
    %194 = vector.shape_cast %193 : vector<1x1x16xf32> to vector<1x1x16x1xf32>
    %cst_93 = arith.constant 1.600000e+01 : f32
    %195 = vector.broadcast %cst_93 : f32 to vector<1x1x16x1xf32>
    %196 = arith.divf %194, %195 : vector<1x1x16x1xf32>
    %cst_94 = arith.constant dense<0.000000e+00> : vector<1x1x1xf32>
    %197 = vector.multi_reduction <add>, %196, %cst_94 [2] : vector<1x1x16x1xf32> to vector<1x1x1xf32>
    %198 = vector.shape_cast %197 : vector<1x1x1xf32> to vector<1x1x1x1xf32>
    %cst_95 = arith.constant 1.600000e+01 : f32
    %199 = vector.broadcast %cst_95 : f32 to vector<1x1x1x1xf32>
    %200 = arith.divf %198, %199 : vector<1x1x1x1xf32>
    %201 = vector.broadcast %200 : vector<1x1x1x1xf32> to vector<1x1x16x16xf32>
    %202 = arith.subf %192, %201 : vector<1x1x16x16xf32>
    %203 = arith.mulf %202, %202 : vector<1x1x16x16xf32>
    %cst_96 = arith.constant dense<0.000000e+00> : vector<1x1x16xf32>
    %204 = vector.multi_reduction <add>, %203, %cst_96 [3] : vector<1x1x16x16xf32> to vector<1x1x16xf32>
    %205 = vector.shape_cast %204 : vector<1x1x16xf32> to vector<1x1x16x1xf32>
    %cst_97 = arith.constant 1.600000e+01 : f32
    %206 = vector.broadcast %cst_97 : f32 to vector<1x1x16x1xf32>
    %207 = arith.divf %205, %206 : vector<1x1x16x1xf32>
    %cst_98 = arith.constant dense<0.000000e+00> : vector<1x1x1xf32>
    %208 = vector.multi_reduction <add>, %207, %cst_98 [2] : vector<1x1x16x1xf32> to vector<1x1x1xf32>
    %209 = vector.shape_cast %208 : vector<1x1x1xf32> to vector<1x1x1x1xf32>
    %cst_99 = arith.constant 1.600000e+01 : f32
    %210 = vector.broadcast %cst_99 : f32 to vector<1x1x1x1xf32>
    %211 = arith.divf %209, %210 : vector<1x1x1x1xf32>
    %cst_100 = arith.constant 9.99999974E-6 : f32
    %212 = vector.broadcast %cst_100 : f32 to vector<1x1x1x1xf32>
    %213 = arith.addf %211, %212 : vector<1x1x1x1xf32>
    %214 = math.rsqrt %213 : vector<1x1x1x1xf32>
    %215 = vector.broadcast %214 : vector<1x1x1x1xf32> to vector<1x1x16x16xf32>
    %216 = arith.mulf %202, %215 : vector<1x1x16x16xf32>
    %c0_101 = arith.constant 0 : index
    %c0_102 = arith.constant 0 : index
    %217 = vector.load %arg21[%c0_101, %c0_102] : memref<16x16xf32, #tpu.memory_space<vmem>>, vector<16x16xf32>
    %218 = vector.shape_cast %217 : vector<16x16xf32> to vector<1x1x16x16xf32>
    %219 = arith.mulf %216, %218 : vector<1x1x16x16xf32>
    %c0_103 = arith.constant 0 : index
    %c0_104 = arith.constant 0 : index
    %220 = vector.load %arg22[%c0_103, %c0_104] : memref<16x16xf32, #tpu.memory_space<vmem>>, vector<16x16xf32>
    %221 = vector.shape_cast %220 : vector<16x16xf32> to vector<1x1x16x16xf32>
    %222 = arith.addf %219, %221 : vector<1x1x16x16xf32>
    %223 = vector.shape_cast %222 : vector<1x1x16x16xf32> to vector<1x16x16xf32>
    %224 = vector.shape_cast %223 : vector<1x16x16xf32> to vector<16x16xf32>
    %c0_105 = arith.constant 0 : index
    %c0_106 = arith.constant 0 : index
    %225 = vector.load %arg23[%c0_105, %c0_106] : memref<16x16xf32, #tpu.memory_space<vmem>>, vector<16x16xf32>
    %cst_107 = arith.constant dense<0.000000e+00> : vector<16x16xf32>
    %226 = tpu.matmul %224, %225, %cst_107 {dimension_numbers = #tpu.dot_dimension_numbers<[1], [0], [0], [1], [0, 0, 1, 1], [], []>} : vector<16x16xf32>, vector<16x16xf32>, vector<16x16xf32> -> vector<16x16xf32>
    %c0_108 = arith.constant 0 : index
    %c0_109 = arith.constant 0 : index
    %227 = vector.load %arg24[%c0_108, %c0_109] : memref<1x16xf32, #tpu.memory_space<vmem>>, vector<1x16xf32>
    %228 = vector.shape_cast %227 : vector<1x16xf32> to vector<16xf32>
    %229 = vector.shape_cast %228 : vector<16xf32> to vector<1x16xf32>
    %230 = vector.broadcast %229 : vector<1x16xf32> to vector<16x16xf32>
    %231 = arith.addf %226, %230 : vector<16x16xf32>
    %cst_110 = arith.constant 0.000000e+00 : f32
    %232 = vector.broadcast %cst_110 : f32 to vector<16x16xf32>
    %233 = arith.maximumf %231, %232 : vector<16x16xf32>
    %c0_111 = arith.constant 0 : index
    %c0_112 = arith.constant 0 : index
    %234 = vector.load %arg25[%c0_111, %c0_112] : memref<16x1xf32, #tpu.memory_space<vmem>>, vector<16x1xf32>
    %cst_113 = arith.constant dense<0.000000e+00> : vector<16x1xf32>
    %235 = tpu.matmul %233, %234, %cst_113 {dimension_numbers = #tpu.dot_dimension_numbers<[1], [0], [0], [1], [0, 0, 1, 1], [], []>} : vector<16x16xf32>, vector<16x1xf32>, vector<16x1xf32> -> vector<16x1xf32>
    %c0_114 = arith.constant 0 : index
    %c0_115 = arith.constant 0 : index
    %236 = vector.load %arg26[%c0_114, %c0_115] : memref<1x1xf32, #tpu.memory_space<vmem>>, vector<1x1xf32>
    %237 = vector.shape_cast %236 : vector<1x1xf32> to vector<1xf32>
    %238 = vector.shape_cast %237 : vector<1xf32> to vector<1x1xf32>
    %239 = vector.broadcast %238 : vector<1x1xf32> to vector<16x1xf32>
    %240 = arith.addf %235, %239 : vector<16x1xf32>
    %241 = vector.shape_cast %240 : vector<16x1xf32> to vector<1x16x1xf32>
    %242 = tpu.transpose %241, [0, 2, 1] : vector<1x16x1xf32> -> vector<1x1x16xf32>
    %c0_116 = arith.constant 0 : index
    %c0_117 = arith.constant 0 : index
    %c0_118 = arith.constant 0 : index
    %243 = vector.load %arg27[%c0_116, %c0_117, %c0_118] : memref<1x1x16xf32, #tpu.memory_space<vmem>>, vector<1x1x16xf32>
    tpu.vector_store %arg27[%c0_116, %c0_117, %c0_118], %242 {strides = array<i32>} : memref<1x1x16xf32, #tpu.memory_space<vmem>>, vector<1x1x16xf32>,
    return
  }
  func.func @transform_0(%arg0: i32) -> (i32, i32, i32) {
    %c0_i32 = arith.constant 0 : i32
    %c0_i32_0 = arith.constant 0 : i32
    %c0_i32_1 = arith.constant 0 : i32
    return %arg0, %c0_i32, %c0_i32_0 : i32, i32, i32
  }
  func.func @transform_1(%arg0: i32) -> (i32, i32, i32) {
    %c0_i32 = arith.constant 0 : i32
    %c0_i32_0 = arith.constant 0 : i32
    %c0_i32_1 = arith.constant 0 : i32
    %c0_i32_2 = arith.constant 0 : i32
    return %c0_i32, %c0_i32_0, %c0_i32_1 : i32, i32, i32
  }
  func.func @transform_2(%arg0: i32) -> (i32, i32) {
    %c0_i32 = arith.constant 0 : i32
    %c0_i32_0 = arith.constant 0 : i32
    %c0_i32_1 = arith.constant 0 : i32
    return %c0_i32, %c0_i32_0 : i32, i32
  }
  func.func @transform_3(%arg0: i32) -> (i32, i32) {
    %c0_i32 = arith.constant 0 : i32
    %c0_i32_0 = arith.constant 0 : i32
    %c0_i32_1 = arith.constant 0 : i32
    return %c0_i32, %c0_i32_0 : i32, i32
  }
  func.func @transform_4(%arg0: i32) -> (i32, i32) {
    %c0_i32 = arith.constant 0 : i32
    %c0_i32_0 = arith.constant 0 : i32
    %c0_i32_1 = arith.constant 0 : i32
    return %c0_i32, %c0_i32_0 : i32, i32
  }
  func.func @transform_5(%arg0: i32) -> (i32, i32) {
    %c0_i32 = arith.constant 0 : i32
    %c0_i32_0 = arith.constant 0 : i32
    %c0_i32_1 = arith.constant 0 : i32
    return %c0_i32, %c0_i32_0 : i32, i32
  }
  func.func @transform_6(%arg0: i32) -> (i32, i32) {
    %c0_i32 = arith.constant 0 : i32
    %c0_i32_0 = arith.constant 0 : i32
    %c0_i32_1 = arith.constant 0 : i32
    return %c0_i32, %c0_i32_0 : i32, i32
  }
  func.func @transform_7(%arg0: i32) -> (i32, i32) {
    %c0_i32 = arith.constant 0 : i32
    %c0_i32_0 = arith.constant 0 : i32
    %c0_i32_1 = arith.constant 0 : i32
    return %c0_i32, %c0_i32_0 : i32, i32
  }
  func.func @transform_8(%arg0: i32) -> (i32, i32) {
    %c0_i32 = arith.constant 0 : i32
    %c0_i32_0 = arith.constant 0 : i32
    %c0_i32_1 = arith.constant 0 : i32
    return %c0_i32, %c0_i32_0 : i32, i32
  }
  func.func @transform_9(%arg0: i32) -> (i32, i32) {
    %c0_i32 = arith.constant 0 : i32
    %c0_i32_0 = arith.constant 0 : i32
    %c0_i32_1 = arith.constant 0 : i32
    return %c0_i32, %c0_i32_0 : i32, i32
  }
  func.func @transform_10(%arg0: i32) -> (i32, i32, i32) {
    %c0_i32 = arith.constant 0 : i32
    %c0_i32_0 = arith.constant 0 : i32
    %c0_i32_1 = arith.constant 0 : i32
    %c0_i32_2 = arith.constant 0 : i32
    return %c0_i32, %c0_i32_0, %c0_i32_1 : i32, i32, i32
  }
  func.func @transform_11(%arg0: i32) -> (i32, i32) {
    %c0_i32 = arith.constant 0 : i32
    %c0_i32_0 = arith.constant 0 : i32
    %c0_i32_1 = arith.constant 0 : i32
    return %c0_i32, %c0_i32_0 : i32, i32
  }
  func.func @transform_12(%arg0: i32) -> (i32, i32) {
    %c0_i32 = arith.constant 0 : i32
    %c0_i32_0 = arith.constant 0 : i32
    %c0_i32_1 = arith.constant 0 : i32
    return %c0_i32, %c0_i32_0 : i32, i32
  }
  func.func @transform_13(%arg0: i32) -> (i32, i32) {
    %c0_i32 = arith.constant 0 : i32
    %c0_i32_0 = arith.constant 0 : i32
    %c0_i32_1 = arith.constant 0 : i32
    return %c0_i32, %c0_i32_0 : i32, i32
  }
  func.func @transform_14(%arg0: i32) -> (i32, i32) {
    %c0_i32 = arith.constant 0 : i32
    %c0_i32_0 = arith.constant 0 : i32
    %c0_i32_1 = arith.constant 0 : i32
    return %c0_i32, %c0_i32_0 : i32, i32
  }
  func.func @transform_15(%arg0: i32) -> (i32, i32) {
    %c0_i32 = arith.constant 0 : i32
    %c0_i32_0 = arith.constant 0 : i32
    %c0_i32_1 = arith.constant 0 : i32
    return %c0_i32, %c0_i32_0 : i32, i32
  }
  func.func @transform_16(%arg0: i32) -> (i32, i32, i32) {
    %c0_i32 = arith.constant 0 : i32
    %c0_i32_0 = arith.constant 0 : i32
    %c0_i32_1 = arith.constant 0 : i32
    %c0_i32_2 = arith.constant 0 : i32
    return %c0_i32, %c0_i32_0, %c0_i32_1 : i32, i32, i32
  }
  func.func @transform_17(%arg0: i32) -> (i32, i32) {
    %c0_i32 = arith.constant 0 : i32
    %c0_i32_0 = arith.constant 0 : i32
    %c0_i32_1 = arith.constant 0 : i32
    return %c0_i32, %c0_i32_0 : i32, i32
  }
  func.func @transform_18(%arg0: i32) -> (i32, i32) {
    %c0_i32 = arith.constant 0 : i32
    %c0_i32_0 = arith.constant 0 : i32
    %c0_i32_1 = arith.constant 0 : i32
    return %c0_i32, %c0_i32_0 : i32, i32
  }
  func.func @transform_19(%arg0: i32) -> (i32, i32) {
    %c0_i32 = arith.constant 0 : i32
    %c0_i32_0 = arith.constant 0 : i32
    %c0_i32_1 = arith.constant 0 : i32
    return %c0_i32, %c0_i32_0 : i32, i32
  }
  func.func @transform_20(%arg0: i32) -> (i32, i32) {
    %c0_i32 = arith.constant 0 : i32
    %c0_i32_0 = arith.constant 0 : i32
    %c0_i32_1 = arith.constant 0 : i32
    return %c0_i32, %c0_i32_0 : i32, i32
  }
  func.func @transform_21(%arg0: i32) -> (i32, i32) {
    %c0_i32 = arith.constant 0 : i32
    %c0_i32_0 = arith.constant 0 : i32
    %c0_i32_1 = arith.constant 0 : i32
    return %c0_i32, %c0_i32_0 : i32, i32
  }
  func.func @transform_22(%arg0: i32) -> (i32, i32) {
    %c0_i32 = arith.constant 0 : i32
    %c0_i32_0 = arith.constant 0 : i32
    %c0_i32_1 = arith.constant 0 : i32
    return %c0_i32, %c0_i32_0 : i32, i32
  }
  func.func @transform_23(%arg0: i32) -> (i32, i32) {
    %c0_i32 = arith.constant 0 : i32
    %c0_i32_0 = arith.constant 0 : i32
    %c0_i32_1 = arith.constant 0 : i32
    return %c0_i32, %c0_i32_0 : i32, i32
  }
  func.func @transform_24(%arg0: i32) -> (i32, i32) {
    %c0_i32 = arith.constant 0 : i32
    %c0_i32_0 = arith.constant 0 : i32
    %c0_i32_1 = arith.constant 0 : i32
    return %c0_i32, %c0_i32_0 : i32, i32
  }
  func.func @transform_25(%arg0: i32) -> (i32, i32) {
    %c0_i32 = arith.constant 0 : i32
    %c0_i32_0 = arith.constant 0 : i32
    %c0_i32_1 = arith.constant 0 : i32
    return %c0_i32, %c0_i32_0 : i32, i32
  }
  func.func @transform_26(%arg0: i32) -> (i32, i32, i32) {
    %c0_i32 = arith.constant 0 : i32
    %c0_i32_0 = arith.constant 0 : i32
    %c0_i32_1 = arith.constant 0 : i32
    return %arg0, %c0_i32, %c0_i32_0 : i32, i32, i32
  }
}

</mosaic_0001>

<bundles_post_ra>
// kernel: tpu_custom_call.1
= control target key start
LH: loop header
LB: loop body
LE: loop exit
PB: predicated region body
PF: predicated region fallthrough
CT: control target
= control target key end

     0   :  { %s6798_s0 = inlined_call_operand.hbm [shape: f32[2,1,128], index: 0, kind: input, shape index: {}]   ;;  %s6799_s1 = inlined_call_operand.hbm [shape: f32[3,1,16], index: 1, kind: input, shape index: {}]   ;;  %s6800_s2 = inlined_call_operand.hbm [shape: f32[1,16], index: 2, kind: input, shape index: {}]   ;;  %s6801_s3 = inlined_call_operand.hbm [shape: f32[1,8], index: 3, kind: input, shape index: {}]   ;;  %s6802_s4 = inlined_call_operand.hbm [shape: f32[1,8], index: 4, kind: input, shape index: {}]   ;;  %s6803_s5 = inlined_call_operand.vmem [shape: f32[8,4], index: 5, kind: input, shape index: {}]   ;;  %s6804_s6 = inlined_call_operand.hbm [shape: f32[1,4], index: 6, kind: input, shape index: {}]   ;;  %s6805_s7 = inlined_call_operand.vmem [shape: f32[96,96], index: 7, kind: input, shape index: {}]   ;;  %s6806_s8 = inlined_call_operand.hbm [shape: f32[4,4], index: 8, kind: input, shape index: {}]   ;;  %s6807_s9 = inlined_call_operand.hbm [shape: f32[1,4], index: 9, kind: input, shape index: {}]   ;;  %s6808_s10 = inlined_call_operand.hbm [shape: f32[3,4,16], index: 10, kind: input, shape index: {}]   ;;  %s6809_s11 = inlined_call_operand.hbm [shape: f32[1,16], index: 11, kind: input, shape index: {}]   ;;  %s6810_s12 = inlined_call_operand.hbm [shape: f32[4,8], index: 12, kind: input, shape index: {}]   ;;  %s6811_s13 = inlined_call_operand.hbm [shape: f32[1,8], index: 13, kind: input, shape index: {}]   ;;  %s6812_s14 = inlined_call_operand.vmem [shape: f32[16,8], index: 14, kind: input, shape index: {}]   ;;  %s6813_s15 = inlined_call_operand.vmem [shape: f32[16,8], index: 15, kind: input, shape index: {}]   ;;  %s6814_s16 = inlined_call_operand.vmem [shape: f32[4,8,32], index: 16, kind: input, shape index: {}]   ;;  %s6815_s17 = inlined_call_operand.hbm [shape: f32[1,32], index: 17, kind: input, shape index: {}]   ;;  %s6816_s18 = inlined_call_operand.hbm [shape: f32[8,16], index: 18, kind: input, shape index: {}]   ;;  %s6817_s19 = inlined_call_operand.hbm [shape: f32[1,16], index: 19, kind: input, shape index: {}]   ;;  %s6818_s20 = inlined_call_operand.vmem [shape: f32[16,16], index: 20, kind: input, shape index: {}]   ;;  %s6819_s21 = inlined_call_operand.vmem [shape: f32[16,16], index: 21, kind: input, shape index: {}]   ;;  %s6820_s22 = inlined_call_operand.hbm [shape: f32[16,16], index: 22, kind: input, shape index: {}]   ;;  %s6821_s23 = inlined_call_operand.vmem [shape: f32[1,16], index: 23, kind: input, shape index: {}]   ;;  %s6822_s24 = inlined_call_operand.vmem [shape: f32[16,1], index: 24, kind: input, shape index: {}]   ;;  %s6823_s25 = inlined_call_operand.<no memory space> [shape: f32[1,1], index: 25, kind: input, shape index: {}]   ;;  %s6824_s26 = inlined_call_operand.hbm [shape: f32[2,1,16], index: 26, kind: output, shape index: {}]  }
   0x1   :  { %6854 = sst [smem:[#allocation40_spill]] %s6798_s0  ;;  %v31_v0 = vstv %s6823_s25 }
   0x2   :  { %6855 = sst [smem:[#allocation41_spill]] %s6799_s1  ;;  %32 = vst [vmem:[#allocation2] sm:$0x1] %v31_v0 }
   0x3   :  { %6856 = sst [smem:[#allocation42_spill]] %s6800_s2 }
   0x4   :  { %6857 = sst [smem:[#allocation43_spill]] %s6801_s3 }
   0x5   :  { %6858 = sst [smem:[#allocation44_spill]] %s6802_s4 }
   0x6   :  { %6859 = sst [smem:[#allocation45_spill]] %s6803_s5 }
   0x7   :  { %6860 = sst [smem:[#allocation46_spill]] %s6804_s6 }
   0x8   :  { %6861 = sst [smem:[#allocation47_spill]] %s6805_s7 }
   0x9   :  { %6862 = sst [smem:[#allocation48_spill]] %s6806_s8 }
   0xa   :  { %6863 = sst [smem:[#allocation49_spill]] %s6807_s9 }
   0xb   :  { %6864 = sst [smem:[#allocation50_spill]] %s6808_s10 }
   0xc   :  { %6865 = sst [smem:[#allocation51_spill]] %s6809_s11 }
   0xd   :  { %6866 = sst [smem:[#allocation52_spill]] %s6810_s12 }
   0xe   :  { %6867 = sst [smem:[#allocation53_spill]] %s6811_s13 }
   0xf   :  { %6868 = sst [smem:[#allocation54_spill]] %s6812_s14 }
  0x10   :  { %6869 = sst [smem:[#allocation55_spill]] %s6813_s15 }
  0x11   :  { %6870 = sst [smem:[#allocation56_spill]] %s6814_s16 }
  0x12   :  { %6871 = sst [smem:[#allocation57_spill]] %s6816_s18 }
  0x13   :  { %6872 = sst [smem:[#allocation58_spill]] %s6818_s20 }
  0x14   :  { %6873 = sst [smem:[#allocation59_spill]] %s6819_s21 }
  0x15   :  { %6874 = sst [smem:[#allocation60_spill]] %s6821_s23 }
  0x16   :  { %6875 = sst [smem:[#allocation61_spill]] %s6822_s24 }
  0x17   :  { %6876 = sst [smem:[#allocation62_spill]] %s6824_s26 }
  0x18   :  { %33 = vsyncpa [#allocation4], 0 }
  0x19   :  { %35 = vsyncpa [#allocation4 + $0x1], 0 }
  0x1a   :  { %36 = vsyncpa [#allocation7], 0 }
  0x1b   :  { %37 = vsyncpa [#allocation10], 0 }
  0x1c   :  { %38 = vsyncpa [#allocation13], 0 }
  0x1d   :  { %39 = vsyncpa [#allocation16], 0 }
  0x1e   :  { %40 = vsyncpa [#allocation19], 0 }
  0x1f   :  { %41 = vsyncpa [#allocation22], 0 }
  0x20   :  { %42 = vsyncpa [#allocation25], 0 }
  0x21   :  { %43 = vsyncpa [#allocation28], 0 }
  0x22   :  { %44 = vsyncpa [#allocation5], 0 }
  0x23   :  { %46 = vsyncpa [#allocation5 + $0x1], 0  ;;  %s5802_s7 = smov 0   ;;  %s5804_s28 = smov 0  }
  0x24   :  { %s5806_s8 = smov 0   ;;  %s5808_s25 = smov 0  }
  0x25 LB: > { %s5639_s4 = smov [#allocation6]   ;;  %s5823_s0 = sadd.s32 4294967295, %s5637_s25   ;;  %s5637_s25 = sphi %s5808_s25, %s6931_s25   ;;  %s5633_s8 = sphi %s5806_s8, %s6930_s8   ;;  %s5629_s28 = sphi %s5804_s28, %s6929_s28   ;;  %s5625_s7 = sphi %s5802_s7, %s6928_s7  }
  0x26   : > { %s646_s29 = sshll.u32 %s5639_s4, 4  ;;  %p4077_p0 = scmp.ge.s32.totalorder %s5637_s25, 1  ;;  %s5828_s29 = int_to_ptr.vmem [resolvable:$true] %s646_s29 }
  0x27   : > { %p6843_p1 = scmp.eq.s32.totalorder %s5823_s0, 0  ;;  %p634_p2 = scmp.lt.s32.totalorder %s5637_s25, 3 }
  0x28   : > { %s5640_s30 = smov [#allocation9]   ;;  %s5641_s10 = smov [#allocation12]  }
  0x29   : > { %p5830_p3 = pnand %p4077_p0, %p634_p2  ;;  %s671_s2 = sshll.u32 %s5640_s30, 4  ;;  %s5843_s2 = int_to_ptr.vmem [resolvable:$true] %s671_s2 }
  0x2a   : > { %s696_s6 = sshll.u32 %s5641_s10, 4  ;;  %s6879_s3 = sld [smem:[#allocation41_spill]]  ;;  %s5845_s6 = int_to_ptr.vmem [resolvable:$true] %s696_s6 }
  0x2b   : > { %s6877_s9 = scalar_select %p5830_p3, 1, 0 }
  0x2c   : > { %p4849_p5 = pneg %p5830_p3 }
  0x2e   : > { %p5839_p6 = pnand %p4849_p5, %p6843_p1 }
  0x30   : > { %s5089_s4 = scalar_lea.hbm %s6879_s3, 48  ;;  %p5855_p8 = pneg %p5839_p6 }
  0x31   : > { %p5090_p7 = scmp.ne.s32.totalorder %s6879_s3, %s5089_s4  ;;  %p5096_p11 = scmp.lt.u32.totalorder %s5089_s4, %s6879_s3 }
  0x33   : > { %p5092_p9 = pnand %p5855_p8, %p5090_p7 }
  0x35   : > { %p5093_p10 = pneg %p5092_p9 }
  0x37   : > { %p5098_p12 = pnand %p5096_p11, %p5093_p10 }
  0x39   : > { %5101 = shalt.err (!%p5098_p12)
}
  0x3a   : > { %s5102_s23 = scalar_lea.vmem %s5828_s29, 48  ;;  %s5109_s26 = scalar_lea.vmem %s5828_s29, 64 }
  0x3b   : > { %p5103_p13 = scmp.ne.s32.totalorder %s5828_s29, %s5102_s23  ;;  %p5110_p5 = scmp.lt.s32.totalorder %s5828_s29, %s5828_s29 }
  0x3c   : > { %p5111_p7 = scmp.lt.s32.totalorder %s5109_s26, %s5102_s23 }
  0x3d   : > { %p5105_p0 = pnand %p5103_p13, %p5855_p8 }
  0x3e   : > { %p5112_p9 = por %p5111_p7, %p5110_p5 }
  0x3f   : > { %p5106_p2 = pneg %p5105_p0 }
  0x41   : > { %p5113_p4 = pnand %p5112_p9, %p5106_p2 }
  0x43   : > { %5116 = shalt.err (!%p5113_p4)
}
  0x44   : > { %s5642_s24 = smov 16   ;;  %s5643_s1 = smov 1  }
  0x45   : > { %4852 = dma.hbm_to_vmem [thread:$0]  (!%p5839_p6), %s6879_s3, 48, %s5828_s29, [#allocation7], %s5642_s24, %s5642_s24, %s5643_s1  }
  0x46   : > { %s6881_s20 = sld [smem:[#allocation43_spill]] }
  0x4c   : > { %s5117_s15 = scalar_lea.hbm %s6881_s20, 16 }
  0x4d   : > { %p5118_p10 = scmp.ne.s32.totalorder %s6881_s20, %s5117_s15  ;;  %p5124_p12 = scmp.lt.u32.totalorder %s5117_s15, %s6881_s20 }
  0x4f   : > { %p5120_p4 = pnand %p5118_p10, %p5855_p8 }
  0x51   : > { %p5121_p11 = pneg %p5120_p4 }
  0x53   : > { %p5126_p13 = pnand %p5124_p12, %p5121_p11 }
  0x55   : > { %5129 = shalt.err (!%p5126_p13)
}
  0x56   : > { %s5130_s21 = scalar_lea.vmem %s5843_s2, 16  ;;  %s5137_s14 = scalar_lea.vmem %s5843_s2, 32 }
  0x57   : > { %p5131_p0 = scmp.ne.s32.totalorder %s5843_s2, %s5130_s21  ;;  %p5138_p7 = scmp.lt.s32.totalorder %s5843_s2, %s5843_s2 }
  0x58   : > { %p5139_p9 = scmp.lt.s32.totalorder %s5137_s14, %s5130_s21 }
  0x59   : > { %p5133_p2 = pnand %p5131_p0, %p5855_p8 }
  0x5a   : > { %p5140_p10 = por %p5139_p9, %p5138_p7 }
  0x5b   : > { %p5134_p5 = pneg %p5133_p2 }
  0x5d   : > { %p5141_p4 = pnand %p5140_p10, %p5134_p5 }
  0x5f   : > { %5144 = shalt.err (!%p5141_p4)
}
  0x60   : > { %4858 = dma.hbm_to_vmem [thread:$0]  (!%p5839_p6), %s6881_s20, 16, %s5843_s2, [#allocation10]  }
  0x61   : > { %s6882_s1 = sld [smem:[#allocation46_spill]] }
  0x67   : > { %s5145_s27 = scalar_lea.hbm %s6882_s1, 16 }
  0x68   : > { %p5146_p11 = scmp.ne.s32.totalorder %s6882_s1, %s5145_s27  ;;  %p5152_p0 = scmp.lt.u32.totalorder %s5145_s27, %s6882_s1 }
  0x6a   : > { %p5148_p12 = pnand %p5146_p11, %p5855_p8 }
  0x6c   : > { %p5149_p13 = pneg %p5148_p12 }
  0x6e   : > { %p5154_p2 = pnand %p5152_p0, %p5149_p13 }
  0x70   : > { %5157 = shalt.err (!%p5154_p2)
}
  0x71   : > { %s5158_s2 = scalar_lea.vmem %s5845_s6, 16  ;;  %s5165_s21 = scalar_lea.vmem %s5845_s6, 32 }
  0x72   : > { %p5159_p5 = scmp.ne.s32.totalorder %s5845_s6, %s5158_s2  ;;  %p5166_p10 = scmp.lt.s32.totalorder %s5845_s6, %s5845_s6 }
  0x73   : > { %p5167_p4 = scmp.lt.s32.totalorder %s5165_s21, %s5158_s2 }
  0x74   : > { %p5161_p7 = pnand %p5159_p5, %p5855_p8 }
  0x75   : > { %p5168_p11 = por %p5167_p4, %p5166_p10 }
  0x76   : > { %p5162_p9 = pneg %p5161_p7 }
  0x78   : > { %p5169_p12 = pnand %p5168_p11, %p5162_p9 }
  0x7a   : > { %5172 = shalt.err (!%p5169_p12)
}
  0x7b   : > { %4864 = dma.hbm_to_vmem [thread:$0]  (!%p5839_p6), %s6882_s1, 16, %s5845_s6, [#allocation13]  }
  0x7c   : > { %s5644_s16 = smov [#allocation15]   ;;  %s5645_s24 = smov [#allocation18]  }
  0x7d   : > { %s721_s29 = sshll.u32 %s5644_s16, 4  ;;  %s745_s27 = sshll.u32 %s5645_s24, 4  ;;  %s722_s29 = int_to_ptr.vmem [resolvable:$true] %s721_s29  ;;  %s746_s27 = int_to_ptr.vmem [resolvable:$true] %s745_s27 }
  0x7e   : > { %s6883_s23 = sld [smem:[#allocation49_spill]] }
  0x84   : > { %s5173_s26 = scalar_lea.hbm %s6883_s23, 16 }
  0x85   : > { %p5174_p13 = scmp.ne.s32.totalorder %s6883_s23, %s5173_s26  ;;  %p5180_p5 = scmp.lt.u32.totalorder %s5173_s26, %s6883_s23 }
  0x87   : > { %p5176_p0 = pnand %p5174_p13, %p5855_p8 }
  0x89   : > { %p5177_p2 = pneg %p5176_p0 }
  0x8b   : > { %p5182_p7 = pnand %p5180_p5, %p5177_p2 }
  0x8d   : > { %5185 = shalt.err (!%p5182_p7)
}
  0x8e   : > { %s5186_s6 = scalar_lea.vmem %s722_s29, 16  ;;  %s5193_s15 = scalar_lea.vmem %s722_s29, 32 }
  0x8f   : > { %p5187_p9 = scmp.ne.s32.totalorder %s722_s29, %s5186_s6  ;;  %p5194_p11 = scmp.lt.s32.totalorder %s722_s29, %s722_s29 }
  0x90   : > { %p5195_p12 = scmp.lt.s32.totalorder %s5193_s15, %s5186_s6 }
  0x91   : > { %p5189_p10 = pnand %p5187_p9, %p5855_p8 }
  0x92   : > { %p5196_p1 = por %p5195_p12, %p5194_p11 }
  0x93   : > { %p5190_p4 = pneg %p5189_p10 }
  0x95   : > { %p5197_p3 = pnand %p5196_p1, %p5190_p4 }
  0x97   : > { %5200 = shalt.err (!%p5197_p3)
}
  0x98   : > { %4870 = dma.hbm_to_vmem [thread:$0]  (!%p5839_p6), %s6883_s23, 16, %s722_s29, [#allocation16]  }
  0x99   : > { %s6884_s11 = sld [smem:[#allocation51_spill]] }
  0x9f   : > { %s5201_s10 = scalar_lea.hbm %s6884_s11, 16 }
  0xa0   : > { %p5202_p13 = scmp.ne.s32.totalorder %s6884_s11, %s5201_s10  ;;  %p5208_p3 = scmp.lt.u32.totalorder %s5201_s10, %s6884_s11 }
  0xa2   : > { %p5204_p0 = pnand %p5202_p13, %p5855_p8 }
  0xa4   : > { %p5205_p1 = pneg %p5204_p0 }
  0xa6   : > { %p5210_p2 = pnand %p5208_p3, %p5205_p1 }
  0xa8   : > { %5213 = shalt.err (!%p5210_p2)
}
  0xa9   : > { %s5214_s6 = scalar_lea.vmem %s746_s27, 16  ;;  %s5221_s29 = scalar_lea.vmem %s746_s27, 32 }
  0xaa   : > { %p5215_p5 = scmp.ne.s32.totalorder %s746_s27, %s5214_s6  ;;  %p5222_p10 = scmp.lt.s32.totalorder %s746_s27, %s746_s27 }
  0xab   : > { %p5223_p4 = scmp.lt.s32.totalorder %s5221_s29, %s5214_s6 }
  0xac   : > { %p5217_p7 = pnand %p5215_p5, %p5855_p8 }
  0xad   : > { %p5224_p11 = por %p5223_p4, %p5222_p10 }
  0xae   : > { %p5218_p9 = pneg %p5217_p7 }
  0xb0   : > { %p5225_p12 = pnand %p5224_p11, %p5218_p9 }
  0xb2   : > { %5228 = shalt.err (!%p5225_p12)
}
  0xb3   : > { %4876 = dma.hbm_to_vmem [thread:$0]  (!%p5839_p6), %s6884_s11, 16, %s746_s27, [#allocation19]  }
  0xb4   : > { %s5646_s24 = smov [#allocation21]   ;;  %s5647_s4 = smov [#allocation24]  }
  0xb5   : > { %s767_s3 = sshll.u32 %s5646_s24, 4  ;;  %s798_s10 = sshll.u32 %s5647_s4, 4  ;;  %s768_s3 = int_to_ptr.vmem [resolvable:$true] %s767_s3  ;;  %s799_s10 = int_to_ptr.vmem [resolvable:$true] %s798_s10 }
  0xb6   : > { %s6885_s13 = sld [smem:[#allocation53_spill]] }
  0xbc   : > { %s5229_s21 = scalar_lea.hbm %s6885_s13, 16 }
  0xbd   : > { %p5230_p13 = scmp.ne.s32.totalorder %s6885_s13, %s5229_s21  ;;  %p5236_p3 = scmp.lt.u32.totalorder %s5229_s21, %s6885_s13 }
  0xbf   : > { %p5232_p0 = pnand %p5230_p13, %p5855_p8 }
  0xc1   : > { %p5233_p1 = pneg %p5232_p0 }
  0xc3   : > { %p5238_p2 = pnand %p5236_p3, %p5233_p1 }
  0xc5   : > { %5241 = shalt.err (!%p5238_p2)
}
  0xc6   : > { %s5242_s27 = scalar_lea.vmem %s768_s3, 16  ;;  %s5249_s16 = scalar_lea.vmem %s768_s3, 32 }
  0xc7   : > { %p5243_p5 = scmp.ne.s32.totalorder %s768_s3, %s5242_s27  ;;  %p5250_p10 = scmp.lt.s32.totalorder %s768_s3, %s768_s3 }
  0xc8   : > { %p5251_p4 = scmp.lt.s32.totalorder %s5249_s16, %s5242_s27 }
  0xc9   : > { %p5245_p7 = pnand %p5243_p5, %p5855_p8 }
  0xca   : > { %p5252_p11 = por %p5251_p4, %p5250_p10 }
  0xcb   : > { %p5246_p9 = pneg %p5245_p7 }
  0xcd   : > { %p5253_p12 = pnand %p5252_p11, %p5246_p9 }
  0xcf   : > { %5256 = shalt.err (!%p5253_p12)
}
  0xd0   : > { %4882 = dma.hbm_to_vmem [thread:$0]  (!%p5839_p6), %s6885_s13, 16, %s768_s3, [#allocation22]  }
  0xd1   : > { %s6886_s18 = sld [smem:[#allocation57_spill]] }
  0xd7   : > { %s5257_s21 = scalar_lea.hbm %s6886_s18, 128 }
  0xd8   : > { %p5258_p13 = scmp.ne.s32.totalorder %s6886_s18, %s5257_s21  ;;  %p5264_p3 = scmp.lt.u32.totalorder %s5257_s21, %s6886_s18 }
  0xda   : > { %p5260_p0 = pnand %p5258_p13, %p5855_p8 }
  0xdc   : > { %p5261_p1 = pneg %p5260_p0 }
  0xde   : > { %p5266_p2 = pnand %p5264_p3, %p5261_p1 }
  0xe0   : > { %5269 = shalt.err (!%p5266_p2)
}
  0xe1   : > { %s5270_s27 = scalar_lea.vmem %s799_s10, 128  ;;  %p5278_p10 = scmp.lt.s32.totalorder %s799_s10, %s799_s10 }
  0xe2   : > { %p5271_p5 = scmp.ne.s32.totalorder %s799_s10, %s5270_s27  ;;  %p5279_p4 = scmp.lt.s32.totalorder %s5270_s27, %s5270_s27 }
  0xe4   : > { %p5273_p7 = pnand %p5271_p5, %p5855_p8  ;;  %p5280_p11 = por %p5279_p4, %p5278_p10 }
  0xe6   : > { %p5274_p9 = pneg %p5273_p7 }
  0xe8   : > { %p5281_p12 = pnand %p5280_p11, %p5274_p9 }
  0xea   : > { %5284 = shalt.err (!%p5281_p12)
}
  0xeb   : > { %4888 = dma.hbm_to_vmem [thread:$0]  (!%p5839_p6), %s6886_s18, 128, %s799_s10, [#allocation25]  }
  0xec   : > { %s5648_s24 = smov [#allocation8]   ;;  %s5649_s26 = smov [#allocation11]  }
  0xed   : > { %s660_s4 = sshll.u32 %s5648_s24, 4  ;;  %s682_s2 = sshll.u32 %s5649_s26, 4  ;;  %s661_s4 = int_to_ptr.vmem [resolvable:$true] %s660_s4  ;;  %s683_s2 = int_to_ptr.vmem [resolvable:$true] %s682_s2 }
  0xee   : > { %s6887_s6 = sld [smem:[#allocation42_spill]] }
  0xf4   : > { %s5285_s29 = scalar_lea.hbm %s6887_s6, 16 }
  0xf5   : > { %p5286_p13 = scmp.ne.s32.totalorder %s6887_s6, %s5285_s29  ;;  %p5292_p3 = scmp.lt.u32.totalorder %s5285_s29, %s6887_s6 }
  0xf7   : > { %p5288_p0 = pnand %p5286_p13, %p5855_p8 }
  0xf9   : > { %p5289_p1 = pneg %p5288_p0 }
  0xfb   : > { %p5294_p2 = pnand %p5292_p3, %p5289_p1 }
  0xfd   : > { %5297 = shalt.err (!%p5294_p2)
}
  0xfe   : > { %s5298_s10 = scalar_lea.vmem %s661_s4, 16  ;;  %s5305_s16 = scalar_lea.vmem %s661_s4, 32 }
  0xff   : > { %p5299_p5 = scmp.ne.s32.totalorder %s661_s4, %s5298_s10  ;;  %p5306_p10 = scmp.lt.s32.totalorder %s661_s4, %s661_s4 }
 0x100   : > { %p5307_p4 = scmp.lt.s32.totalorder %s5305_s16, %s5298_s10 }
 0x101   : > { %p5301_p7 = pnand %p5299_p5, %p5855_p8 }
 0x102   : > { %p5308_p11 = por %p5307_p4, %p5306_p10 }
 0x103   : > { %p5302_p9 = pneg %p5301_p7 }
 0x105   : > { %p5309_p12 = pnand %p5308_p11, %p5302_p9 }
 0x107   : > { %5312 = shalt.err (!%p5309_p12)
}
 0x108   : > { %4855 = dma.hbm_to_vmem [thread:$0]  (!%p5839_p6), %s6887_s6, 16, %s661_s4, [#allocation7]  }
 0x109   : > { %s6888_s14 = sld [smem:[#allocation44_spill]] }
 0x10f   : > { %s5313_s29 = scalar_lea.hbm %s6888_s14, 16 }
 0x110   : > { %p5314_p13 = scmp.ne.s32.totalorder %s6888_s14, %s5313_s29  ;;  %p5320_p3 = scmp.lt.u32.totalorder %s5313_s29, %s6888_s14 }
 0x112   : > { %p5316_p0 = pnand %p5314_p13, %p5855_p8 }
 0x114   : > { %p5317_p1 = pneg %p5316_p0 }
 0x116   : > { %p5322_p2 = pnand %p5320_p3, %p5317_p1 }
 0x118   : > { %5325 = shalt.err (!%p5322_p2)
}
 0x119   : > { %s5326_s16 = scalar_lea.vmem %s683_s2, 16  ;;  %s5333_s4 = scalar_lea.vmem %s683_s2, 32 }
 0x11a   : > { %p5327_p5 = scmp.ne.s32.totalorder %s683_s2, %s5326_s16  ;;  %p5334_p10 = scmp.lt.s32.totalorder %s683_s2, %s683_s2 }
 0x11b   : > { %p5335_p4 = scmp.lt.s32.totalorder %s5333_s4, %s5326_s16 }
 0x11c   : > { %p5329_p7 = pnand %p5327_p5, %p5855_p8 }
 0x11d   : > { %p5336_p11 = por %p5335_p4, %p5334_p10 }
 0x11e   : > { %p5330_p9 = pneg %p5329_p7 }
 0x120   : > { %p5337_p12 = pnand %p5336_p11, %p5330_p9 }
 0x122   : > { %5340 = shalt.err (!%p5337_p12)
}
 0x123   : > { %4861 = dma.hbm_to_vmem [thread:$0]  (!%p5839_p6), %s6888_s14, 16, %s683_s2, [#allocation10]  }
 0x124   : > { %s5650_s1 = smov [#allocation14]   ;;  %s5651_s29 = smov [#allocation17]  }
 0x125   : > { %s710_s21 = sshll.u32 %s5650_s1, 4  ;;  %s731_s15 = sshll.u32 %s5651_s29, 4  ;;  %s711_s21 = int_to_ptr.vmem [resolvable:$true] %s710_s21  ;;  %s732_s15 = int_to_ptr.vmem [resolvable:$true] %s731_s15 }
 0x126   : > { %s6889_s10 = sld [smem:[#allocation48_spill]] }
 0x12c   : > { %s5341_s6 = scalar_lea.hbm %s6889_s10, 64 }
 0x12d   : > { %p5342_p13 = scmp.ne.s32.totalorder %s6889_s10, %s5341_s6  ;;  %p5348_p3 = scmp.lt.u32.totalorder %s5341_s6, %s6889_s10 }
 0x12f   : > { %p5344_p0 = pnand %p5342_p13, %p5855_p8 }
 0x131   : > { %p5345_p1 = pneg %p5344_p0 }
 0x133   : > { %p5350_p2 = pnand %p5348_p3, %p5345_p1 }
 0x135   : > { %5353 = shalt.err (!%p5350_p2)
}
 0x136   : > { %s5354_s2 = scalar_lea.vmem %s711_s21, 64  ;;  %p5362_p10 = scmp.lt.s32.totalorder %s711_s21, %s711_s21 }
 0x137   : > { %p5355_p5 = scmp.ne.s32.totalorder %s711_s21, %s5354_s2  ;;  %p5363_p4 = scmp.lt.s32.totalorder %s5354_s2, %s5354_s2 }
 0x139   : > { %p5357_p7 = pnand %p5355_p5, %p5855_p8  ;;  %p5364_p11 = por %p5363_p4, %p5362_p10 }
 0x13b   : > { %p5358_p9 = pneg %p5357_p7 }
 0x13d   : > { %p5365_p12 = pnand %p5364_p11, %p5358_p9 }
 0x13f   : > { %5368 = shalt.err (!%p5365_p12)
}
 0x140   : > { %4867 = dma.hbm_to_vmem [thread:$0]  (!%p5839_p6), %s6889_s10, 64, %s711_s21, [#allocation13]  }
 0x141   : > { %s6890_s29 = sld [smem:[#allocation50_spill]] }
 0x147   : > { %s5369_s27 = scalar_lea.hbm %s6890_s29, 192 }
 0x148   : > { %p5370_p13 = scmp.ne.s32.totalorder %s6890_s29, %s5369_s27  ;;  %p5376_p3 = scmp.lt.u32.totalorder %s5369_s27, %s6890_s29 }
 0x14a   : > { %p5372_p0 = pnand %p5370_p13, %p5855_p8 }
 0x14c   : > { %p5373_p1 = pneg %p5372_p0 }
 0x14e   : > { %p5378_p2 = pnand %p5376_p3, %p5373_p1 }
 0x150   : > { %5381 = shalt.err (!%p5378_p2)
}
 0x151   : > { %s5382_s2 = scalar_lea.vmem %s732_s15, 192  ;;  %p5390_p10 = scmp.lt.s32.totalorder %s732_s15, %s732_s15 }
 0x152   : > { %p5383_p5 = scmp.ne.s32.totalorder %s732_s15, %s5382_s2  ;;  %p5391_p4 = scmp.lt.s32.totalorder %s5382_s2, %s5382_s2 }
 0x154   : > { %p5385_p7 = pnand %p5383_p5, %p5855_p8  ;;  %p5392_p11 = por %p5391_p4, %p5390_p10 }
 0x156   : > { %p5386_p9 = pneg %p5385_p7 }
 0x158   : > { %p5393_p12 = pnand %p5392_p11, %p5386_p9 }
 0x15a   : > { %5396 = shalt.err (!%p5393_p12)
}
 0x15b   : > { %s5652_s21 = smov 64   ;;  %s5653_s26 = smov 4  }
 0x15c   : > { %4873 = dma.hbm_to_vmem [thread:$0]  (!%p5839_p6), %s6890_s29, 192, %s732_s15, [#allocation16], %s5652_s21, %s5652_s21, %s5653_s26  }
 0x15d   : > { %s5654_s6 = smov [#allocation20]   ;;  %s5655_s3 = smov [#allocation23]  }
 0x15e   : > { %s756_s27 = sshll.u32 %s5654_s6, 4  ;;  %s787_s16 = sshll.u32 %s5655_s3, 4  ;;  %s757_s27 = int_to_ptr.vmem [resolvable:$true] %s756_s27  ;;  %s788_s16 = int_to_ptr.vmem [resolvable:$true] %s787_s16 }
 0x15f   : > { %s6891_s12 = sld [smem:[#allocation52_spill]] }
 0x165   : > { %s5397_s2 = scalar_lea.hbm %s6891_s12, 64 }
 0x166   : > { %p5398_p13 = scmp.ne.s32.totalorder %s6891_s12, %s5397_s2  ;;  %p5404_p3 = scmp.lt.u32.totalorder %s5397_s2, %s6891_s12 }
 0x168   : > { %p5400_p0 = pnand %p5398_p13, %p5855_p8 }
 0x16a   : > { %p5401_p1 = pneg %p5400_p0 }
 0x16c   : > { %p5406_p2 = pnand %p5404_p3, %p5401_p1 }
 0x16e   : > { %5409 = shalt.err (!%p5406_p2)
}
 0x16f   : > { %s5410_s15 = scalar_lea.vmem %s757_s27, 64  ;;  %p5418_p10 = scmp.lt.s32.totalorder %s757_s27, %s757_s27 }
 0x170   : > { %p5411_p5 = scmp.ne.s32.totalorder %s757_s27, %s5410_s15  ;;  %p5419_p4 = scmp.lt.s32.totalorder %s5410_s15, %s5410_s15 }
 0x172   : > { %p5413_p7 = pnand %p5411_p5, %p5855_p8  ;;  %p5420_p11 = por %p5419_p4, %p5418_p10 }
 0x174   : > { %p5414_p9 = pneg %p5413_p7 }
 0x176   : > { %p5421_p12 = pnand %p5420_p11, %p5414_p9 }
 0x178   : > { %5424 = shalt.err (!%p5421_p12)
}
 0x179   : > { %4879 = dma.hbm_to_vmem [thread:$0]  (!%p5839_p6), %s6891_s12, 64, %s757_s27, [#allocation19]  }
 0x17a   : > { %s5425_s21 = scalar_lea.hbm %s6815_s17, 16 }
 0x17b   : > { %p5426_p13 = scmp.ne.s32.totalorder %s6815_s17, %s5425_s21  ;;  %p5432_p3 = scmp.lt.u32.totalorder %s5425_s21, %s6815_s17 }
 0x17d   : > { %p5428_p0 = pnand %p5426_p13, %p5855_p8 }
 0x17f   : > { %p5429_p1 = pneg %p5428_p0 }
 0x181   : > { %p5434_p2 = pnand %p5432_p3, %p5429_p1 }
 0x183   : > { %5437 = shalt.err (!%p5434_p2)
}
 0x184   : > { %s5438_s3 = scalar_lea.vmem %s788_s16, 16  ;;  %s5445_s27 = scalar_lea.vmem %s788_s16, 32 }
 0x185   : > { %p5439_p5 = scmp.ne.s32.totalorder %s788_s16, %s5438_s3  ;;  %p5446_p10 = scmp.lt.s32.totalorder %s788_s16, %s788_s16 }
 0x186   : > { %p5447_p4 = scmp.lt.s32.totalorder %s5445_s27, %s5438_s3 }
 0x187   : > { %p5441_p7 = pnand %p5439_p5, %p5855_p8 }
 0x188   : > { %p5448_p11 = por %p5447_p4, %p5446_p10 }
 0x189   : > { %p5442_p9 = pneg %p5441_p7 }
 0x18b   : > { %p5449_p12 = pnand %p5448_p11, %p5442_p9 }
 0x18d   : > { %5452 = shalt.err (!%p5449_p12)
}
 0x18e   : > { %4885 = dma.hbm_to_vmem [thread:$0]  (!%p5839_p6), %s6815_s17, 16, %s788_s16, [#allocation22]  }
 0x18f   : > { %s5656_s2 = smov [#allocation26]   ;;  %s5657_s13 = smov [#allocation27]  }
 0x190   : > { %s809_s15 = sshll.u32 %s5656_s2, 4  ;;  %s825_s10 = sshll.u32 %s5657_s13, 4  ;;  %s810_s15 = int_to_ptr.vmem [resolvable:$true] %s809_s15  ;;  %s826_s10 = int_to_ptr.vmem [resolvable:$true] %s825_s10 }
 0x191   : > { %s5453_s21 = scalar_lea.hbm %s6817_s19, 16 }
 0x192   : > { %p5454_p13 = scmp.ne.s32.totalorder %s6817_s19, %s5453_s21  ;;  %p5460_p3 = scmp.lt.u32.totalorder %s5453_s21, %s6817_s19 }
 0x194   : > { %p5456_p0 = pnand %p5454_p13, %p5855_p8 }
 0x196   : > { %p5457_p1 = pneg %p5456_p0 }
 0x198   : > { %p5462_p2 = pnand %p5460_p3, %p5457_p1 }
 0x19a   : > { %5465 = shalt.err (!%p5462_p2)
}
 0x19b   : > { %s5466_s16 = scalar_lea.vmem %s810_s15, 16  ;;  %s5473_s3 = scalar_lea.vmem %s810_s15, 32 }
 0x19c   : > { %p5467_p5 = scmp.ne.s32.totalorder %s810_s15, %s5466_s16  ;;  %p5474_p10 = scmp.lt.s32.totalorder %s810_s15, %s810_s15 }
 0x19d   : > { %p5475_p4 = scmp.lt.s32.totalorder %s5473_s3, %s5466_s16 }
 0x19e   : > { %p5469_p7 = pnand %p5467_p5, %p5855_p8 }
 0x19f   : > { %p5476_p11 = por %p5475_p4, %p5474_p10 }
 0x1a0   : > { %p5470_p9 = pneg %p5469_p7 }
 0x1a2   : > { %p5477_p12 = pnand %p5476_p11, %p5470_p9 }
 0x1a4   : > { %5480 = shalt.err (!%p5477_p12)
}
 0x1a5   : > { %4891 = dma.hbm_to_vmem [thread:$0]  (!%p5839_p6), %s6817_s19, 16, %s810_s15, [#allocation25]  }
 0x1a6   : > { %s5481_s13 = scalar_lea.hbm %s6820_s22, 256 }
 0x1a7   : > { %p5482_p13 = scmp.ne.s32.totalorder %s6820_s22, %s5481_s13  ;;  %p5488_p3 = scmp.lt.u32.totalorder %s5481_s13, %s6820_s22 }
 0x1a9   : > { %p5484_p0 = pnand %p5482_p13, %p5855_p8 }
 0x1ab   : > { %p5485_p1 = pneg %p5484_p0 }
 0x1ad   : > { %p5490_p2 = pnand %p5488_p3, %p5485_p1 }
 0x1af   : > { %5493 = shalt.err (!%p5490_p2)
}
 0x1b0   : > { %s5494_s1 = scalar_lea.vmem %s826_s10, 256  ;;  %p5502_p10 = scmp.lt.s32.totalorder %s826_s10, %s826_s10 }
 0x1b1   : > { %p5495_p5 = scmp.ne.s32.totalorder %s826_s10, %s5494_s1  ;;  %p5503_p4 = scmp.lt.s32.totalorder %s5494_s1, %s5494_s1 }
 0x1b3   : > { %p5497_p7 = pnand %p5495_p5, %p5855_p8  ;;  %p5504_p11 = por %p5503_p4, %p5502_p10 }
 0x1b5   : > { %p5498_p9 = pneg %p5497_p7 }
 0x1b7   : > { %p5505_p12 = pnand %p5504_p11, %p5498_p9 }
 0x1b9   : > { %5508 = shalt.err (!%p5505_p12)
}
 0x1ba   : > { %s5658_s15 = smov 128   ;;  %s5659_s30 = smov 8  }
 0x1bb   : > { %4894 = dma.hbm_to_vmem [thread:$0]  (!%p5839_p6), %s6820_s22, 256, %s826_s10, [#allocation28], %s5658_s15, %s5658_s15, %s5659_s30  }
 0x1bc   : > { %s4076_s16 = sadd.s32 4294967294, %s5637_s25   ;;  %s6143_s3 = sadd.s32 1, %s5637_s25  }
 0x1bd   : > { %s59_s27 = sadd.s32 1, %s5633_s8  ;;  %s56_s4 = ssub.s32 %s5637_s25, %s6143_s3 }
 0x1be   : > { %p66_p8 = scmp.ne.s32.totalorder %s5633_s8, %s5629_s28  ;;  %p57_p13 = scmp.eq.s32.totalorder %s56_s4, 0 }
 0x1bf   : > { %p67_p0 = scmp.eq.s32.totalorder %s5637_s25, 0  ;;  %p72_p1 = scmp.ne.s32.totalorder %s5629_s28, %s5625_s7 }
 0x1c0   : > { %p621_p3 = scmp.eq.s32.totalorder %s5823_s0, 1  ;;  %p6892_p5 = scmp.eq.s32.totalorder %s5823_s0, 0 }
 0x1c1   : > { %s6155_s24 = scalar_select %p57_p13, %s5633_s8, %s59_s27  }
 0x1c2   : > { %p68_p2 = por %p67_p0, %p66_p8  ;;  %p6159_p7 = por %p6892_p5, %p72_p1 }
 0x1c3   : > { %p6163_p6 = por %p621_p3, %p66_p8  ;;  %p627_p9 = scmp.eq.s32.totalorder %s4076_s16, 1 }
 0x1c4   : > { %p4918_p10 = scmp.lt.s32.totalorder %s5637_s25, 2  ;;  %s848_s2 = sand.u32 1, %s5633_s8  }
 0x1c5   : > { %s6894_s10 = scalar_select %p6163_p6, 1, 0 }
 0x1c6   : > { %p6169_p4 = por %p627_p9, %p72_p1  ;;  %s4094_s18 = sshll.u32 %s5637_s25, 4 }
 0x1c7   : > { %s6896_s26 = sld [smem:[#allocation40_spill]]  ;;  %s851_s15 = scalar_lea.vmem [#allocation3], %s848_s2 }
 0x1c8   : > { %s6895_s13 = scalar_select %p6169_p4, 1, 0 }
 0x1c9   : > { %s858_s30 = sshll.u32 %s851_s15, 4  ;;  %p6181_p11 = pnand %p4918_p10, %p68_p2  ;;  %s6179_s30 = int_to_ptr.vmem [resolvable:$true] %s858_s30 }
 0x1ca   : > { %s849_s6 = scalar_lea.sflag [#allocation4], %s848_s2 }
 0x1cb   : > { %p5511_p8 = pneg %p6181_p11 }
 0x1cd   : > { %s6177_s1 = scalar_lea.hbm %s6896_s26, %s4094_s18  ;;  %s5514_s18 = scalar_lea.hbm %s6896_s26, 32 }
 0x1ce   : > { %s5509_s16 = scalar_lea.hbm %s6177_s1, 16  ;;  %p5515_p1 = scmp.lt.u32.totalorder %s6177_s1, %s6896_s26 }
 0x1cf   : > { %p5510_p12 = scmp.ne.s32.totalorder %s6177_s1, %s5509_s16  ;;  %p5516_p3 = scmp.lt.u32.totalorder %s5514_s18, %s5509_s16 }
 0x1d0   : > { %p5518_p5 = scmp.lt.u32.totalorder %s5509_s16, %s6177_s1 }
 0x1d1   : > { %p5512_p13 = pnand %p5511_p8, %p5510_p12  ;;  %p5517_p2 = por %p5516_p3, %p5515_p1 }
 0x1d3   : > { %p5513_p0 = pneg %p5512_p13  ;;  %p5519_p9 = por %p5518_p5, %p5517_p2 }
 0x1d5   : > { %p5520_p10 = pnand %p5519_p9, %p5513_p0 }
 0x1d7   : > { %5523 = shalt.err (!%p5520_p10)
}
 0x1d8   : > { %s5524_s2 = scalar_lea.vmem %s6179_s30, 16  ;;  %s5660_s15 = smov [#allocation3]  }
 0x1d9   : > { %p5525_p12 = scmp.ne.s32.totalorder %s6179_s30, %s5524_s2  ;;  %s5529_s27 = sshll.u32 %s5660_s15, 4  ;;  %s5530_s27 = int_to_ptr.vmem [resolvable:$false] %s5529_s27 }
 0x1da   : > { %s5531_s4 = scalar_lea.vmem %s5530_s27, 32  ;;  %p5532_p6 = scmp.lt.s32.totalorder %s6179_s30, %s5530_s27 }
 0x1db   : > { %p5527_p13 = pnand %p5525_p12, %p5511_p8  ;;  %p5533_p1 = scmp.lt.s32.totalorder %s5531_s4, %s5524_s2 }
 0x1dd   : > { %p5528_p4 = pneg %p5527_p13  ;;  %p5534_p3 = por %p5533_p1, %p5532_p6 }
 0x1df   : > { %p5535_p2 = pnand %p5534_p3, %p5528_p4 }
 0x1e1   : > { %5538 = shalt.err (!%p5535_p2)
}
 0x1e2   : > { %4898 = dma.hbm_to_vmem [thread:$0]  (!%p6181_p11), %s6177_s1, 16, %s6179_s30, %s849_s6  }
 0x1e3   : > { %p6898_p0 = scmp.ne.s32.totalorder %s6877_s9, 0 }
 0x1e4   : > { %s6213_s16 = sand.u32 (!%p6898_p0), 1, %s5629_s28  }
 0x1e5   : > { %867 = sbr.rel (%p6898_p0) target bundleno = 3772 (0xebc), region = 124  ;;  %s870_s18 = scalar_lea.sflag (!%p6898_p0), [#allocation4], %s6213_s16 }
 0x1e6   : > { %s872_s14 = scalar_lea.vmem (!%p6898_p0), [#allocation3], %s6213_s16 }
 0x1ec   : > { %5584 = dma.done.wait (%p6159_p7), %s870_s18, 16  }
 0x1ed   : > { %5586 = vsyncadd (%p6159_p7), %s870_s18, 4294967280  ;;  %p6899_p6 = scmp.eq.s32.totalorder %s5823_s0, 0 }
 0x1ef   : > { %5588 = dma.done.wait (%p6899_p6), [#allocation7], 64   ;;  %p6900_p4 = pmov %p6899_p6 }
 0x1f1   : > { %5590 = vsyncadd (%p6900_p4), [#allocation7], 4294967232  ;;  %p6901_p11 = pmov %p6900_p4 }
 0x1f2   : > { %p6902_p8 = pmov %p6900_p4 }
 0x1f3   : > { %5592 = dma.done.wait (%p6901_p11), [#allocation10], 32  }
 0x1f4   : > { %5594 = vsyncadd (%p6902_p8), [#allocation10], 4294967264  ;;  %p6903_p5 = pmov %p6900_p4 }
 0x1f5   : > { %p6904_p9 = pmov %p6900_p4 }
 0x1f6   : > { %5596 = dma.done.wait (%p6903_p5), [#allocation13], 80  }
 0x1f7   : > { %5598 = vsyncadd (%p6904_p9), [#allocation13], 4294967216  ;;  %p6905_p7 = pmov %p6900_p4 }
 0x1f8   : > { %p6906_p10 = pmov %p6900_p4 }
 0x1f9   : > { %5600 = dma.done.wait (%p6905_p7), [#allocation16], 208  }
 0x1fa   : > { %5602 = vsyncadd (%p6906_p10), [#allocation16], 4294967088  ;;  %p6907_p12 = pmov %p6900_p4 }
 0x1fb   : > { %p6908_p13 = pmov %p6900_p4 }
 0x1fc   : > { %5604 = dma.done.wait (%p6907_p12), [#allocation19], 80  }
 0x1fd   : > { %5606 = vsyncadd (%p6908_p13), [#allocation19], 4294967216  ;;  %p6909_p1 = pmov %p6900_p4 }
 0x1ff   : > { %5608 = dma.done.wait (%p6909_p1), [#allocation22], 32   ;;  %p6910_p3 = pmov %p6909_p1 }
 0x200   : > { %p6911_p2 = pmov %p6909_p1 }
 0x201   : > { %5610 = vsyncadd (%p6910_p3), [#allocation22], 4294967264 }
 0x202   : > { %5612 = dma.done.wait (%p6911_p2), [#allocation25], 144   ;;  %p6912_p0 = pmov %p6909_p1 }
 0x204   : > { %5614 = vsyncadd (%p6912_p0), [#allocation25], 4294967152  ;;  %p6913_p6 = pmov %p6912_p0 }
 0x205   : > { %p6914_p4 = pmov %p6912_p0 }
 0x206   : > { %5616 = dma.done.wait (%p6913_p6), [#allocation28], 256  }
 0x207   : > { %5618 = vsyncadd (%p6914_p4), [#allocation28], 4294967040  ;;  %vm1107_vm0 = vcmask 1040384   ;;  %v4111_v1 = vld [vmem:[%s872_s14] ss:$0 sm:$0xff]  ;;  %vm1070_vm1 = vcmask 7168  }
 0x208   : > { %v1069_v2 = vld [vmem:[#allocation6 + $0x1] sm:$0x1]  ;;  %1013 = vbcast.lane.b32.xlu0 %v4111_v1, 272  ;;  %1021 = vbcast.lane.b32.xlu1 %v4111_v1, 288  ;;  %v1067_v3 = vld [vmem:[#allocation6] sm:$0x1] }
 0x209   : > { %v1537_v4 = vld [vmem:[#allocation9] sm:$0x1]  ;;  %4450 = vmatprep.subr.msk.mxu0 %vm1107_vm0, %v1069_v2  ;;  %v1371_v9 = vld [vmem:[#allocation6 + $0x2] sm:$0x1]  ;;  %s6915_s1 = sld [smem:[#allocation45_spill]]  ;;  %s5661_s30 = smov 120  }
 0x20a   : > { %4510 = vmatprep.subr.msk.mxu1 %vm1107_vm0, %v1537_v4  ;;  %4451 = vmatpush3.msk.msra.mxu0 %vm1107_vm0, %v1069_v2  ;;  %v6316_v35 = vld [vmem:[#allocation11] ss:$0 sm:$0xff]  ;;  %v6318_v36 = vld [vmem:[#allocation8] ss:$0 sm:$0xff]  ;;  %vm1825_vm2 = vcmask 64512   ;;  %s6916_s21 = sld [smem:[#allocation47_spill]] }
 0x20b   : > { %4511 = vmatpush3.msk.msra.mxu1 %vm1107_vm0, %v1537_v4  ;;  %4470 = vmatprep.subr.msk.mxu0 %vm1107_vm0, %v1067_v3  ;;  %vm1999_vm3 = vcmask 785408   ;;  %vm2206_vm4 = vcmask 1043456   ;;  %vm2169_vm5 = vcmask 31744   ;;  %s6917_s15 = sld [smem:[#allocation56_spill]]  ;;  %s6918_s9 = sld [smem:[#allocation54_spill]]  ;;  %vm3592_vm6 = vcmask 130048  }
 0x20c   : > { %1017 = vbcast.lane.b32.xlu0 %v4111_v1, 280  ;;  %1025 = vbcast.lane.b32.xlu1 %v4111_v1, 296  ;;  %s6920_s2 = sld [smem:[#allocation58_spill]]  ;;  %s6921_s5 = sld [smem:[#allocation59_spill]]  ;;  %vm3855_vm7 = vcmask 122880  }
 0x20d   : > { %s6922_s27 = sld [smem:[#allocation61_spill]]  ;;  %s6923_s14 = sld [smem:[#allocation60_spill]] }
 0x20e   : > { %p6925_p8 = scmp.ne.s32.totalorder %s6894_s10, 0 }
 0x20f   : > { %v1817_v22 = vld [vmem:[%s6915_s1] sm:$0xff]  ;;  %s5662_s1 = smov 112  }
 0x210   : > { %1029 = vbcast.lane.b32.xlu0 %v4111_v1, 304  ;;  %1033 = vbcast.lane.b32.xlu1 %v4111_v1, 312 }
 0x211   : > { %4530 = vmatprep.subr.mxu1 %v1817_v22 }
 0x214   : > { %1037 = vbcast.lane.b32.xlu0 %v4111_v1, 320  ;;  %1041 = vbcast.lane.b32.xlu1 %v4111_v1, 328 }
 0x218   : > { %1045 = vbcast.lane.b32.xlu0 %v4111_v1, 336  ;;  %1049 = vbcast.lane.b32.xlu1 %v4111_v1, 344 }
 0x21c   : > { %1053 = vbcast.lane.b32.xlu0 %v4111_v1, 352  ;;  %1057 = vbcast.lane.b32.xlu1 %v4111_v1, 360 }
 0x220   : > { %1005 = vbcast.lane.b32.xlu0 %v4111_v1, 256  ;;  %1009 = vbcast.lane.b32.xlu1 %v4111_v1, 264 }
 0x224   : > { %1061 = vbcast.lane.b32.xlu0 %v4111_v1, 368  ;;  %1065 = vbcast.lane.b32.xlu1 %v4111_v1, 376 }
 0x27a   : > { %v1014_v5 = vpop.permute.xlu0 %1013  ;;  %v1022_v6 = vpop.permute.xlu1 %1021 }
 0x27b   : > { %4452 = vmatprep.mubr.msk.f32.mxu0 %vm1070_vm1, %v1014_v5  ;;  %4512 = vmatprep.mubr.msk.f32.mxu1 %vm1070_vm1, %v1022_v6 }
 0x27e   : > { %v1018_v7 = vpop.permute.xlu0 %1017  ;;  %v1026_v8 = vpop.permute.xlu1 %1025 }
 0x27f   : > { %4453 = vmatmul.mubr.msk.f32.vlgmr.msra.gmra.mrb[0].mxu0 %vm1070_vm1, %v1018_v7  ;;  %4513 = vmatmul.mubr.msk.f32.vlgmr.msra.gmra.mrb[0].mxu1 %vm1070_vm1, %v1026_v8 }
 0x280   : > { %4455 = vmatprep.mubr.msk.f32.mxu0 %vm1070_vm1, %v1022_v6  ;;  %4471 = vmatpush3.msk.msra.mxu0 %vm1107_vm0, %v1067_v3 }
 0x281   : > { %4490 = vmatprep.subr.msk.mxu0 %vm1107_vm0, %v1371_v9  ;;  %4531 = vmatpush3.msra.mxu1 %v1817_v22 }
 0x282   : > { %v1030_v10 = vpop.permute.xlu0 %1029  ;;  %v1034_v11 = vpop.permute.xlu1 %1033 }
 0x283   : > { %4456 = vmatmul.mubr.msk.f32.gmra.mrb[2].mxu0 %vm1070_vm1, %v1026_v8  ;;  %4515 = vmatprep.mubr.msk.f32.mxu1 %vm1070_vm1, %v1030_v10 }
 0x284   : > { %4458 = vmatprep.mubr.msk.f32.mxu0 %vm1070_vm1, %v1030_v10  ;;  %4516 = vmatmul.mubr.msk.f32.gmra.mrb[2].mxu1 %vm1070_vm1, %v1034_v11 }
 0x286   : > { %v1038_v12 = vpop.permute.xlu0 %1037  ;;  %v1042_v13 = vpop.permute.xlu1 %1041 }
 0x287   : > { %4459 = vmatmul.mubr.msk.f32.gmra.mrb[4].mxu0 %vm1070_vm1, %v1034_v11  ;;  %4518 = vmatprep.mubr.msk.f32.mxu1 %vm1070_vm1, %v1038_v12 }
 0x288   : > { %4461 = vmatprep.mubr.msk.f32.mxu0 %vm1070_vm1, %v1038_v12  ;;  %4519 = vmatmul.mubr.msk.f32.gmra.mrb[4].mxu1 %vm1070_vm1, %v1042_v13 }
 0x28a   : > { %v1046_v14 = vpop.permute.xlu0 %1045  ;;  %v1050_v15 = vpop.permute.xlu1 %1049 }
 0x28b   : > { %4462 = vmatmul.mubr.msk.f32.gmra.mrb[6].mxu0 %vm1070_vm1, %v1042_v13  ;;  %4521 = vmatprep.mubr.msk.f32.mxu1 %vm1070_vm1, %v1046_v14 }
 0x28c   : > { %4464 = vmatprep.mubr.msk.f32.mxu0 %vm1070_vm1, %v1046_v14  ;;  %4522 = vmatmul.mubr.msk.f32.gmra.mrb[6].mxu1 %vm1070_vm1, %v1050_v15 }
 0x28e   : > { %v1054_v16 = vpop.permute.xlu0 %1053  ;;  %v1058_v17 = vpop.permute.xlu1 %1057 }
 0x28f   : > { %4465 = vmatmul.mubr.msk.f32.gmra.mrb[8].mxu0 %vm1070_vm1, %v1050_v15  ;;  %4524 = vmatprep.mubr.msk.f32.mxu1 %vm1070_vm1, %v1054_v16 }
 0x290   : > { %4467 = vmatprep.mubr.msk.f32.mxu0 %vm1070_vm1, %v1054_v16  ;;  %4525 = vmatmul.mubr.msk.f32.gmra.mrb[8].mxu1 %vm1070_vm1, %v1058_v17 }
 0x292   : > { %v1006_v18 = vpop.permute.xlu0 %1005  ;;  %v1010_v19 = vpop.permute.xlu1 %1009 }
 0x293   : > { %4468 = vmatmul.mubr.msk.f32.gmra.mrb[10].mxu0 %vm1070_vm1, %v1058_v17 }
 0x294   : > { %4472 = vmatprep.mubr.msk.f32.mxu0 %vm1070_vm1, %v1006_v18 }
 0x296   : > { %v1062_v20 = vpop.permute.xlu0 %1061  ;;  %v1066_v21 = vpop.permute.xlu1 %1065 }
 0x297   : > { %4473 = vmatmul.mubr.msk.f32.vlgmr.msra.gmra.mrb[0].mxu0 %vm1070_vm1, %v1010_v19  ;;  %4527 = vmatprep.mubr.msk.f32.mxu1 %vm1070_vm1, %v1062_v20 }
 0x298   : > { %4475 = vmatprep.mubr.msk.f32.mxu0 %vm1070_vm1, %v1014_v5  ;;  %4491 = vmatpush3.msk.msra.mxu0 %vm1107_vm0, %v1371_v9 }
 0x299   : > { %4528 = vmatmul.mubr.msk.f32.gmra.mrb[10].mxu1 %vm1070_vm1, %v1066_v21 }
 0x29b   : > { %4476 = vmatmul.mubr.msk.f32.gmra.mrb[2].mxu0 %vm1070_vm1, %v1018_v7 }
 0x29c   : > { %4478 = vmatprep.mubr.msk.f32.mxu0 %vm1070_vm1, %v1022_v6 }
 0x29f   : > { %4479 = vmatmul.mubr.msk.f32.gmra.mrb[4].mxu0 %vm1070_vm1, %v1026_v8 }
 0x2a0   : > { %4481 = vmatprep.mubr.msk.f32.mxu0 %vm1070_vm1, %v1030_v10 }
 0x2a3   : > { %4482 = vmatmul.mubr.msk.f32.gmra.mrb[6].mxu0 %vm1070_vm1, %v1034_v11 }
 0x2a4   : > { %4484 = vmatprep.mubr.msk.f32.mxu0 %vm1070_vm1, %v1038_v12 }
 0x2a7   : > { %4485 = vmatmul.mubr.msk.f32.gmra.mrb[8].mxu0 %vm1070_vm1, %v1042_v13 }
 0x2a8   : > { %4487 = vmatprep.mubr.msk.f32.mxu0 %vm1070_vm1, %v1046_v14 }
 0x2ab   : > { %4488 = vmatmul.mubr.msk.f32.gmra.mrb[10].mxu0 %vm1070_vm1, %v1050_v15 }
 0x2ac   : > { %4492 = vmatprep.mubr.msk.f32.mxu0 %vm1070_vm1, %v1022_v6 }
 0x2af   : > { %4493 = vmatmul.mubr.msk.f32.vlgmr.msra.gmra.mrb[0].mxu0 %vm1070_vm1, %v1026_v8 }
 0x2b0   : > { %4495 = vmatprep.mubr.msk.f32.mxu0 %vm1070_vm1, %v1030_v10 }
 0x2b3   : > { %4496 = vmatmul.mubr.msk.f32.gmra.mrb[2].mxu0 %vm1070_vm1, %v1034_v11 }
 0x2b4   : > { %4498 = vmatprep.mubr.msk.f32.mxu0 %vm1070_vm1, %v1038_v12 }
 0x2b7   : > { %4499 = vmatmul.mubr.msk.f32.gmra.mrb[4].mxu0 %vm1070_vm1, %v1042_v13 }
 0x2b8   : > { %4501 = vmatprep.mubr.msk.f32.mxu0 %vm1070_vm1, %v1046_v14 }
 0x2bb   : > { %4502 = vmatmul.mubr.msk.f32.gmra.mrb[6].mxu0 %vm1070_vm1, %v1050_v15 }
 0x2bc   : > { %4504 = vmatprep.mubr.msk.f32.mxu0 %vm1070_vm1, %v1054_v16 }
 0x2bf   : > { %4505 = vmatmul.mubr.msk.f32.gmra.mrb[8].mxu0 %vm1070_vm1, %v1058_v17 }
 0x2c0   : > { %4507 = vmatprep.mubr.msk.f32.mxu0 %vm1070_vm1, %v1062_v20 }
 0x2c3   : > { %4508 = vmatmul.mubr.msk.f32.gmra.mrb[10].mxu0 %vm1070_vm1, %v1066_v21 }
 0x352   : > { %v4514_v23 = vpop.f32.mrb[0].mxu1 }
 0x353   : > { %v1614_v24 = vpop.f32.mrb[1].mxu1  ;;  %v1620_v38 = vadd.f32 %v4514_v23, %v6316_v35 }
 0x354   : > { %v1615_v41 = vadd.f32 %v6316_v35, %v1614_v24 }
 0x357   : > { %v4517_v25 = vpop.f32.mrb[2].mxu1 }
 0x358   : > { %v1624_v26 = vpop.f32.mrb[3].mxu1  ;;  %v1630_v48 = vadd.f32 %v4517_v25, %v6316_v35 }
 0x359   : > { %v1625_v51 = vadd.f32 %v6316_v35, %v1624_v26 }
 0x35b   : > { %v4520_v27 = vpop.f32.mrb[4].mxu1 }
 0x35c   : > { %v1634_v28 = vpop.f32.mrb[5].mxu1  ;;  %v1640_v58 = vadd.f32 %v4520_v27, %v6316_v35 }
 0x35d   : > { %v1635_v61 = vadd.f32 %v6316_v35, %v1634_v28 }
 0x35f   : > { %v4523_v29 = vpop.f32.mrb[6].mxu1 }
 0x360   : > { %v1644_v30 = vpop.f32.mrb[7].mxu1  ;;  %v1650_v4 = vadd.f32 %v4523_v29, %v6316_v35 }
 0x361   : > { %v1645_v7 = vadd.f32 %v6316_v35, %v1644_v30 }
 0x363   : > { %v4526_v31 = vpop.f32.mrb[8].mxu1 }
 0x364   : > { %v1654_v32 = vpop.f32.mrb[9].mxu1  ;;  %v1660_v17 = vadd.f32 %v4526_v31, %v6316_v35 }
 0x365   : > { %v1655_v21 = vadd.f32 %v6316_v35, %v1654_v32 }
 0x36c   : > { %v6312_v33 = vpop.f32.mrb[10].mxu1 }
 0x36d   : > { %v6314_v34 = vpop.f32.mrb[11].mxu1  ;;  %v1670_v25 = vadd.f32 %v6312_v33, %v6316_v35 }
 0x36e   : > { %v1665_v31 = vadd.f32 %v6316_v35, %v6314_v34 }
 0x382   : > { %v4494_v37 = vpop.f32.mrb[0].mxu0 }
 0x383   : > { %v1526_v39 = vadd.f32 %v4494_v37, %v6318_v36  ;;  %v1447_v40 = vpop.f32.mrb[1].mxu0 }
 0x384   : > { %v1525_v42 = vadd.f32 %v6318_v36, %v1447_v40 }
 0x385   : > { %v4167_v43 = vmul.f32 -1.442695, %v1526_v39  ;;  %v6324_v44 = vadd.f32 %v1620_v38, %v1526_v39 }
 0x386   : > { %v4166_v45 = vmul.f32 -1.442695, %v1525_v42  ;;  %v4497_v46 = vpop.f32.mrb[2].mxu0  ;;  %v6326_v47 = vadd.f32 %v1615_v41, %v1525_v42 }
 0x387   : > { %4991 = vpow2.f32 %v4167_v43  ;;  %v1528_v49 = vadd.f32 %v4497_v46, %v6318_v36  ;;  %v1457_v50 = vpop.f32.mrb[3].mxu0 }
 0x388   : > { %4993 = vpow2.f32 %v4166_v45  ;;  %v1527_v52 = vadd.f32 %v6318_v36, %v1457_v50 }
 0x389   : > { %v4169_v53 = vmul.f32 -1.442695, %v1528_v49  ;;  %v6332_v54 = vadd.f32 %v1630_v48, %v1528_v49 }
 0x38a   : > { %v4168_v55 = vmul.f32 -1.442695, %v1527_v52  ;;  %v4500_v56 = vpop.f32.mrb[4].mxu0  ;;  %v6334_v57 = vadd.f32 %v1625_v51, %v1527_v52 }
 0x38b   : > { %4995 = vpow2.f32 %v4169_v53  ;;  %v1530_v59 = vadd.f32 %v4500_v56, %v6318_v36  ;;  %v1467_v60 = vpop.f32.mrb[5].mxu0 }
 0x38c   : > { %4997 = vpow2.f32 %v4168_v55  ;;  %v1529_v62 = vadd.f32 %v6318_v36, %v1467_v60 }
 0x38d   : > { %v4171_v63 = vmul.f32 -1.442695, %v1530_v59  ;;  %v6340_v0 = vadd.f32 %v1640_v58, %v1530_v59 }
 0x38e   : > { %v4170_v1 = vmul.f32 -1.442695, %v1529_v62  ;;  %v4503_v2 = vpop.f32.mrb[6].mxu0  ;;  %v6342_v3 = vadd.f32 %v1635_v61, %v1529_v62 }
 0x38f   : > { %4999 = vpow2.f32 %v4171_v63  ;;  %v1532_v5 = vadd.f32 %v4503_v2, %v6318_v36  ;;  %v1477_v6 = vpop.f32.mrb[7].mxu0 }
 0x390   : > { %5001 = vpow2.f32 %v4170_v1  ;;  %v1531_v8 = vadd.f32 %v6318_v36, %v1477_v6 }
 0x391   : > { %v4992_v9 = vpop.eup %4991  ;;  %v4173_v10 = vmul.f32 -1.442695, %v1532_v5  ;;  %v6348_v11 = vadd.f32 %v1650_v4, %v1532_v5 }
 0x392   : > { %v4994_v12 = vpop.eup %4993  ;;  %v1722_v13 = vadd.f32 1.0, %v4992_v9  ;;  %v4172_v14 = vmul.f32 -1.442695, %v1531_v8  ;;  %v4506_v15 = vpop.f32.mrb[8].mxu0  ;;  %v6350_v16 = vadd.f32 %v1645_v7, %v1531_v8 }
 0x393   : > { %v1721_v18 = vadd.f32 1.0, %v4994_v12  ;;  %5003 = vpow2.f32 %v4173_v10  ;;  %v1534_v19 = vadd.f32 %v4506_v15, %v6318_v36  ;;  %v1487_v20 = vpop.f32.mrb[9].mxu0 }
 0x394   : > { %5005 = vrcp.f32 %v1722_v13  ;;  %v1533_v22 = vadd.f32 %v6318_v36, %v1487_v20 }
 0x395   : > { %v4996_v23 = vpop.eup %4995  ;;  %5007 = vrcp.f32 %v1721_v18  ;;  %v4175_v24 = vmul.f32 -1.442695, %v1534_v19  ;;  %v6358_v26 = vadd.f32 %v1660_v17, %v1534_v19 }
 0x396   : > { %v4998_v27 = vpop.eup %4997  ;;  %v1724_v28 = vadd.f32 1.0, %v4996_v23  ;;  %5009 = vpow2.f32 %v4172_v14  ;;  %v4174_v29 = vmul.f32 -1.442695, %v1533_v22  ;;  %v4509_v30 = vpop.f32.mrb[10].mxu0  ;;  %v6363_v39 = vadd.f32 %v1655_v21, %v1533_v22 }
 0x397   : > { %v1723_v32 = vadd.f32 1.0, %v4998_v27  ;;  %5011 = vpow2.f32 %v4175_v24  ;;  %v1536_v37 = vadd.f32 %v4509_v30, %v6318_v36  ;;  %v1497_v38 = vpop.f32.mrb[11].mxu0 }
 0x398   : > { %5013 = vrcp.f32 %v1724_v28  ;;  %v1535_v33 = vadd.f32 %v6318_v36, %v1497_v38 }
 0x399   : > { %v5000_v40 = vpop.eup %4999  ;;  %5015 = vrcp.f32 %v1723_v32  ;;  %v4177_v41 = vmul.f32 -1.442695, %v1536_v37  ;;  %v6366_v42 = vadd.f32 %v1670_v25, %v1536_v37 }
 0x39a   : > { %v5002_v43 = vpop.eup %5001  ;;  %v1726_v45 = vadd.f32 1.0, %v5000_v40  ;;  %5017 = vpow2.f32 %v4174_v29  ;;  %v4176_v46 = vmul.f32 -1.442695, %v1535_v33  ;;  %v6368_v34 = vadd.f32 %v1665_v31, %v1535_v33  ;;  %v4178_v31 = vld [vmem:[#allocation12] ss:$0 sm:$0xff] }
 0x39b   : > { %v1725_v35 = vadd.f32 1.0, %v5002_v43  ;;  %5019 = vpow2.f32 %v4177_v41 }
 0x39c   : > { %5021 = vrcp.f32 %v1726_v45 }
 0x39d   : > { %v5004_v48 = vpop.eup %5003  ;;  %5023 = vrcp.f32 %v1725_v35 }
 0x39e   : > { %v5006_v49 = vpop.eup %5005  ;;  %v1728_v50 = vadd.f32 1.0, %v5004_v48  ;;  %5025 = vpow2.f32 %v4176_v46 }
 0x39f   : > { %v5008_v36 = vpop.eup %5007  ;;  %1771 = vrot.lane.b32.xlu1 %v5006_v49, %s5661_s30 }
 0x3a0   : > { %v5010_v51 = vpop.eup %5009  ;;  %5027 = vrcp.f32 %v1728_v50  ;;  %1769 = vrot.lane.b32.xlu0 %v5008_v36, %s5661_s30 }
 0x3a1   : > { %v5012_v52 = vpop.eup %5011  ;;  %v1727_v53 = vadd.f32 1.0, %v5010_v51 }
 0x3a2   : > { %v5014_v55 = vpop.eup %5013  ;;  %v1730_v56 = vadd.f32 1.0, %v5012_v52 }
 0x3a3   : > { %v5016_v58 = vpop.eup %5015  ;;  %5029 = vrcp.f32 %v1727_v53  ;;  %1775 = vrot.lane.b32.xlu1 %v5014_v55, %s5661_s30 }
 0x3a4   : > { %v5018_v59 = vpop.eup %5017  ;;  %5031 = vrcp.f32 %v1730_v56  ;;  %1773 = vrot.lane.b32.xlu0 %v5016_v58, %s5661_s30 }
 0x3a5   : > { %v5020_v60 = vpop.eup %5019  ;;  %v1729_v61 = vadd.f32 1.0, %v5018_v59 }
 0x3a6   : > { %v5022_v62 = vpop.eup %5021  ;;  %v1732_v63 = vadd.f32 1.0, %v5020_v60 }
 0x3a7   : > { %v5024_v1 = vpop.eup %5023  ;;  %5033 = vrcp.f32 %v1729_v61  ;;  %1779 = vrot.lane.b32.xlu1 %v5022_v62, %s5661_s30 }
 0x3a8   : > { %v5026_v2 = vpop.eup %5025  ;;  %5035 = vrcp.f32 %v1732_v63  ;;  %1777 = vrot.lane.b32.xlu0 %v5024_v1, %s5661_s30 }
 0x3a9   : > { %v1731_v4 = vadd.f32 1.0, %v5026_v2 }
 0x3aa   : > { %v5028_v5 = vpop.eup %5027 }
 0x3ab   : > { %5037 = vrcp.f32 %v1731_v4  ;;  %1783 = vrot.lane.b32.xlu1 %v5028_v5, %s5661_s30  ;;  %v1988_v4 = vld [vmem:[%s6916_s21 + $0x8] sm:$0xff]  ;;  %v1989_v5 = vld [vmem:[%s6916_s21 + $0x10] sm:$0xff] }
 0x3ad   : > { %v5030_v6 = vpop.eup %5029 }
 0x3ae   : > { %v5032_v7 = vpop.eup %5031  ;;  %1781 = vrot.lane.b32.xlu0 %v5030_v6, %s5661_s30  ;;  %v1990_v6 = vld [vmem:[%s6916_s21 + $0x18] sm:$0xff] }
 0x3af   : > { %1787 = vrot.lane.b32.xlu1 %v5032_v7, %s5661_s30  ;;  %v1991_v7 = vld [vmem:[%s6916_s21 + $0x20] sm:$0xff] }
 0x3b1   : > { %v5034_v8 = vpop.eup %5033 }
 0x3b2   : > { %v5036_v9 = vpop.eup %5035  ;;  %1785 = vrot.lane.b32.xlu0 %v5034_v8, %s5661_s30  ;;  %v1992_v8 = vld [vmem:[%s6916_s21 + $0x28] sm:$0xff] }
 0x3b3   : > { %1791 = vrot.lane.b32.xlu1 %v5036_v9, %s5661_s30  ;;  %v1993_v9 = vld [vmem:[%s6916_s21 + $0x30] sm:$0xff] }
 0x3b5   : > { %v5038_v10 = vpop.eup %5037 }
 0x3b6   : > { %1789 = vrot.lane.b32.xlu0 %v5038_v10, %s5661_s30  ;;  %v1994_v10 = vld [vmem:[%s6916_s21 + $0x38] sm:$0xff] }
 0x411   : > { %v1772_v12 = vpop.permute.xlu1 %1771 }
 0x412   : > { %v1770_v13 = vpop.permute.xlu0 %1769  ;;  %v1806_v15 = vmul.f32 %v1772_v12, %v6324_v44  ;;  %v1995_v12 = vld [vmem:[%s6916_s21 + $0x40] sm:$0xff] }
 0x413   : > { %v1805_v14 = vmul.f32 %v1770_v13, %v6326_v47  ;;  %v1996_v13 = vld [vmem:[%s6916_s21 + $0x48] sm:$0xff] }
 0x415   : > { %v1776_v17 = vpop.permute.xlu1 %1775  ;;  %4532 = vmatprep.mubr.msk.f32.mxu1 %vm1825_vm2, %v1805_v14  ;;  %v1997_v14 = vld [vmem:[%s6916_s21 + $0x50] sm:$0xff] }
 0x416   : > { %4533 = vmatmul.mubr.msk.f32.vlgmr.msra.gmra.mrb[12].mxu1 %vm1825_vm2, %v1806_v15  ;;  %v1774_v18 = vpop.permute.xlu0 %1773  ;;  %v1808_v20 = vmul.f32 %v1776_v17, %v6332_v54  ;;  %v1998_v15 = vld [vmem:[%s6916_s21 + $0x58] sm:$0xff] }
 0x417   : > { %v1807_v19 = vmul.f32 %v1774_v18, %v6334_v57  ;;  %v2361_v17 = vld [vmem:[#allocation17 + $0x4] sm:$0xf] }
 0x419   : > { %v1780_v21 = vpop.permute.xlu1 %1779  ;;  %4535 = vmatprep.mubr.msk.f32.mxu1 %vm1825_vm2, %v1807_v19 }
 0x41a   : > { %4536 = vmatmul.mubr.msk.f32.gmra.mrb[14].mxu1 %vm1825_vm2, %v1808_v20  ;;  %v1778_v22 = vpop.permute.xlu0 %1777  ;;  %v1810_v44 = vmul.f32 %v1780_v21, %v6340_v0 }
 0x41b   : > { %v1809_v47 = vmul.f32 %v1778_v22, %v6342_v3 }
 0x41d   : > { %v1784_v23 = vpop.permute.xlu1 %1783  ;;  %4538 = vmatprep.mubr.msk.f32.mxu1 %vm1825_vm2, %v1809_v47 }
 0x41e   : > { %4539 = vmatmul.mubr.msk.f32.gmra.mrb[16].mxu1 %vm1825_vm2, %v1810_v44  ;;  %v1812_v54 = vmul.f32 %v1784_v23, %v6348_v11  ;;  %v1987_v11 = vld [vmem:[%s6916_s21] sm:$0xff] }
 0x420   : > { %v1782_v24 = vpop.permute.xlu0 %1781 }
 0x421   : > { %v1811_v57 = vmul.f32 %v1782_v24, %v6350_v16  ;;  %v1788_v25 = vpop.permute.xlu1 %1787 }
 0x422   : > { %v1814_v0 = vmul.f32 %v1788_v25, %v6358_v26  ;;  %v2161_v26 = vld [vmem:[#allocation14] sm:$0xf] }
 0x423   : > { %4541 = vmatprep.mubr.msk.f32.mxu1 %vm1825_vm2, %v1811_v57  ;;  %4592 = vmatprep.subr.msk.mxu0 %vm2206_vm4, %v2161_v26 }
 0x424   : > { %4542 = vmatmul.mubr.msk.f32.gmra.mrb[18].mxu1 %vm1825_vm2, %v1812_v54  ;;  %v1786_v27 = vpop.permute.xlu0 %1785  ;;  %4593 = vmatpush3.msk.msra.mxu0 %vm2206_vm4, %v2161_v26 }
 0x425   : > { %v1813_v3 = vmul.f32 %v1786_v27, %v6363_v39  ;;  %v1792_v28 = vpop.permute.xlu1 %1791  ;;  %v2747_v27 = vld [vmem:[#allocation20] sm:$0xf] }
 0x426   : > { %v1816_v30 = vmul.f32 %v1792_v28, %v6366_v42  ;;  %4654 = vmatprep.subr.msk.mxu0 %vm2206_vm4, %v2747_v27 }
 0x427   : > { %4544 = vmatprep.mubr.msk.f32.mxu1 %vm1825_vm2, %v1813_v3  ;;  %v2359_v3 = vld [vmem:[#allocation17] sm:$0xf] }
 0x428   : > { %4545 = vmatmul.mubr.msk.f32.gmra.mrb[20].mxu1 %vm1825_vm2, %v1814_v0  ;;  %v1790_v29 = vpop.permute.xlu0 %1789 }
 0x429   : > { %v1815_v16 = vmul.f32 %v1790_v29, %v6368_v34  ;;  %v4203_v29 = vld [vmem:[#allocation15] ss:$0 sm:$0xff] }
 0x42b   : > { %4547 = vmatprep.mubr.msk.f32.mxu1 %vm1825_vm2, %v1815_v16 }
 0x42c   : > { %4548 = vmatmul.mubr.msk.f32.gmra.mrb[22].mxu1 %vm1825_vm2, %v1816_v30 }
 0x42d   : > { %4574 = vmatprep.mubr.msk.f32.mxu1 %vm1999_vm3, %v1987_v11 }
 0x4e9   : > { %v4534_v32 = vpop.f32.mrb[12].mxu1 }
 0x4ea   : > { %v6412_v37 = vadd.f32 %v4534_v32, %v4178_v31  ;;  %v1928_v38 = vpop.f32.mrb[13].mxu1 }
 0x4eb   : > { %v6414_v39 = vadd.f32 %v4178_v31, %v1928_v38 }
 0x4ed   : > { %v4707_v33 = vpack.c.bf16 %v6412_v37, %v6414_v39  ;;  %v4537_v40 = vpop.f32.mrb[14].mxu1 }
 0x4ee   : > { %v6418_v41 = vadd.f32 %v4537_v40, %v4178_v31  ;;  %v1938_v42 = vpop.f32.mrb[15].mxu1 }
 0x4ef   : > { %v6420_v43 = vadd.f32 %v4178_v31, %v1938_v42  ;;  %4708 = vmatprep.subr.bf16.mxu1 %v4707_v33 }
 0x4f0   : > { %4710 = vmatpush3.bf16.msra.mxu1 %v4707_v33 }
 0x4f1   : > { %v4711_v45 = vpack.c.bf16 %v6418_v41, %v6420_v43  ;;  %v4540_v46 = vpop.f32.mrb[16].mxu1 }
 0x4f2   : > { %v6424_v34 = vadd.f32 %v4540_v46, %v4178_v31  ;;  %v1948_v35 = vpop.f32.mrb[17].mxu1 }
 0x4f3   : > { %v6426_v48 = vadd.f32 %v4178_v31, %v1948_v35  ;;  %4712 = vmatprep.subr.bf16.mxu1 %v4711_v45 }
 0x4f4   : > { %4714 = vmatpush3.bf16.msra.mxu1 %v4711_v45 }
 0x4f5   : > { %v4715_v49 = vpack.c.bf16 %v6424_v34, %v6426_v48 }
 0x4f7   : > { %v4543_v50 = vpop.f32.mrb[18].mxu1  ;;  %4716 = vmatprep.subr.bf16.mxu1 %v4715_v49 }
 0x4f8   : > { %v6430_v36 = vadd.f32 %v4543_v50, %v4178_v31  ;;  %v1958_v51 = vpop.f32.mrb[19].mxu1  ;;  %4718 = vmatpush3.bf16.msra.mxu1 %v4715_v49 }
 0x4f9   : > { %v6432_v52 = vadd.f32 %v4178_v31, %v1958_v51 }
 0x4fb   : > { %v4719_v53 = vpack.c.bf16 %v6430_v36, %v6432_v52  ;;  %v4546_v55 = vpop.f32.mrb[20].mxu1 }
 0x4fc   : > { %v6436_v56 = vadd.f32 %v4546_v55, %v4178_v31  ;;  %v1968_v58 = vpop.f32.mrb[21].mxu1 }
 0x4fd   : > { %v6438_v59 = vadd.f32 %v4178_v31, %v1968_v58  ;;  %4720 = vmatprep.subr.bf16.mxu1 %v4719_v53 }
 0x4fe   : > { %4722 = vmatpush3.bf16.msra.mxu1 %v4719_v53 }
 0x4ff   : > { %v4723_v60 = vpack.c.bf16 %v6436_v56, %v6438_v59  ;;  %v4549_v61 = vpop.f32.mrb[22].mxu1 }
 0x500   : > { %v6442_v62 = vadd.f32 %v4549_v61, %v4178_v31  ;;  %v1978_v63 = vpop.f32.mrb[23].mxu1 }
 0x501   : > { %v6444_v1 = vadd.f32 %v4178_v31, %v1978_v63  ;;  %4724 = vmatprep.subr.bf16.mxu1 %v4723_v60 }
 0x502   : > { %4726 = vmatpush3.bf16.msra.mxu1 %v4723_v60 }
 0x503   : > { %v4727_v2 = vpack.c.bf16 %v6442_v62, %v6444_v1 }
 0x505   : > { %4728 = vmatprep.subr.bf16.mxu1 %v4727_v2 }
 0x506   : > { %4730 = vmatpush3.bf16.msra.mxu1 %v4727_v2 }
 0x507   : > { %4612 = vmatprep.subr.msk.mxu1 %vm2206_vm4, %v2361_v17 }
 0x509   : > { %4575 = vmatmul.mubr.msk.f32.vlgmr.msra.gmra.mrb[24].mxu1 %vm1999_vm3, %v1988_v4 }
 0x50a   : > { %4577 = vmatprep.mubr.msk.f32.mxu1 %vm1999_vm3, %v1989_v5  ;;  %4613 = vmatpush3.msk.msra.mxu1 %vm2206_vm4, %v2361_v17 }
 0x50b   : > { %4626 = vmatprep.subr.msk.mxu1 %vm2206_vm4, %v2359_v3 }
 0x50d   : > { %4578 = vmatmul.mubr.msk.f32.gmra.mrb[26].mxu1 %vm1999_vm3, %v1990_v6 }
 0x50e   : > { %4580 = vmatprep.mubr.msk.f32.mxu1 %vm1999_vm3, %v1991_v7 }
 0x511   : > { %4581 = vmatmul.mubr.msk.f32.gmra.mrb[28].mxu1 %vm1999_vm3, %v1992_v8 }
 0x512   : > { %4583 = vmatprep.mubr.msk.f32.mxu1 %vm1999_vm3, %v1993_v9 }
 0x515   : > { %4584 = vmatmul.mubr.msk.f32.gmra.mrb[30].mxu1 %vm1999_vm3, %v1994_v10 }
 0x516   : > { %4586 = vmatprep.mubr.msk.f32.mxu1 %vm1999_vm3, %v1995_v12 }
 0x519   : > { %4587 = vmatmul.mubr.msk.f32.gmra.mrb[32].mxu1 %vm1999_vm3, %v1996_v13 }
 0x51a   : > { %4589 = vmatprep.mubr.msk.f32.mxu1 %vm1999_vm3, %v1997_v14 }
 0x51d   : > { %4590 = vmatmul.mubr.msk.f32.gmra.mrb[34].mxu1 %vm1999_vm3, %v1998_v15 }
 0x5dc   : > { %v4576_v18 = vpop.f32.mrb[24].mxu1 }
 0x5dd   : > { %v2102_v19 = vpop.f32.mrb[25].mxu1 }
 0x5de   : > { %4594 = vmatprep.mubr.msk.f32.mxu0 %vm2169_vm5, %v2102_v19 }
 0x5df   : > { %4595 = vmatmul.mubr.msk.f32.vlgmr.msra.gmra.mrb[12].mxu0 %vm2169_vm5, %v4576_v18 }
 0x5e0   : > { %v4579_v20 = vpop.f32.mrb[26].mxu1  ;;  %4655 = vmatpush3.msk.msra.mxu0 %vm2206_vm4, %v2747_v27 }
 0x5e1   : > { %v2112_v21 = vpop.f32.mrb[27].mxu1 }
 0x5e2   : > { %4597 = vmatprep.mubr.msk.f32.mxu0 %vm2169_vm5, %v2112_v21 }
 0x5e3   : > { %4598 = vmatmul.mubr.msk.f32.gmra.mrb[14].mxu0 %vm2169_vm5, %v4579_v20 }
 0x5e4   : > { %v4582_v22 = vpop.f32.mrb[28].mxu1 }
 0x5e5   : > { %v2122_v47 = vpop.f32.mrb[29].mxu1 }
 0x5e6   : > { %4600 = vmatprep.mubr.msk.f32.mxu0 %vm2169_vm5, %v2122_v47 }
 0x5e7   : > { %4601 = vmatmul.mubr.msk.f32.gmra.mrb[16].mxu0 %vm2169_vm5, %v4582_v22 }
 0x5e8   : > { %v4585_v44 = vpop.f32.mrb[30].mxu1 }
 0x5e9   : > { %v2132_v23 = vpop.f32.mrb[31].mxu1 }
 0x5ea   : > { %4603 = vmatprep.mubr.msk.f32.mxu0 %vm2169_vm5, %v2132_v23 }
 0x5eb   : > { %4604 = vmatmul.mubr.msk.f32.gmra.mrb[18].mxu0 %vm2169_vm5, %v4585_v44 }
 0x5ec   : > { %v4588_v24 = vpop.f32.mrb[32].mxu1 }
 0x5ed   : > { %v2142_v57 = vpop.f32.mrb[33].mxu1 }
 0x5ee   : > { %4606 = vmatprep.mubr.msk.f32.mxu0 %vm2169_vm5, %v2142_v57  ;;  %v4244_v57 = vld [vmem:[#allocation18] ss:$0 sm:$0xff] }
 0x5ef   : > { %4607 = vmatmul.mubr.msk.f32.gmra.mrb[20].mxu0 %vm2169_vm5, %v4588_v24  ;;  %v4245_v24 = vld [vmem:[#allocation21] ss:$0 sm:$0xff] }
 0x5f0   : > { %v4591_v25 = vpop.f32.mrb[34].mxu1 }
 0x5f1   : > { %v2152_v54 = vpop.f32.mrb[35].mxu1 }
 0x5f2   : > { %4609 = vmatprep.mubr.msk.f32.mxu0 %vm2169_vm5, %v2152_v54 }
 0x5f3   : > { %4610 = vmatmul.mubr.msk.f32.gmra.mrb[22].mxu0 %vm2169_vm5, %v4591_v25 }
 0x6b2   : > { %v4596_v0 = vpop.f32.mrb[12].mxu0 }
 0x6b3   : > { %v2276_v28 = vpop.f32.mrb[13].mxu0  ;;  %v2282_v6 = vadd.f32 %v4596_v0, %v4203_v29 }
 0x6b5   : > { %v2336_v15 = vadd.f32 %v2282_v6, %v6412_v37 }
 0x6b6   : > { %v4599_v16 = vpop.f32.mrb[14].mxu0 }
 0x6b7   : > { %v2292_v30 = vadd.f32 %v4599_v16, %v4203_v29  ;;  %v2286_v11 = vpop.f32.mrb[15].mxu0  ;;  %v2348_v19 = vmax.f32 %v2336_v15, 0.0 }
 0x6b8   : > { %v2287_v26 = vadd.f32 %v4203_v29, %v2286_v11 }
 0x6b9   : > { %v6510_v31 = vadd.f32 %v2292_v30, %v6418_v41  ;;  %v2609_v41 = vld [vmem:[#allocation17 + $0x8] sm:$0xf] }
 0x6ba   : > { %v6513_v32 = vadd.f32 %v2287_v26, %v6420_v43  ;;  %v4602_v38 = vpop.f32.mrb[16].mxu0 }
 0x6bb   : > { %v2302_v33 = vadd.f32 %v4602_v38, %v4203_v29  ;;  %v2296_v40 = vpop.f32.mrb[17].mxu0  ;;  %v2350_v46 = vmax.f32 %v6510_v31, 0.0 }
 0x6bc   : > { %v2349_v42 = vmax.f32 %v6513_v32, 0.0  ;;  %v2297_v45 = vadd.f32 %v4203_v29, %v2296_v40 }
 0x6bd   : > { %v2340_v35 = vadd.f32 %v2302_v33, %v6424_v34  ;;  %v2277_v34 = vadd.f32 %v4203_v29, %v2276_v28 }
 0x6be   : > { %v2339_v49 = vadd.f32 %v2297_v45, %v6426_v48  ;;  %v4605_v50 = vpop.f32.mrb[18].mxu0  ;;  %4614 = vmatprep.mubr.msk.f32.mxu1 %vm2169_vm5, %v2349_v42 }
 0x6bf   : > { %v2312_v51 = vadd.f32 %v4605_v50, %v4203_v29  ;;  %v2306_v53 = vpop.f32.mrb[19].mxu0  ;;  %4615 = vmatmul.mubr.msk.f32.vlgmr.msra.gmra.mrb[36].mxu1 %vm2169_vm5, %v2350_v46  ;;  %v2352_v58 = vmax.f32 %v2340_v35, 0.0  ;;  %v2335_v8 = vadd.f32 %v2277_v34, %v6414_v39 }
 0x6c0   : > { %v2351_v43 = vmax.f32 %v2339_v49, 0.0  ;;  %v2307_v55 = vadd.f32 %v4203_v29, %v2306_v53  ;;  %4627 = vmatpush3.msk.msra.mxu1 %vm2206_vm4, %v2359_v3 }
 0x6c1   : > { %v2342_v60 = vadd.f32 %v2312_v51, %v6430_v36  ;;  %4640 = vmatprep.subr.msk.mxu1 %vm2206_vm4, %v2609_v41  ;;  %v2347_v17 = vmax.f32 %v2335_v8, 0.0 }
 0x6c2   : > { %v2341_v48 = vadd.f32 %v2307_v55, %v6432_v52  ;;  %v4608_v61 = vpop.f32.mrb[20].mxu0  ;;  %4617 = vmatprep.mubr.msk.f32.mxu1 %vm2169_vm5, %v2351_v43  ;;  %4656 = vmatprep.mubr.msk.f32.mxu0 %vm2169_vm5, %v2351_v43 }
 0x6c3   : > { %v2322_v63 = vadd.f32 %v4608_v61, %v4203_v29  ;;  %v2316_v2 = vpop.f32.mrb[21].mxu0  ;;  %4618 = vmatmul.mubr.msk.f32.gmra.mrb[38].mxu1 %vm2169_vm5, %v2352_v58  ;;  %4657 = vmatmul.mubr.msk.f32.vlgmr.msra.gmra.mrb[24].mxu0 %vm2169_vm5, %v2352_v58  ;;  %v2354_v36 = vmax.f32 %v2342_v60, 0.0 }
 0x6c4   : > { %v2353_v4 = vmax.f32 %v2341_v48, 0.0  ;;  %v2317_v5 = vadd.f32 %v4203_v29, %v2316_v2 }
 0x6c5   : > { %v2344_v7 = vadd.f32 %v2322_v63, %v6436_v56 }
 0x6c6   : > { %v2343_v52 = vadd.f32 %v2317_v5, %v6438_v59  ;;  %v4611_v9 = vpop.f32.mrb[22].mxu0  ;;  %4620 = vmatprep.mubr.msk.f32.mxu1 %vm2169_vm5, %v2353_v4  ;;  %4659 = vmatprep.mubr.msk.f32.mxu0 %vm2169_vm5, %v2353_v4 }
 0x6c7   : > { %v2332_v10 = vadd.f32 %v4611_v9, %v4203_v29  ;;  %v2326_v12 = vpop.f32.mrb[23].mxu0  ;;  %4621 = vmatmul.mubr.msk.f32.gmra.mrb[40].mxu1 %vm2169_vm5, %v2354_v36  ;;  %4660 = vmatmul.mubr.msk.f32.gmra.mrb[26].mxu0 %vm2169_vm5, %v2354_v36  ;;  %v2356_v56 = vmax.f32 %v2344_v7, 0.0 }
 0x6c8   : > { %v2355_v13 = vmax.f32 %v2343_v52, 0.0  ;;  %v2327_v14 = vadd.f32 %v4203_v29, %v2326_v12 }
 0x6c9   : > { %v2346_v39 = vadd.f32 %v2332_v10, %v6442_v62 }
 0x6ca   : > { %v2345_v59 = vadd.f32 %v2327_v14, %v6444_v1  ;;  %4623 = vmatprep.mubr.msk.f32.mxu1 %vm2169_vm5, %v2355_v13  ;;  %4662 = vmatprep.mubr.msk.f32.mxu0 %vm2169_vm5, %v2355_v13 }
 0x6cb   : > { %4624 = vmatmul.mubr.msk.f32.gmra.mrb[42].mxu1 %vm2169_vm5, %v2356_v56  ;;  %4663 = vmatmul.mubr.msk.f32.gmra.mrb[28].mxu0 %vm2169_vm5, %v2356_v56  ;;  %v2358_v20 = vmax.f32 %v2346_v39, 0.0 }
 0x6cc   : > { %v2357_v18 = vmax.f32 %v2345_v59, 0.0  ;;  %4628 = vmatprep.mubr.msk.f32.mxu1 %vm2169_vm5, %v2347_v17 }
 0x6ce   : > { %4665 = vmatprep.mubr.msk.f32.mxu0 %vm2169_vm5, %v2357_v18 }
 0x6cf   : > { %4629 = vmatmul.mubr.msk.f32.vlgmr.msra.gmra.mrb[36].mxu1 %vm2169_vm5, %v2348_v19  ;;  %4666 = vmatmul.mubr.msk.f32.gmra.mrb[30].mxu0 %vm2169_vm5, %v2358_v20 }
 0x6d0   : > { %4631 = vmatprep.mubr.msk.f32.mxu1 %vm2169_vm5, %v2349_v42  ;;  %4641 = vmatpush3.msk.msra.mxu1 %vm2206_vm4, %v2609_v41 }
 0x6d3   : > { %4632 = vmatmul.mubr.msk.f32.gmra.mrb[38].mxu1 %vm2169_vm5, %v2350_v46 }
 0x6d4   : > { %4634 = vmatprep.mubr.msk.f32.mxu1 %vm2169_vm5, %v2351_v43 }
 0x6d7   : > { %4635 = vmatmul.mubr.msk.f32.gmra.mrb[40].mxu1 %vm2169_vm5, %v2352_v58 }
 0x6d8   : > { %4637 = vmatprep.mubr.msk.f32.mxu1 %vm2169_vm5, %v2353_v4 }
 0x6db   : > { %4638 = vmatmul.mubr.msk.f32.gmra.mrb[42].mxu1 %vm2169_vm5, %v2354_v36 }
 0x6dc   : > { %4642 = vmatprep.mubr.msk.f32.mxu1 %vm2169_vm5, %v2351_v43 }
 0x6df   : > { %4643 = vmatmul.mubr.msk.f32.vlgmr.msra.gmra.mrb[36].mxu1 %vm2169_vm5, %v2352_v58 }
 0x6e0   : > { %4645 = vmatprep.mubr.msk.f32.mxu1 %vm2169_vm5, %v2353_v4 }
 0x6e3   : > { %4646 = vmatmul.mubr.msk.f32.gmra.mrb[38].mxu1 %vm2169_vm5, %v2354_v36 }
 0x6e4   : > { %4648 = vmatprep.mubr.msk.f32.mxu1 %vm2169_vm5, %v2355_v13 }
 0x6e7   : > { %4649 = vmatmul.mubr.msk.f32.gmra.mrb[40].mxu1 %vm2169_vm5, %v2356_v56 }
 0x6e8   : > { %4651 = vmatprep.mubr.msk.f32.mxu1 %vm2169_vm5, %v2357_v18 }
 0x6eb   : > { %4652 = vmatmul.mubr.msk.f32.gmra.mrb[42].mxu1 %vm2169_vm5, %v2358_v20 }
 0x796   : > { %v4658_v37 = vpop.f32.mrb[24].mxu0 }
 0x797   : > { %v2824_v62 = vpop.f32.mrb[25].mxu0  ;;  %v2830_v54 = vadd.f32 %v4658_v37, %v4245_v24 }
 0x798   : > { %v2825_v0 = vadd.f32 %v4245_v24, %v2824_v62 }
 0x79a   : > { %v4661_v1 = vpop.f32.mrb[26].mxu0 }
 0x79b   : > { %v2834_v21 = vpop.f32.mrb[27].mxu0  ;;  %v2840_v31 = vadd.f32 %v4661_v1, %v4245_v24 }
 0x79c   : > { %v2835_v33 = vadd.f32 %v4245_v24, %v2834_v21 }
 0x79e   : > { %v4664_v22 = vpop.f32.mrb[28].mxu0 }
 0x79f   : > { %v2844_v47 = vpop.f32.mrb[29].mxu0  ;;  %v2850_v50 = vadd.f32 %v4664_v22, %v4245_v24 }
 0x7a0   : > { %v2845_v53 = vadd.f32 %v4245_v24, %v2844_v47 }
 0x7a2   : > { %v4667_v44 = vpop.f32.mrb[30].mxu0 }
 0x7a3   : > { %v2854_v23 = vpop.f32.mrb[31].mxu0  ;;  %v2860_v61 = vadd.f32 %v4667_v44, %v4245_v24 }
 0x7a4   : > { %v2855_v4 = vadd.f32 %v4245_v24, %v2854_v23 }
 0x7b2   : > { %v4644_v25 = vpop.f32.mrb[36].mxu1 }
 0x7b3   : > { %v2740_v27 = vadd.f32 %v4644_v25, %v4244_v57  ;;  %v2685_v3 = vpop.f32.mrb[37].mxu1 }
 0x7b4   : > { %v2739_v28 = vadd.f32 %v4244_v57, %v2685_v3 }
 0x7b5   : > { %v4256_v29 = vmul.f32 -1.442695, %v2740_v27  ;;  %v6562_v16 = vadd.f32 %v2830_v54, %v2740_v27 }
 0x7b6   : > { %v4255_v30 = vmul.f32 -1.442695, %v2739_v28  ;;  %v4647_v11 = vpop.f32.mrb[38].mxu1  ;;  %v6564_v26 = vadd.f32 %v2825_v0, %v2739_v28 }
 0x7b7   : > { %v2742_v32 = vadd.f32 %v4647_v11, %v4244_v57  ;;  %v2695_v38 = vpop.f32.mrb[39].mxu1  ;;  %5039 = vpow2.f32 %v4256_v29 }
 0x7b8   : > { %v2741_v40 = vadd.f32 %v4244_v57, %v2695_v38  ;;  %5041 = vpow2.f32 %v4255_v30 }
 0x7b9   : > { %v4258_v42 = vmul.f32 -1.442695, %v2742_v32  ;;  %v6566_v45 = vadd.f32 %v2840_v31, %v2742_v32 }
 0x7ba   : > { %v4257_v46 = vmul.f32 -1.442695, %v2741_v40  ;;  %v4650_v35 = vpop.f32.mrb[40].mxu1  ;;  %v6568_v49 = vadd.f32 %v2835_v33, %v2741_v40 }
 0x7bb   : > { %5043 = vpow2.f32 %v4258_v42  ;;  %v2744_v41 = vadd.f32 %v4650_v35, %v4244_v57  ;;  %v2705_v51 = vpop.f32.mrb[41].mxu1 }
 0x7bc   : > { %5045 = vpow2.f32 %v4257_v46  ;;  %v2743_v43 = vadd.f32 %v4244_v57, %v2705_v51 }
 0x7bd   : > { %v4260_v55 = vmul.f32 -1.442695, %v2744_v41  ;;  %v6570_v58 = vadd.f32 %v2850_v50, %v2744_v41 }
 0x7be   : > { %v4259_v60 = vmul.f32 -1.442695, %v2743_v43  ;;  %v4653_v34 = vpop.f32.mrb[42].mxu1  ;;  %v6572_v48 = vadd.f32 %v2845_v53, %v2743_v43 }
 0x7bf   : > { %5047 = vpow2.f32 %v4260_v55  ;;  %v2746_v63 = vadd.f32 %v4653_v34, %v4244_v57  ;;  %v2715_v2 = vpop.f32.mrb[43].mxu1 }
 0x7c0   : > { %5049 = vpow2.f32 %v4259_v60  ;;  %v2745_v5 = vadd.f32 %v4244_v57, %v2715_v2 }
 0x7c1   : > { %v4262_v6 = vmul.f32 -1.442695, %v2746_v63  ;;  %v6574_v36 = vadd.f32 %v2860_v61, %v2746_v63  ;;  %v5040_v52 = vpop.eup %5039 }
 0x7c2   : > { %v4261_v7 = vmul.f32 -1.442695, %v2745_v5  ;;  %v6576_v8 = vadd.f32 %v2855_v4, %v2745_v5  ;;  %v5042_v9 = vpop.eup %5041  ;;  %v2896_v15 = vadd.f32 1.0, %v5040_v52 }
 0x7c3   : > { %5051 = vpow2.f32 %v4262_v6  ;;  %v2895_v39 = vadd.f32 1.0, %v5042_v9 }
 0x7c4   : > { %5053 = vpow2.f32 %v4261_v7 }
 0x7c5   : > { %v5044_v10 = vpop.eup %5043 }
 0x7c6   : > { %v5046_v12 = vpop.eup %5045  ;;  %v2898_v13 = vadd.f32 1.0, %v5044_v10 }
 0x7c7   : > { %v2897_v14 = vadd.f32 1.0, %v5046_v12 }
 0x7c8   : > { %5055 = vrcp.f32 %v2898_v13 }
 0x7c9   : > { %v5048_v56 = vpop.eup %5047  ;;  %5057 = vrcp.f32 %v2897_v14 }
 0x7ca   : > { %v5050_v17 = vpop.eup %5049  ;;  %5059 = vrcp.f32 %v2896_v15  ;;  %v2900_v59 = vadd.f32 1.0, %v5048_v56 }
 0x7cb   : > { %5061 = vrcp.f32 %v2895_v39  ;;  %v2899_v19 = vadd.f32 1.0, %v5050_v17 }
 0x7cc   : > { %5063 = vrcp.f32 %v2900_v59 }
 0x7cd   : > { %v5052_v18 = vpop.eup %5051  ;;  %5065 = vrcp.f32 %v2899_v19 }
 0x7ce   : > { %v5054_v20 = vpop.eup %5053  ;;  %v2902_v37 = vadd.f32 1.0, %v5052_v18 }
 0x7cf   : > { %v2901_v62 = vadd.f32 1.0, %v5054_v20 }
 0x7d0   : > { %5067 = vrcp.f32 %v2902_v37 }
 0x7d1   : > { %5069 = vrcp.f32 %v2901_v62 }
 0x7d2   : > { %v5056_v1 = vpop.eup %5055 }
 0x7d3   : > { %v5058_v21 = vpop.eup %5057  ;;  %2933 = vrot.lane.b32.xlu1 %v5056_v1, %s5661_s30 }
 0x7d4   : > { %2931 = vrot.lane.b32.xlu0 %v5058_v21, %s5661_s30  ;;  %v5060_v22 = vpop.eup %5059 }
 0x7d5   : > { %v5062_v47 = vpop.eup %5061 }
 0x7d6   : > { %v5064_v44 = vpop.eup %5063 }
 0x7d7   : > { %2929 = vrot.lane.b32.xlu1 %v5060_v22, %s5661_s30  ;;  %v5066_v23 = vpop.eup %5065 }
 0x7d8   : > { %2927 = vrot.lane.b32.xlu0 %v5062_v47, %s5661_s30 }
 0x7da   : > { %v5068_v24 = vpop.eup %5067 }
 0x7db   : > { %2937 = vrot.lane.b32.xlu1 %v5064_v44, %s5661_s30  ;;  %v5070_v57 = vpop.eup %5069 }
 0x7dc   : > { %2935 = vrot.lane.b32.xlu0 %v5066_v23, %s5661_s30 }
 0x7df   : > { %2941 = vrot.lane.b32.xlu1 %v5068_v24, %s5661_s30 }
 0x7e0   : > { %2939 = vrot.lane.b32.xlu0 %v5070_v57, %s5661_s30  ;;  %s6919_s30 = sld [smem:[#allocation55_spill]] }
 0x845   : > { %v2934_v25 = vpop.permute.xlu1 %2933 }
 0x846   : > { %v6587_v54 = vmul.f32 %v2934_v25, %v6566_v45  ;;  %v2932_v27 = vpop.permute.xlu0 %2931 }
 0x847   : > { %v6590_v3 = vmul.f32 %v2932_v27, %v6568_v49 }
 0x848   : > { %v2968_v0 = vsel %vm1825_vm2, %v6587_v54, 0.0 }
 0x849   : > { %v2930_v28 = vpop.permute.xlu1 %2929  ;;  %2969 = vadd.xlane.f32.xlu1 %v2968_v0  ;;  %v2965_v29 = vsel %vm1825_vm2, %v6590_v3, 0.0 }
 0x84a   : > { %v2928_v30 = vpop.permute.xlu0 %2927  ;;  %2966 = vadd.xlane.f32.xlu0 %v2965_v29  ;;  %v6600_v31 = vmul.f32 %v2930_v28, %v6562_v16 }
 0x84b   : > { %v6597_v11 = vmul.f32 %v2928_v30, %v6564_v26 }
 0x84c   : > { %v2962_v26 = vsel %vm1825_vm2, %v6600_v31, 0.0 }
 0x84d   : > { %v2938_v32 = vpop.permute.xlu1 %2937  ;;  %v2959_v38 = vsel %vm1825_vm2, %v6597_v11, 0.0 }
 0x84e   : > { %v2936_v33 = vpop.permute.xlu0 %2935  ;;  %2960 = vadd.xlane.f32.xlu0 %v2959_v38  ;;  %v6608_v42 = vmul.f32 %v2938_v32, %v6570_v58 }
 0x84f   : > { %v6605_v40 = vmul.f32 %v2936_v33, %v6572_v48 }
 0x850   : > { %v2974_v50 = vsel %vm1825_vm2, %v6608_v42, 0.0 }
 0x851   : > { %v2971_v45 = vsel %vm1825_vm2, %v6605_v40, 0.0  ;;  %v2942_v16 = vpop.permute.xlu1 %2941 }
 0x852   : > { %2972 = vadd.xlane.f32.xlu1 %v2971_v45  ;;  %2963 = vadd.xlane.f32.xlu0 %v2962_v26  ;;  %v2940_v46 = vpop.permute.xlu0 %2939  ;;  %v6618_v49 = vmul.f32 %v2942_v16, %v6574_v36 }
 0x853   : > { %v6615_v35 = vmul.f32 %v2940_v46, %v6576_v8 }
 0x854   : > { %v2980_v51 = vsel %vm1825_vm2, %v6618_v49, 0.0 }
 0x855   : > { %v2977_v41 = vsel %vm1825_vm2, %v6615_v35, 0.0 }
 0x856   : > { %2975 = vadd.xlane.f32.xlu0 %v2974_v50  ;;  %2978 = vadd.xlane.f32.xlu1 %v2977_v41 }
 0x85a   : > { %2981 = vadd.xlane.f32.xlu0 %v2980_v51 }
 0x8d6   : > { %v2970_v53 = vpop.xlane.xlu1 %2969 }
 0x8d7   : > { %v2987_v43 = vmul.f32 0.125, %v2970_v53  ;;  %v2967_v55 = vpop.xlane.xlu0 %2966 }
 0x8d8   : > { %v2986_v58 = vmul.f32 0.125, %v2967_v55 }
 0x8da   : > { %v2999_v60 = vadd.f32 %v2987_v43, %v2986_v58 }
 0x8db   : > { %v2961_v34 = vpop.xlane.xlu0 %2960 }
 0x8dc   : > { %v3000_v48 = vrot.slane %v2999_v60, 4  ;;  %v2984_v5 = vmul.f32 0.125, %v2961_v34 }
 0x8de   : > { %v3001_v61 = vadd.f32 %v3000_v48, %v2999_v60 }
 0x8df   : > { %v2973_v63 = vpop.xlane.xlu1 %2972  ;;  %v2964_v2 = vpop.xlane.xlu0 %2963 }
 0x8e0   : > { %v3002_v4 = vrot.slane %v3001_v61, 2  ;;  %v2985_v6 = vmul.f32 0.125, %v2964_v2  ;;  %v2988_v9 = vmul.f32 0.125, %v2973_v63 }
 0x8e2   : > { %v3003_v36 = vadd.f32 %v3002_v4, %v3001_v61  ;;  %v2992_v7 = vadd.f32 %v2985_v6, %v2984_v5  ;;  %v3485_v4 = vld [vmem:[#allocation24] sm:$0xff] }
 0x8e3   : > { %v2976_v8 = vpop.xlane.xlu0 %2975  ;;  %v2979_v13 = vpop.xlane.xlu1 %2978  ;;  %4688 = vmatprep.subr.mxu1 %v3485_v4 }
 0x8e4   : > { %v3004_v52 = vrot.slane %v3003_v36, 1  ;;  %v2993_v10 = vrot.slane %v2992_v7, 4  ;;  %v2989_v12 = vmul.f32 0.125, %v2976_v8  ;;  %v2990_v39 = vmul.f32 0.125, %v2979_v13  ;;  %4689 = vmatpush3.msra.mxu1 %v3485_v4 }
 0x8e6   : > { %v2994_v14 = vadd.f32 %v2993_v10, %v2992_v7  ;;  %v3006_v15 = vadd.f32 %v2989_v12, %v2988_v9  ;;  %v3005_v56 = vadd.f32 %v3004_v52, %v3003_v36 }
 0x8e7   : > { %v2982_v17 = vpop.xlane.xlu0 %2981 }
 0x8e8   : > { %v2995_v59 = vrot.slane %v2994_v14, 2  ;;  %v3007_v18 = vrot.slane %v3006_v15, 4  ;;  %v2991_v19 = vmul.f32 0.125, %v2982_v17  ;;  %v3022_v20 = vmul.f32 0.0625, %v3005_v56 }
 0x8ea   : > { %v2996_v37 = vadd.f32 %v2995_v59, %v2994_v14  ;;  %v3008_v62 = vadd.f32 %v3007_v18, %v3006_v15  ;;  %v3013_v1 = vadd.f32 %v2991_v19, %v2990_v39  ;;  %v6627_v21 = vsub.f32 %v6587_v54, %v3022_v20 }
 0x8eb   : > { %v6630_v22 = vsub.f32 %v6590_v3, %v3022_v20 }
 0x8ec   : > { %v2997_v47 = vrot.slane %v2996_v37, 1  ;;  %v3009_v44 = vrot.slane %v3008_v62, 2  ;;  %v3014_v23 = vrot.slane %v3013_v1, 4  ;;  %v3036_v24 = vmul.f32 %v6627_v21, %v6627_v21 }
 0x8ed   : > { %v3035_v57 = vmul.f32 %v6630_v22, %v6630_v22 }
 0x8ee   : > { %v3010_v25 = vadd.f32 %v3009_v44, %v3008_v62  ;;  %v3015_v27 = vadd.f32 %v3014_v23, %v3013_v1  ;;  %v3050_v0 = vsel %vm1825_vm2, %v3036_v24, 0.0  ;;  %v2998_v28 = vadd.f32 %v2997_v47, %v2996_v37 }
 0x8ef   : > { %3051 = vadd.xlane.f32.xlu0 %v3050_v0  ;;  %v3047_v54 = vsel %vm1825_vm2, %v3035_v57, 0.0 }
 0x8f0   : > { %v3011_v29 = vrot.slane %v3010_v25, 1  ;;  %v3016_v3 = vrot.slane %v3015_v27, 2  ;;  %3048 = vadd.xlane.f32.xlu1 %v3047_v54  ;;  %v3021_v30 = vmul.f32 0.0625, %v2998_v28 }
 0x8f2   : > { %v3017_v32 = vadd.f32 %v3016_v3, %v3015_v27  ;;  %v6639_v38 = vsub.f32 %v6600_v31, %v3021_v30  ;;  %v6642_v33 = vsub.f32 %v6597_v11, %v3021_v30  ;;  %v3012_v45 = vadd.f32 %v3011_v29, %v3010_v25 }
 0x8f4   : > { %v3018_v26 = vrot.slane %v3017_v32, 1  ;;  %v3034_v16 = vmul.f32 %v6639_v38, %v6639_v38  ;;  %v3033_v46 = vmul.f32 %v6642_v33, %v6642_v33  ;;  %v3023_v50 = vmul.f32 0.0625, %v3012_v45 }
 0x8f6   : > { %v3044_v41 = vsel %vm1825_vm2, %v3034_v16, 0.0  ;;  %v3041_v51 = vsel %vm1825_vm2, %v3033_v46, 0.0  ;;  %v6651_v53 = vsub.f32 %v6608_v42, %v3023_v50  ;;  %v6654_v31 = vsub.f32 %v6605_v40, %v3023_v50 }
 0x8f7   : > { %3045 = vadd.xlane.f32.xlu0 %v3044_v41  ;;  %3042 = vadd.xlane.f32.xlu1 %v3041_v51  ;;  %v3019_v11 = vadd.f32 %v3018_v26, %v3017_v32 }
 0x8f8   : > { %v3038_v43 = vmul.f32 %v6651_v53, %v6651_v53  ;;  %v3037_v55 = vmul.f32 %v6654_v31, %v6654_v31 }
 0x8f9   : > { %v3024_v58 = vmul.f32 0.0625, %v3019_v11 }
 0x8fa   : > { %v3056_v60 = vsel %vm1825_vm2, %v3038_v43, 0.0  ;;  %v3053_v34 = vsel %vm1825_vm2, %v3037_v55, 0.0 }
 0x8fb   : > { %3057 = vadd.xlane.f32.xlu0 %v3056_v60  ;;  %3054 = vadd.xlane.f32.xlu1 %v3053_v34  ;;  %v6663_v42 = vsub.f32 %v6618_v49, %v3024_v58  ;;  %v6666_v40 = vsub.f32 %v6615_v35, %v3024_v58  ;;  %v4263_v49 = vld [vmem:[%s6917_s15 + $0x8] sm:$0xff]  ;;  %v6680_v35 = vld [vmem:[%s6917_s15] sm:$0xff] }
 0x8fc   : > { %4668 = vmatprep.subr.mxu0 %v4263_v49 }
 0x8fd   : > { %v3040_v48 = vmul.f32 %v6663_v42, %v6663_v42  ;;  %v3039_v61 = vmul.f32 %v6666_v40, %v6666_v40  ;;  %4669 = vmatpush3.msra.mxu0 %v4263_v49 }
 0x8fe   : > { %4673 = vmatprep.subr.mxu0 %v6680_v35 }
 0x8ff   : > { %v3062_v63 = vsel %vm1825_vm2, %v3040_v48, 0.0  ;;  %v3059_v2 = vsel %vm1825_vm2, %v3039_v61, 0.0 }
 0x900   : > { %3063 = vadd.xlane.f32.xlu0 %v3062_v63  ;;  %3060 = vadd.xlane.f32.xlu1 %v3059_v2  ;;  %v3121_v63 = vld [vmem:[%s6918_s9] sm:$0xff]  ;;  %v3122_v2 = vld [vmem:[%s6918_s9 + $0x8] sm:$0xff]  ;;  %s6924_s9 = sld [smem:[#allocation62_spill]] }
 0x97c   : > { %v3052_v5 = vpop.xlane.xlu0 %3051 }
 0x97d   : > { %v3068_v6 = vmul.f32 0.125, %v3052_v5  ;;  %v3049_v36 = vpop.xlane.xlu1 %3048 }
 0x97e   : > { %v3067_v7 = vmul.f32 0.125, %v3049_v36  ;;  %v3132_v36 = vld [vmem:[%s6919_s30 + $0x8] sm:$0xff] }
 0x980   : > { %v3080_v8 = vadd.f32 %v3068_v6, %v3067_v7  ;;  %v3131_v6 = vld [vmem:[%s6919_s30] sm:$0xff] }
 0x982   : > { %v3081_v52 = vrot.slane %v3080_v8, 4 }
 0x984   : > { %v3082_v9 = vadd.f32 %v3081_v52, %v3080_v8  ;;  %v3046_v10 = vpop.xlane.xlu0 %3045  ;;  %v3043_v12 = vpop.xlane.xlu1 %3042 }
 0x985   : > { %v3066_v13 = vmul.f32 0.125, %v3046_v10  ;;  %v3065_v14 = vmul.f32 0.125, %v3043_v12 }
 0x986   : > { %v3083_v15 = vrot.slane %v3082_v9, 2 }
 0x987   : > { %v3073_v56 = vadd.f32 %v3066_v13, %v3065_v14 }
 0x988   : > { %v3084_v39 = vadd.f32 %v3083_v15, %v3082_v9  ;;  %v3058_v17 = vpop.xlane.xlu0 %3057  ;;  %v3055_v59 = vpop.xlane.xlu1 %3054 }
 0x989   : > { %v3074_v18 = vrot.slane %v3073_v56, 4  ;;  %v3070_v19 = vmul.f32 0.125, %v3058_v17  ;;  %v3069_v20 = vmul.f32 0.125, %v3055_v59 }
 0x98a   : > { %v3085_v37 = vrot.slane %v3084_v39, 1 }
 0x98b   : > { %v3075_v62 = vadd.f32 %v3074_v18, %v3073_v56  ;;  %v3087_v1 = vadd.f32 %v3070_v19, %v3069_v20 }
 0x98c   : > { %v3086_v47 = vadd.f32 %v3085_v37, %v3084_v39 }
 0x98d   : > { %v3076_v44 = vrot.slane %v3075_v62, 2  ;;  %v3088_v23 = vrot.slane %v3087_v1, 4  ;;  %v3064_v24 = vpop.xlane.xlu0 %3063  ;;  %v3061_v57 = vpop.xlane.xlu1 %3060 }
 0x98e   : > { %v3102_v25 = vmul.f32 0.0625, %v3086_v47  ;;  %v3072_v27 = vmul.f32 0.125, %v3064_v24  ;;  %v3071_v0 = vmul.f32 0.125, %v3061_v57  ;;  %v4274_v24 = vld [vmem:[#allocation23] ss:$0 sm:$0xff] }
 0x98f   : > { %v3077_v28 = vadd.f32 %v3076_v44, %v3075_v62  ;;  %v3089_v54 = vadd.f32 %v3088_v23, %v3087_v1  ;;  %v4275_v23 = vld [vmem:[#allocation26] ss:$0 sm:$0xff] }
 0x990   : > { %v3106_v29 = vadd.f32 1e-05, %v3102_v25  ;;  %v3094_v3 = vadd.f32 %v3072_v27, %v3071_v0 }
 0x991   : > { %v3078_v30 = vrot.slane %v3077_v28, 1  ;;  %v3090_v32 = vrot.slane %v3089_v54, 2 }
 0x992   : > { %5071 = vrsqrt.f32 %v3106_v29  ;;  %v3095_v45 = vrot.slane %v3094_v3, 4 }
 0x993   : > { %v3079_v26 = vadd.f32 %v3078_v30, %v3077_v28  ;;  %v3091_v16 = vadd.f32 %v3090_v32, %v3089_v54 }
 0x994   : > { %v3096_v46 = vadd.f32 %v3095_v45, %v3094_v3 }
 0x995   : > { %v3101_v50 = vmul.f32 0.0625, %v3079_v26  ;;  %v3092_v41 = vrot.slane %v3091_v16, 1 }
 0x996   : > { %v3097_v51 = vrot.slane %v3096_v46, 2 }
 0x997   : > { %v3105_v11 = vadd.f32 1e-05, %v3101_v50  ;;  %v3093_v43 = vadd.f32 %v3092_v41, %v3091_v16 }
 0x998   : > { %v3098_v55 = vadd.f32 %v3097_v51, %v3096_v46 }
 0x999   : > { %5073 = vrsqrt.f32 %v3105_v11  ;;  %v3103_v58 = vmul.f32 0.0625, %v3093_v43 }
 0x99a   : > { %v3099_v60 = vrot.slane %v3098_v55, 1 }
 0x99b   : > { %v3107_v34 = vadd.f32 1e-05, %v3103_v58 }
 0x99c   : > { %v5072_v48 = vpop.eup %5071  ;;  %v3100_v61 = vadd.f32 %v3099_v60, %v3098_v55 }
 0x99d   : > { %v3116_v49 = vmul.f32 %v5072_v48, %v6627_v21  ;;  %5075 = vrsqrt.f32 %v3107_v34  ;;  %v3115_v4 = vmul.f32 %v5072_v48, %v6630_v22  ;;  %v4268_v21 = vld [vmem:[%s6917_s15 + $0x10] sm:$0xff] }
 0x99e   : > { %v3104_v5 = vmul.f32 0.0625, %v3100_v61 }
 0x99f   : > { %v3125_v7 = vmul.f32 %v3121_v63, %v3115_v4  ;;  %v3126_v8 = vmul.f32 %v3122_v2, %v3116_v49 }
 0x9a0   : > { %v3108_v52 = vadd.f32 1e-05, %v3104_v5 }
 0x9a1   : > { %v3135_v9 = vadd.f32 %v3131_v6, %v3125_v7  ;;  %v3136_v10 = vadd.f32 %v3132_v36, %v3126_v8 }
 0x9a2   : > { %5077 = vrsqrt.f32 %v3108_v52 }
 0x9a3   : > { %v5074_v12 = vpop.eup %5073  ;;  %4670 = vmatprep.mubr.msk.f32.mxu0 %vm1825_vm2, %v3135_v9 }
 0x9a4   : > { %4671 = vmatmul.mubr.msk.f32.vlgmr.msra.gmra.mrb[32].mxu0 %vm1825_vm2, %v3136_v10  ;;  %v3113_v22 = vmul.f32 %v5074_v12, %v6642_v33  ;;  %v3114_v13 = vmul.f32 %v5074_v12, %v6639_v38  ;;  %v4271_v33 = vld [vmem:[%s6917_s15 + $0x18] sm:$0xff] }
 0x9a5   : > { %4674 = vmatpush3.msra.mxu0 %v6680_v35 }
 0x9a6   : > { %v3123_v14 = vmul.f32 %v3121_v63, %v3113_v22  ;;  %v3124_v15 = vmul.f32 %v3122_v2, %v3114_v13  ;;  %4678 = vmatprep.subr.mxu0 %v4268_v21  ;;  %v3641_v13 = vld [vmem:[#allocation27] sm:$0xff] }
 0x9a7   : > { %v5076_v56 = vpop.eup %5075 }
 0x9a8   : > { %v3133_v39 = vadd.f32 %v3131_v6, %v3123_v14  ;;  %v3134_v17 = vadd.f32 %v3132_v36, %v3124_v15  ;;  %v3117_v59 = vmul.f32 %v5076_v56, %v6654_v31  ;;  %v3118_v19 = vmul.f32 %v5076_v56, %v6651_v53  ;;  %v3642_v14 = vld [vmem:[#allocation27 + $0x8] sm:$0xff] }
 0x9a9   : > { %v4731_v15 = vpack.c.bf16 %v3642_v14, %v3641_v13 }
 0x9aa   : > { %4675 = vmatprep.mubr.msk.f32.mxu0 %vm1825_vm2, %v3133_v39  ;;  %v3127_v18 = vmul.f32 %v3121_v63, %v3117_v59  ;;  %v3128_v31 = vmul.f32 %v3122_v2, %v3118_v19 }
 0x9ab   : > { %4732 = vmatprep.subr.bf16.mxu1 %v4731_v15 }
 0x9ac   : > { %v5078_v38 = vpop.eup %5077  ;;  %4676 = vmatmul.mubr.msk.f32.vlgmr.msra.gmra.mrb[32].mxu0 %vm1825_vm2, %v3134_v17  ;;  %v3137_v35 = vadd.f32 %v3131_v6, %v3127_v18  ;;  %v3138_v44 = vadd.f32 %v3132_v36, %v3128_v31 }
 0x9ad   : > { %v3120_v20 = vmul.f32 %v5078_v38, %v6663_v42  ;;  %4679 = vmatpush3.msra.mxu0 %v4268_v21  ;;  %v3119_v37 = vmul.f32 %v5078_v38, %v6666_v40 }
 0x9ae   : > { %4680 = vmatprep.mubr.msk.f32.mxu0 %vm1825_vm2, %v3137_v35  ;;  %4683 = vmatprep.subr.mxu0 %v4271_v33 }
 0x9af   : > { %v3129_v62 = vmul.f32 %v3121_v63, %v3119_v37  ;;  %v3130_v1 = vmul.f32 %v3122_v2, %v3120_v20 }
 0x9b1   : > { %v3139_v53 = vadd.f32 %v3131_v6, %v3129_v62  ;;  %v3140_v47 = vadd.f32 %v3132_v36, %v3130_v1 }
 0x9b3   : > { %4690 = vmatprep.mubr.msk.f32.mxu1 %vm1825_vm2, %v3139_v53 }
 0x9b4   : > { %4681 = vmatmul.mubr.msk.f32.vlgmr.msra.gmra.mrb[32].mxu0 %vm1825_vm2, %v3138_v44  ;;  %4691 = vmatmul.mubr.msk.f32.vlgmr.msra.gmra.mrb[44].mxu1 %vm1825_vm2, %v3140_v47 }
 0x9b5   : > { %4684 = vmatpush3.msra.mxu0 %v4271_v33  ;;  %4685 = vmatprep.mubr.msk.f32.mxu0 %vm1825_vm2, %v3139_v53  ;;  %v3633_v53 = vld [vmem:[%s6920_s2] sm:$0xff] }
 0x9b6   : > { %4734 = vmatpush3.bf16.msra.mxu1 %v4731_v15 }
 0x9bc   : > { %4686 = vmatmul.mubr.msk.f32.vlgmr.msra.gmra.mrb[32].mxu0 %vm1825_vm2, %v3140_v47  ;;  %v3634_v47 = vld [vmem:[%s6920_s2 + $0x8] sm:$0xff]  ;;  %s4286_s2 = sshll.u32 %s5823_s0, 4  ;;  %s5663_s0 = smov [#allocation29]  }
 0x9bd   : > { %s6754_s18 = scalar_lea.hbm %s6924_s9, %s4286_s2  ;;  %s5543_s12 = sshll.u32 %s5663_s0, 4  ;;  %s5544_s12 = int_to_ptr.vmem [resolvable:$false] %s5543_s12 }
 0x9be   : > { %s5545_s15 = scalar_lea.vmem %s5544_s12, 32 }
 0xa87   : > { %v4692_v42 = vpop.f32.mrb[44].mxu1 }
 0xa88   : > { %v3559_v40 = vpop.f32.mrb[45].mxu1  ;;  %v3565_v25 = vadd.f32 %v4692_v42, %v4275_v23 }
 0xa89   : > { %v3560_v28 = vadd.f32 %v4275_v23, %v3559_v40  ;;  %v3637_v40 = vld [vmem:[%s6921_s5] sm:$0xff]  ;;  %v3638_v23 = vld [vmem:[%s6921_s5 + $0x8] sm:$0xff] }
 0xa8f   : > { %v4687_v57 = vpop.f32.mrb[32].mxu0 }
 0xa90   : > { %v3484_v27 = vadd.f32 %v4687_v57, %v4274_v24  ;;  %v3465_v0 = vpop.f32.mrb[33].mxu0 }
 0xa91   : > { %v3483_v54 = vadd.f32 %v4274_v24, %v3465_v0  ;;  %v3733_v0 = vld [vmem:[%s6922_s27] sm:$0xff] }
 0xa92   : > { %v4279_v29 = vmul.f32 -1.442695, %v3484_v27  ;;  %v3569_v3 = vadd.f32 %v3565_v25, %v3484_v27 }
 0xa93   : > { %v4278_v30 = vmul.f32 -1.442695, %v3483_v54  ;;  %v3568_v32 = vadd.f32 %v3560_v28, %v3483_v54  ;;  %v3734_v28 = vld [vmem:[%s6922_s27 + $0x8] sm:$0xff] }
 0xa94   : > { %5079 = vpow2.f32 %v4279_v29  ;;  %v4735_v54 = vpack.c.bf16 %v3734_v28, %v3733_v0  ;;  %v4280_v29 = vld [vmem:[%s6923_s14] ss:$0 sm:$0xff]  ;;  %s3858_s14 = scalar_lea.sflag [#allocation5], %s6213_s16 }
 0xa95   : > { %5081 = vpow2.f32 %v4278_v30 }
 0xa96   : > { %4736 = vmatprep.subr.bf16.mxu0 %v4735_v54 }
 0xa97   : > { %4738 = vmatpush3.bf16.msra.mxu0 %v4735_v54 }
 0xa9e   : > { %v5080_v45 = vpop.eup %5079 }
 0xa9f   : > { %v5082_v26 = vpop.eup %5081  ;;  %v3577_v16 = vadd.f32 1.0, %v5080_v45 }
 0xaa0   : > { %v3576_v46 = vadd.f32 1.0, %v5082_v26 }
 0xaa1   : > { %5083 = vrcp.f32 %v3577_v16 }
 0xaa2   : > { %5085 = vrcp.f32 %v3576_v46  ;;  %v4283_v46 = vld [vmem:[#allocation2] ss:$0 sm:$0xff] }
 0xaab   : > { %v5084_v50 = vpop.eup %5083 }
 0xaac   : > { %v5086_v41 = vpop.eup %5085  ;;  %3586 = vrot.lane.b32.xlu0 %v5084_v50, %s5662_s1 }
 0xaad   : > { %3584 = vrot.lane.b32.xlu1 %v5086_v41, %s5662_s1  ;;  %s998_s1 = scalar_lea.vmem [#allocation29], %s6213_s16 }
 0xaae   : > { %s3870_s11 = sshll.u32 %s998_s1, 4  ;;  %s6756_s11 = int_to_ptr.vmem [resolvable:$true] %s3870_s11 }
 0xaaf   : > { %s5539_s5 = scalar_lea.vmem %s6756_s11, 16  ;;  %p5546_p7 = scmp.lt.s32.totalorder %s6756_s11, %s5544_s12 }
 0xab0   : > { %p5540_p11 = scmp.ne.s32.totalorder %s6756_s11, %s5539_s5  ;;  %p5547_p10 = scmp.lt.s32.totalorder %s5545_s15, %s5539_s5 }
 0xab2   : > { %p5541_p5 = pnand %p5540_p11, %p6925_p8  ;;  %p5548_p12 = por %p5547_p10, %p5546_p7 }
 0xab4   : > { %p5542_p9 = pneg %p5541_p5 }
 0xab6   : > { %p5549_p13 = pnand %p5548_p12, %p5542_p9 }
 0xb1e   : > { %v3587_v51 = vpop.permute.xlu0 %3586 }
 0xb1f   : > { %v3591_v11 = vmul.f32 %v3587_v51, %v3569_v3  ;;  %v3585_v43 = vpop.permute.xlu1 %3584 }
 0xb20   : > { %v3590_v55 = vmul.f32 %v3585_v43, %v3568_v32 }
 0xb21   : > { %v3596_v58 = vsel %vm3592_vm6, %v3591_v11, 0.0 }
 0xb22   : > { %3597 = vadd.xlane.f32.xlu0 %v3596_v58  ;;  %v3593_v60 = vsel %vm3592_vm6, %v3590_v55, 0.0 }
 0xb23   : > { %3594 = vadd.xlane.f32.xlu1 %v3593_v60 }
 0xbaf   : > { %v3598_v34 = vpop.xlane.xlu0 %3597 }
 0xbb0   : > { %v3600_v48 = vmul.f32 0.0625, %v3598_v34  ;;  %v3595_v61 = vpop.xlane.xlu1 %3594 }
 0xbb1   : > { %v3599_v63 = vmul.f32 0.0625, %v3595_v61 }
 0xbb3   : > { %v3601_v2 = vadd.f32 %v3600_v48, %v3599_v63 }
 0xbb5   : > { %v3602_v49 = vrot.slane %v3601_v2, 4 }
 0xbb7   : > { %v3603_v4 = vadd.f32 %v3602_v49, %v3601_v2 }
 0xbb9   : > { %v3604_v5 = vrot.slane %v3603_v4, 2 }
 0xbbb   : > { %v3605_v6 = vadd.f32 %v3604_v5, %v3603_v4 }
 0xbbd   : > { %v3606_v36 = vrot.slane %v3605_v6, 1 }
 0xbbf   : > { %v3607_v7 = vadd.f32 %v3606_v36, %v3605_v6 }
 0xbc1   : > { %v3608_v8 = vmul.f32 0.0625, %v3607_v7 }
 0xbc3   : > { %v3610_v52 = vsub.f32 %v3591_v11, %v3608_v8  ;;  %v3609_v9 = vsub.f32 %v3590_v55, %v3608_v8 }
 0xbc5   : > { %v3612_v10 = vmul.f32 %v3610_v52, %v3610_v52  ;;  %v3611_v12 = vmul.f32 %v3609_v9, %v3609_v9 }
 0xbc7   : > { %v3616_v21 = vsel %vm3592_vm6, %v3612_v10, 0.0  ;;  %v3613_v22 = vsel %vm3592_vm6, %v3611_v12, 0.0 }
 0xbc8   : > { %3617 = vadd.xlane.f32.xlu0 %v3616_v21  ;;  %3614 = vadd.xlane.f32.xlu1 %v3613_v22 }
 0xc55   : > { %v3618_v56 = vpop.xlane.xlu0 %3617  ;;  %v3615_v39 = vpop.xlane.xlu1 %3614 }
 0xc56   : > { %v3620_v17 = vmul.f32 0.0625, %v3618_v56  ;;  %v3619_v59 = vmul.f32 0.0625, %v3615_v39 }
 0xc58   : > { %v3621_v18 = vadd.f32 %v3620_v17, %v3619_v59 }
 0xc5a   : > { %v3622_v19 = vrot.slane %v3621_v18, 4 }
 0xc5c   : > { %v3623_v33 = vadd.f32 %v3622_v19, %v3621_v18 }
 0xc5e   : > { %v3624_v38 = vrot.slane %v3623_v33, 2 }
 0xc60   : > { %v3625_v35 = vadd.f32 %v3624_v38, %v3623_v33 }
 0xc62   : > { %v3626_v20 = vrot.slane %v3625_v35, 1 }
 0xc64   : > { %v3627_v37 = vadd.f32 %v3626_v20, %v3625_v35 }
 0xc66   : > { %v3628_v31 = vmul.f32 0.0625, %v3627_v37 }
 0xc68   : > { %v3629_v62 = vadd.f32 1e-05, %v3628_v31 }
 0xc6a   : > { %5087 = vrsqrt.f32 %v3629_v62 }
 0xc74   : > { %v5088_v1 = vpop.eup %5087 }
 0xc75   : > { %v3631_v44 = vmul.f32 %v5088_v1, %v3609_v9  ;;  %v3632_v42 = vmul.f32 %v5088_v1, %v3610_v52 }
 0xc77   : > { %v3635_v24 = vmul.f32 %v3633_v53, %v3631_v44  ;;  %v3636_v57 = vmul.f32 %v3634_v47, %v3632_v42 }
 0xc79   : > { %v3639_v25 = vadd.f32 %v3637_v40, %v3635_v24  ;;  %v3640_v27 = vadd.f32 %v3638_v23, %v3636_v57 }
 0xc7b   : > { %4697 = vmatprep.mubr.msk.f32.mxu1 %vm3592_vm6, %v3639_v25 }
 0xc7c   : > { %4698 = vmatmul.mubr.msk.f32.vlgmr.msra.gmra.mrb[46].mxu1 %vm3592_vm6, %v3640_v27 }
 0xd4f   : > { %v4699_v3 = vpop.f32.mrb[46].mxu1 }
 0xd50   : > { %v3728_v30 = vadd.f32 %v4699_v3, %v4280_v29  ;;  %v3722_v32 = vpop.f32.mrb[47].mxu1 }
 0xd51   : > { %v3723_v45 = vadd.f32 %v4280_v29, %v3722_v32 }
 0xd52   : > { %v3732_v16 = vmax.f32 %v3728_v30, 0.0 }
 0xd53   : > { %v3731_v26 = vmax.f32 %v3723_v45, 0.0 }
 0xd55   : > { %4704 = vmatprep.mubr.msk.f32.mxu0 %vm3592_vm6, %v3731_v26 }
 0xd56   : > { %4705 = vmatmul.mubr.msk.f32.vlgmr.msra.gmra.mrb[34].mxu0 %vm3592_vm6, %v3732_v16 }
 0xe29   : > { %v4706_v50 = vpop.f32.mrb[34].mxu0 }
 0xe2a   : > { %v3814_v41 = vpop.f32.mrb[35].mxu0  ;;  %v3820_v11 = vadd.f32 %v4706_v50, %v4283_v46 }
 0xe2b   : > { %v3815_v51 = vadd.f32 %v4283_v46, %v3814_v41 }
 0xe2d   : > { %3823 = vxpose.xlu1.b32.start [1/2] (short) (narrow) %v3815_v51, 8 }
 0xe31   : > { %3824 = vxpose.xlu1.b32.end [2/2] (short) (narrow) %v3820_v11, 8 }
 0xead   : > { %v3839_v43 = vpop.trf.xlu1 }
 0xeae   : > { %3856 = vst.msk [vmem:[%s998_s1] sm:$0x1] %vm3855_vm7, %v3839_v43 }
 0xeaf   : > { %5552 = shalt.err (!%p5549_p13)
}
 0xeb0   : > { %s5553_s16 = scalar_lea.hbm %s6754_s18, 16  ;;  %s5557_s6 = scalar_lea.hbm %s6924_s9, 32 }
 0xeb1   : > { %p5554_p1 = scmp.ne.s32.totalorder %s6754_s18, %s5553_s16  ;;  %p5558_p0 = scmp.lt.u32.totalorder %s6754_s18, %s6924_s9 }
 0xeb2   : > { %p5559_p6 = scmp.lt.u32.totalorder %s5557_s6, %s5553_s16  ;;  %p5561_p11 = scmp.lt.u32.totalorder %s5553_s16, %s6754_s18 }
 0xeb3   : > { %p5555_p3 = pnand %p5554_p1, %p6925_p8 }
 0xeb4   : > { %p5560_p4 = por %p5559_p6, %p5558_p0 }
 0xeb5   : > { %p5556_p2 = pneg %p5555_p3 }
 0xeb6   : > { %p5562_p5 = por %p5561_p11, %p5560_p4 }
 0xeb8   : > { %p5563_p9 = pnand %p5562_p5, %p5556_p2 }
 0xeba   : > { %5566 = shalt.err (!%p5563_p9)
}
 0xebb   : > { %4847 = dma.vmem_to_hbm [thread:$0]  (%p6925_p8), %s6756_s11, 16, %s6754_s18, %s3858_s14  }
 0xebc PF: > { %s3882_s15 = sand.u32 1, %s5625_s7   ;;  %p6926_p7 = scmp.ne.s32.totalorder %s6895_s13, 0 }
 0xebd   : > { %p6927_p10 = scmp.ge.s32.totalorder %s5637_s25, 2  ;;  %s3883_s5 = scalar_lea.sflag [#allocation5], %s3882_s15 }
 0xebf   : > { %p4900_p12 = pnand %p6927_p10, %p6926_p7 }
 0xec1   : > { %5620 = dma.done.wait (!%p4900_p12), %s3883_s5, 16  }
 0xec2   : > { %5622 = vsyncadd (!%p4900_p12), %s3883_s5, 4294967280  ;;  %p49_p13 = scmp.ge.s32.totalorder %s6143_s3, 4   ;;  %s6928_s7 = smov %s5629_s28 }
 0xec3   : > { %s6929_s28 = smov %s5633_s8  ;;  %s6930_s8 = smov %s6155_s24 }
 0xec4   : > { %s6931_s25 = smov %s6143_s3  ;;  %51 = sbr.rel (!%p49_p13) target bundleno = 37 (0x25), region = 236 }
 0xecb   :  { %3887 = vsyncpa [#allocation4], 1 }
 0xecc   :  { %3889 = vsyncpa [#allocation4 + $0x1], 1 }
 0xecd   :  { %3890 = vsyncpa [#allocation7], 1 }
 0xece   :  { %3891 = vsyncpa [#allocation10], 1 }
 0xecf   :  { %3892 = vsyncpa [#allocation13], 1 }
 0xed0   :  { %3893 = vsyncpa [#allocation16], 1 }
 0xed1   :  { %3894 = vsyncpa [#allocation19], 1 }
 0xed2   :  { %3895 = vsyncpa [#allocation22], 1 }
 0xed3   :  { %3896 = vsyncpa [#allocation25], 1 }
 0xed4   :  { %3897 = vsyncpa [#allocation28], 1 }
 0xed5   :  { %3898 = vsyncpa [#allocation5], 1 }
 0xed6   :  { %3900 = vsyncpa [#allocation5 + $0x1], 1 }

</bundles_post_ra>
